<compile_context>
chip_gen: v6e
topology: v6e:2x2x1
jax: 0.10.0
libtpu: 0.0.40
codegen_flags: <defaults>
</compile_context>

<pallas_src>
import functools

import jax
import jax.numpy as jnp
from jax.experimental import pallas as pl
from jax.experimental.pallas import tpu as pltpu

# ---- scaled-down vit_small_patch16_224 config ------------------------------
IMG = 64            # real: 224
PATCH = 16          # real: 16
IN_CHANS = 3        # real: 3
EMBED_DIM = 128     # real: 384
DEPTH = 2           # real: 12
NUM_HEADS = 4       # real: 6
HEAD_DIM = EMBED_DIM // NUM_HEADS
MLP_HIDDEN = 4 * EMBED_DIM
NUM_CLASSES = 10    # the new nn.Linear head of FineTuning
HEAD_PAD = 128      # head output padded to a full lane width
LN_EPS = 1e-6       # timm ViT LayerNorm eps

ROW_TILE = 256                       # rows per block for M-tiled kernels
VMEM_LIMIT_BYTES = 32 * 1024 * 1024  # budgeted for v7x (64 MiB physical VMEM)


# ---- in-kernel helpers ------------------------------------------------------
def _gelu(x):
    # tanh-approx GELU: transcendental goes to the EUP slot instead of burning
    # ~10 VALU ops/elem on an erf polynomial (matters on v5e's f32-only VPU).
    # TODO(synk): nn.GELU() default is exact-erf; tanh form deviates ~1e-3.
    c = 0.7978845608028654  # sqrt(2/pi)
    return 0.5 * x * (1.0 + jnp.tanh(c * (x + 0.044715 * x * x * x)))


def _layernorm_f32(x, g, b):
    # x: [tm, D] f32; g/b: [1, D] f32.  Stats in f32 (biased var, PyTorch LN).
    mean = jnp.mean(x, axis=-1, keepdims=True)
    xc = x - mean
    var = jnp.mean(xc * xc, axis=-1, keepdims=True)
    return xc * jax.lax.rsqrt(var + LN_EPS) * g + b


def _row_grid(m):
    """Choose (row_tile, grid) for an [M, K] row-wise kernel."""
    if m <= ROW_TILE:
        return m, 1                       # single full block (legal: == full dim)
    return ROW_TILE, pl.cdiv(m, ROW_TILE)  # partial last block handled by Pallas


def _cparams():
    return pltpu.CompilerParams(
        dimension_semantics=("parallel",),
        vmem_limit_bytes=VMEM_LIMIT_BYTES)


# ---- Pallas kernels ---------------------------------------------------------
def matmul_kernel(x_ref, w_ref, b_ref, o_ref, *, activation):
    # x: [tm, K] f32, w: [K, N] bf16, b: [1, N] f32
    z = jnp.dot(x_ref[...].astype(w_ref.dtype), w_ref[...],
                preferred_element_type=jnp.float32)
    z = z + b_ref[...]
    if activation == "gelu":
        z = _gelu(z)
    o_ref[...] = z.astype(o_ref.dtype)


def ln_matmul_kernel(x_ref, g_ref, bln_ref, w_ref, b_ref, o_ref, *, activation):
    # Fused LayerNorm (f32 stats) + Linear (bf16 MXU operands, f32 accum).
    x = x_ref[...].astype(jnp.float32)
    y = _layernorm_f32(x, g_ref[...], bln_ref[...])
    z = jnp.dot(y.astype(w_ref.dtype), w_ref[...],
                preferred_element_type=jnp.float32)
    z = z + b_ref[...]
    if activation == "gelu":
        z = _gelu(z)
    o_ref[...] = z.astype(o_ref.dtype)


def mlp_block_kernel(x_ref, g_ref, bln_ref, w1_ref, b1_ref, w2_ref, b2_ref, o_ref):
    # Fused LN2 + FC1 + GELU + FC2 + residual add, one HBM pass of the tokens.
    x = x_ref[...].astype(jnp.float32)                  # also the residual
    y = _layernorm_f32(x, g_ref[...], bln_ref[...])
    h = jnp.dot(y.astype(w1_ref.dtype), w1_ref[...],
                preferred_element_type=jnp.float32) + b1_ref[...]
    h = _gelu(h)
    z = jnp.dot(h.astype(w2_ref.dtype), w2_ref[...],
                preferred_element_type=jnp.float32) + b2_ref[...]
    o_ref[...] = (x + z).astype(o_ref.dtype)


def attn_block_kernel(qkv_ref, tok_ref, wp_ref, bp_ref, o_ref, *,
                      num_heads, head_dim, scale):
    # Per grid step: one batch element.  qkv: [1, S, 3D] (cols = [q|k|v] x heads
    # x head_dim, matching the timm reshape order), tok: [1, S, D] residual.
    # Head split is done with static in-kernel slices -> no 5-D HBM transposes,
    # scores never leave VMEM.  softmax stats in f32; MXU operands bf16.
    d = num_heads * head_dim
    outs = []
    for h in range(num_heads):
        lo = h * head_dim
        q = qkv_ref[0, :, lo:lo + head_dim] * scale
        k = qkv_ref[0, :, d + lo:d + lo + head_dim]
        v = qkv_ref[0, :, 2 * d + lo:2 * d + lo + head_dim]
        s = jax.lax.dot_general(                      # q @ k^T, 2-D MXU dot
            q.astype(jnp.bfloat16), k.astype(jnp.bfloat16),
            (((1,), (1,)), ((), ())), preferred_element_type=jnp.float32)
        s = s - jnp.max(s, axis=-1, keepdims=True)
        p = jnp.exp(s)
        inv = pl.reciprocal(jnp.sum(p, axis=-1, keepdims=True), approx=True)
        o = jnp.dot(p.astype(jnp.bfloat16), v.astype(jnp.bfloat16),
                    preferred_element_type=jnp.float32) * inv
        outs.append(o)
    a = jnp.concatenate(outs, axis=-1)                # [S, D]
    z = jnp.dot(a.astype(wp_ref.dtype), wp_ref[...],  # fused output projection
                preferred_element_type=jnp.float32) + bp_ref[...]
    o_ref[0] = (tok_ref[0].astype(jnp.float32) + z).astype(o_ref.dtype)


# ---- wrappers ---------------------------------------------------------------
def linear(x, w, b, activation=None):
    """x: [M, K] f32; w: [K, N] (pre-transposed, bf16); b: [1, N] f32."""
    M, K = x.shape
    N = w.shape[1]
    tm, gm = _row_grid(M)
    kernel = functools.partial(matmul_kernel, activation=activation)
    return pl.pallas_call(
        kernel,
        out_shape=jax.ShapeDtypeStruct((M, N), x.dtype),
        grid=(gm,),
        in_specs=[pl.BlockSpec((tm, K), lambda i: (i, 0)),
                  pl.BlockSpec((K, N), lambda i: (0, 0)),
                  pl.BlockSpec((1, N), lambda i: (0, 0))],
        out_specs=pl.BlockSpec((tm, N), lambda i: (i, 0)),
        compiler_params=_cparams(),
        cost_estimate=pl.CostEstimate(
            flops=2 * M * K * N,
            transcendentals=(M * N if activation == "gelu" else 0),
            bytes_accessed=4 * M * K + 2 * K * N + 4 * M * N),
    )(x, w, b)


def ln_linear(x, g, bln, w, b, activation=None):
    """Fused LayerNorm + Linear over M-tiled rows."""
    M, K = x.shape
    N = w.shape[1]
    tm, gm = _row_grid(M)
    kernel = functools.partial(ln_matmul_kernel, activation=activation)
    return pl.pallas_call(
        kernel,
        out_shape=jax.ShapeDtypeStruct((M, N), x.dtype),
        grid=(gm,),
        in_specs=[pl.BlockSpec((tm, K), lambda i: (i, 0)),
                  pl.BlockSpec((1, K), lambda i: (0, 0)),
                  pl.BlockSpec((1, K), lambda i: (0, 0)),
                  pl.BlockSpec((K, N), lambda i: (0, 0)),
                  pl.BlockSpec((1, N), lambda i: (0, 0))],
        out_specs=pl.BlockSpec((tm, N), lambda i: (i, 0)),
        compiler_params=_cparams(),
        cost_estimate=pl.CostEstimate(
            flops=2 * M * K * N + 8 * M * K,
            transcendentals=(M * N if activation == "gelu" else 0) + M,
            bytes_accessed=4 * M * K + 2 * K * N + 4 * M * N),
    )(x, g, bln, w, b)


def mlp_block(x, g, bln, w1, b1, w2, b2):
    """Fused LN2 + FC1 + GELU + FC2 + residual; x: [M, D]."""
    M, D = x.shape
    Hd = w1.shape[1]
    tm, gm = _row_grid(M)
    return pl.pallas_call(
        mlp_block_kernel,
        out_shape=jax.ShapeDtypeStruct((M, D), x.dtype),
        grid=(gm,),
        in_specs=[pl.BlockSpec((tm, D), lambda i: (i, 0)),
                  pl.BlockSpec((1, D), lambda i: (0, 0)),
                  pl.BlockSpec((1, D), lambda i: (0, 0)),
                  pl.BlockSpec((D, Hd), lambda i: (0, 0)),
                  pl.BlockSpec((1, Hd), lambda i: (0, 0)),
                  pl.BlockSpec((Hd, D), lambda i: (0, 0)),
                  pl.BlockSpec((1, D), lambda i: (0, 0))],
        out_specs=pl.BlockSpec((tm, D), lambda i: (i, 0)),
        compiler_params=_cparams(),
        cost_estimate=pl.CostEstimate(
            flops=4 * M * D * Hd,
            transcendentals=M * Hd,
            bytes_accessed=8 * M * D + 4 * D * Hd),
    )(x, g, bln, w1, b1, w2, b2)


def attn_block(qkv, tok, wp, bp, scale):
    """Fused MHA + proj + residual.  qkv: [B, S, 3D], tok: [B, S, D]."""
    B, S, D3 = qkv.shape
    D = tok.shape[-1]
    kernel = functools.partial(attn_block_kernel, num_heads=NUM_HEADS,
                               head_dim=HEAD_DIM, scale=scale)
    return pl.pallas_call(
        kernel,
        out_shape=jax.ShapeDtypeStruct((B, S, D), tok.dtype),
        grid=(B,),
        in_specs=[pl.BlockSpec((1, S, D3), lambda b: (b, 0, 0)),
                  pl.BlockSpec((1, S, D), lambda b: (b, 0, 0)),
                  pl.BlockSpec((D, D), lambda b: (0, 0)),
                  pl.BlockSpec((1, D), lambda b: (0, 0))],
        out_specs=pl.BlockSpec((1, S, D), lambda b: (b, 0, 0)),
        compiler_params=_cparams(),
        cost_estimate=pl.CostEstimate(
            flops=B * (4 * NUM_HEADS * S * S * HEAD_DIM + 2 * S * D * D),
            transcendentals=B * NUM_HEADS * S * S,
            bytes_accessed=4 * B * S * (D3 + 3 * D) + 2 * D * D),
    )(qkv, tok, wp, bp)


# ---- parameters (deterministic init; no checkpoint load) --------------------
def init_params(key):
    # TODO(synk): pretrained timm weights cannot be loaded (no file/network
    # access); deterministic random init is used instead.
    keys = iter(jax.random.split(key, 8 + 8 * DEPTH))
    nk = lambda: next(keys)
    nrm = lambda k, shape, std=0.02: (std * jax.random.normal(k, shape)).astype(jnp.float32)
    wdt = jnp.bfloat16  # matmul weights stored bf16 (halves HBM weight traffic)

    head_w = jnp.zeros((EMBED_DIM, HEAD_PAD), jnp.float32)
    head_w = head_w.at[:, :NUM_CLASSES].set(nrm(nk(), (EMBED_DIM, NUM_CLASSES)))

    params = {
        # Conv2d(C, D, P, stride=P) weight flattened to [C*P*P, D] (pre-transposed)
        "patch_w": nrm(nk(), (IN_CHANS * PATCH * PATCH, EMBED_DIM)).astype(wdt),
        "patch_b": jnp.zeros((1, EMBED_DIM), jnp.float32),
        "cls_token": nrm(nk(), (1, 1, EMBED_DIM)),
        "pos_embed": nrm(nk(), (1, (IMG // PATCH) ** 2 + 1, EMBED_DIM)),
        "norm_g": jnp.ones((1, EMBED_DIM), jnp.float32),
        "norm_b": jnp.zeros((1, EMBED_DIM), jnp.float32),
        "head_w": head_w.astype(wdt),                     # new head, lane-padded
        "head_b": jnp.zeros((1, HEAD_PAD), jnp.float32),
        "blocks": [],
    }
    for _ in range(DEPTH):
        params["blocks"].append({
            "ln1_g": jnp.ones((1, EMBED_DIM), jnp.float32),
            "ln1_b": jnp.zeros((1, EMBED_DIM), jnp.float32),
            "qkv_w": nrm(nk(), (EMBED_DIM, 3 * EMBED_DIM)).astype(wdt),
            "qkv_b": jnp.zeros((1, 3 * EMBED_DIM), jnp.float32),
            "proj_w": nrm(nk(), (EMBED_DIM, EMBED_DIM)).astype(wdt),
            "proj_b": jnp.zeros((1, EMBED_DIM), jnp.float32),
            "ln2_g": jnp.ones((1, EMBED_DIM), jnp.float32),
            "ln2_b": jnp.zeros((1, EMBED_DIM), jnp.float32),
            "fc1_w": nrm(nk(), (EMBED_DIM, MLP_HIDDEN)).astype(wdt),
            "fc1_b": jnp.zeros((1, MLP_HIDDEN), jnp.float32),
            "fc2_w": nrm(nk(), (MLP_HIDDEN, EMBED_DIM)).astype(wdt),
            "fc2_b": jnp.zeros((1, EMBED_DIM), jnp.float32),
        })
    return params


# ---- full forward pass (FineTuning.forward == ViT forward + new head) -------
def vit_forward(params, x):
    B, C, H, W = x.shape
    P = PATCH
    hp, wp = H // P, W // P
    n = hp * wp

    # patch embed: Conv2d(C, D, P, stride=P) -> matmul over (c, ph, pw)-flattened patches
    patches = (x.reshape(B, C, hp, P, wp, P)
                .transpose(0, 2, 4, 1, 3, 5)
                .reshape(B * n, C * P * P))
    tok = linear(patches, params["patch_w"], params["patch_b"]).reshape(B, n, EMBED_DIM)

    # prepend cls token, add positional embedding (cheap, stays in JAX)
    cls = jnp.broadcast_to(params["cls_token"], (B, 1, EMBED_DIM))
    tok = jnp.concatenate([cls, tok], axis=1) + params["pos_embed"]
    S = n + 1
    M = B * S
    scale = HEAD_DIM ** -0.5

    for blk in params["blocks"]:
        # 1) LN1 + QKV projection (fused)
        qkv = ln_linear(tok.reshape(M, EMBED_DIM),
                        blk["ln1_g"], blk["ln1_b"], blk["qkv_w"], blk["qkv_b"])
        # 2) multi-head attention + output proj + residual (fused, grid over B)
        tok = attn_block(qkv.reshape(B, S, 3 * EMBED_DIM), tok,
                         blk["proj_w"], blk["proj_b"], scale)
        # 3) LN2 + MLP + residual (fused)
        tok = mlp_block(tok.reshape(M, EMBED_DIM),
                        blk["ln2_g"], blk["ln2_b"],
                        blk["fc1_w"], blk["fc1_b"],
                        blk["fc2_w"], blk["fc2_b"]).reshape(B, S, EMBED_DIM)

    # final norm fused with the new linear head (global_pool='token': cls only).
    cls_tok = tok[:, 0]                                   # [B, D]
    logits = ln_linear(cls_tok, params["norm_g"], params["norm_b"],
                       params["head_w"], params["head_b"])[:, :NUM_CLASSES]
    return logits


if __name__ == "__main__":
    key = jax.random.PRNGKey(0)
    x_key, p_key = jax.random.split(key)
    x = jax.random.normal(x_key, (2, IN_CHANS, IMG, IMG), jnp.float32)
    params = init_params(p_key)
    logits = jax.jit(vit_forward)(params, x)
    jax.block_until_ready(logits)
    assert logits.shape == (2, NUM_CLASSES)
    assert bool(jnp.all(jnp.isfinite(logits)))
    print("KERNEL_OK")
</pallas_src>

<mosaic_0001>
module attributes {stable_mosaic.version = 11 : i64} {
  func.func @matmul_kernel(%arg0: i32, %arg1: memref<32x768xf32, #tpu.memory_space<vmem>>, %arg2: memref<768x128xbf16, #tpu.memory_space<vmem>>, %arg3: memref<1x128xf32, #tpu.memory_space<vmem>>, %arg4: memref<32x128xf32, #tpu.memory_space<vmem>>) attributes {dimension_semantics = [#tpu.dimension_semantics<parallel>], iteration_bounds = array<i64: 1>, scalar_prefetch = 0 : i64, scratch_operands = 0 : i64, tpu.core_type = #tpu.core_type<tc>, window_params = [{transform_indices = @transform_0, window_bounds = array<i64: 32, 768>}, {pipeline_mode = #tpu.pipeline_mode<synchronous>, transform_indices = @transform_1, window_bounds = array<i64: 768, 128>}, {pipeline_mode = #tpu.pipeline_mode<synchronous>, transform_indices = @transform_2, window_bounds = array<i64: 1, 128>}, {transform_indices = @transform_3, window_bounds = array<i64: 32, 128>}]} {
    %c0 = arith.constant 0 : index
    %c0_0 = arith.constant 0 : index
    %0 = vector.load %arg1[%c0, %c0_0] : memref<32x768xf32, #tpu.memory_space<vmem>>, vector<32x768xf32>
    %1 = arith.truncf %0 : vector<32x768xf32> to vector<32x768xbf16>
    %c0_1 = arith.constant 0 : index
    %c0_2 = arith.constant 0 : index
    %2 = vector.load %arg2[%c0_1, %c0_2] : memref<768x128xbf16, #tpu.memory_space<vmem>>, vector<768x128xbf16>
    %cst = arith.constant dense<0.000000e+00> : vector<32x128xf32>
    %3 = tpu.matmul %1, %2, %cst {dimension_numbers = #tpu.dot_dimension_numbers<[1], [0], [0], [1], [0, 0, 1, 1], [], []>} : vector<32x768xbf16>, vector<768x128xbf16>, vector<32x128xf32> -> vector<32x128xf32>
    %c0_3 = arith.constant 0 : index
    %c0_4 = arith.constant 0 : index
    %4 = vector.load %arg3[%c0_3, %c0_4] : memref<1x128xf32, #tpu.memory_space<vmem>>, vector<1x128xf32>
    %5 = vector.broadcast %4 : vector<1x128xf32> to vector<32x128xf32>
    %6 = arith.addf %3, %5 : vector<32x128xf32>
    %c0_5 = arith.constant 0 : index
    %c0_6 = arith.constant 0 : index
    %7 = vector.load %arg4[%c0_5, %c0_6] : memref<32x128xf32, #tpu.memory_space<vmem>>, vector<32x128xf32>
    tpu.vector_store %arg4[%c0_5, %c0_6], %6 {strides = array<i32>} : memref<32x128xf32, #tpu.memory_space<vmem>>, vector<32x128xf32>,
    return
  }
  func.func @transform_0(%arg0: i32) -> (i32, i32) {
    %c0_i32 = arith.constant 0 : i32
    %c0_i32_0 = arith.constant 0 : i32
    return %arg0, %c0_i32 : i32, i32
  }
  func.func @transform_1(%arg0: i32) -> (i32, i32) {
    %c0_i32 = arith.constant 0 : i32
    %c0_i32_0 = arith.constant 0 : i32
    %c0_i32_1 = arith.constant 0 : i32
    return %c0_i32, %c0_i32_0 : i32, i32
  }
  func.func @transform_2(%arg0: i32) -> (i32, i32) {
    %c0_i32 = arith.constant 0 : i32
    %c0_i32_0 = arith.constant 0 : i32
    %c0_i32_1 = arith.constant 0 : i32
    return %c0_i32, %c0_i32_0 : i32, i32
  }
  func.func @transform_3(%arg0: i32) -> (i32, i32) {
    %c0_i32 = arith.constant 0 : i32
    %c0_i32_0 = arith.constant 0 : i32
    return %arg0, %c0_i32 : i32, i32
  }
}

module attributes {stable_mosaic.version = 11 : i64} {
  func.func @ln_matmul_kernel(%arg0: i32, %arg1: memref<34x128xf32, #tpu.memory_space<vmem>>, %arg2: memref<1x128xf32, #tpu.memory_space<vmem>>, %arg3: memref<1x128xf32, #tpu.memory_space<vmem>>, %arg4: memref<128x384xbf16, #tpu.memory_space<vmem>>, %arg5: memref<1x384xf32, #tpu.memory_space<vmem>>, %arg6: memref<34x384xf32, #tpu.memory_space<vmem>>) attributes {dimension_semantics = [#tpu.dimension_semantics<parallel>], iteration_bounds = array<i64: 1>, scalar_prefetch = 0 : i64, scratch_operands = 0 : i64, tpu.core_type = #tpu.core_type<tc>, window_params = [{transform_indices = @transform_0, window_bounds = array<i64: 34, 128>}, {pipeline_mode = #tpu.pipeline_mode<synchronous>, transform_indices = @transform_1, window_bounds = array<i64: 1, 128>}, {pipeline_mode = #tpu.pipeline_mode<synchronous>, transform_indices = @transform_2, window_bounds = array<i64: 1, 128>}, {pipeline_mode = #tpu.pipeline_mode<synchronous>, transform_indices = @transform_3, window_bounds = array<i64: 128, 384>}, {pipeline_mode = #tpu.pipeline_mode<synchronous>, transform_indices = @transform_4, window_bounds = array<i64: 1, 384>}, {transform_indices = @transform_5, window_bounds = array<i64: 34, 384>}]} {
    %c0 = arith.constant 0 : index
    %c0_0 = arith.constant 0 : index
    %0 = vector.load %arg1[%c0, %c0_0] : memref<34x128xf32, #tpu.memory_space<vmem>>, vector<34x128xf32>
    %c0_1 = arith.constant 0 : index
    %c0_2 = arith.constant 0 : index
    %1 = vector.load %arg2[%c0_1, %c0_2] : memref<1x128xf32, #tpu.memory_space<vmem>>, vector<1x128xf32>
    %c0_3 = arith.constant 0 : index
    %c0_4 = arith.constant 0 : index
    %2 = vector.load %arg3[%c0_3, %c0_4] : memref<1x128xf32, #tpu.memory_space<vmem>>, vector<1x128xf32>
    %cst = arith.constant dense<0.000000e+00> : vector<34xf32>
    %3 = vector.multi_reduction <add>, %0, %cst [1] : vector<34x128xf32> to vector<34xf32>
    %4 = vector.shape_cast %3 : vector<34xf32> to vector<34x1xf32>
    %cst_5 = arith.constant 1.280000e+02 : f32
    %5 = vector.broadcast %cst_5 : f32 to vector<34x1xf32>
    %6 = arith.divf %4, %5 : vector<34x1xf32>
    %7 = vector.broadcast %6 : vector<34x1xf32> to vector<34x128xf32>
    %8 = arith.subf %0, %7 : vector<34x128xf32>
    %9 = arith.mulf %8, %8 : vector<34x128xf32>
    %cst_6 = arith.constant dense<0.000000e+00> : vector<34xf32>
    %10 = vector.multi_reduction <add>, %9, %cst_6 [1] : vector<34x128xf32> to vector<34xf32>
    %11 = vector.shape_cast %10 : vector<34xf32> to vector<34x1xf32>
    %cst_7 = arith.constant 1.280000e+02 : f32
    %12 = vector.broadcast %cst_7 : f32 to vector<34x1xf32>
    %13 = arith.divf %11, %12 : vector<34x1xf32>
    %cst_8 = arith.constant 9.99999997E-7 : f32
    %14 = vector.broadcast %cst_8 : f32 to vector<34x1xf32>
    %15 = arith.addf %13, %14 : vector<34x1xf32>
    %16 = math.rsqrt %15 : vector<34x1xf32>
    %17 = vector.broadcast %16 : vector<34x1xf32> to vector<34x128xf32>
    %18 = arith.mulf %8, %17 : vector<34x128xf32>
    %19 = vector.broadcast %1 : vector<1x128xf32> to vector<34x128xf32>
    %20 = arith.mulf %18, %19 : vector<34x128xf32>
    %21 = vector.broadcast %2 : vector<1x128xf32> to vector<34x128xf32>
    %22 = arith.addf %20, %21 : vector<34x128xf32>
    %23 = arith.truncf %22 : vector<34x128xf32> to vector<34x128xbf16>
    %c0_9 = arith.constant 0 : index
    %c0_10 = arith.constant 0 : index
    %24 = vector.load %arg4[%c0_9, %c0_10] : memref<128x384xbf16, #tpu.memory_space<vmem>>, vector<128x384xbf16>
    %cst_11 = arith.constant dense<0.000000e+00> : vector<34x384xf32>
    %25 = tpu.matmul %23, %24, %cst_11 {dimension_numbers = #tpu.dot_dimension_numbers<[1], [0], [0], [1], [0, 0, 1, 1], [], []>} : vector<34x128xbf16>, vector<128x384xbf16>, vector<34x384xf32> -> vector<34x384xf32>
    %c0_12 = arith.constant 0 : index
    %c0_13 = arith.constant 0 : index
    %26 = vector.load %arg5[%c0_12, %c0_13] : memref<1x384xf32, #tpu.memory_space<vmem>>, vector<1x384xf32>
    %27 = vector.broadcast %26 : vector<1x384xf32> to vector<34x384xf32>
    %28 = arith.addf %25, %27 : vector<34x384xf32>
    %c0_14 = arith.constant 0 : index
    %c0_15 = arith.constant 0 : index
    %29 = vector.load %arg6[%c0_14, %c0_15] : memref<34x384xf32, #tpu.memory_space<vmem>>, vector<34x384xf32>
    tpu.vector_store %arg6[%c0_14, %c0_15], %28 {strides = array<i32>} : memref<34x384xf32, #tpu.memory_space<vmem>>, vector<34x384xf32>,
    return
  }
  func.func @transform_0(%arg0: i32) -> (i32, i32) {
    %c0_i32 = arith.constant 0 : i32
    %c0_i32_0 = arith.constant 0 : i32
    return %arg0, %c0_i32 : i32, i32
  }
  func.func @transform_1(%arg0: i32) -> (i32, i32) {
    %c0_i32 = arith.constant 0 : i32
    %c0_i32_0 = arith.constant 0 : i32
    %c0_i32_1 = arith.constant 0 : i32
    return %c0_i32, %c0_i32_0 : i32, i32
  }
  func.func @transform_2(%arg0: i32) -> (i32, i32) {
    %c0_i32 = arith.constant 0 : i32
    %c0_i32_0 = arith.constant 0 : i32
    %c0_i32_1 = arith.constant 0 : i32
    return %c0_i32, %c0_i32_0 : i32, i32
  }
  func.func @transform_3(%arg0: i32) -> (i32, i32) {
    %c0_i32 = arith.constant 0 : i32
    %c0_i32_0 = arith.constant 0 : i32
    %c0_i32_1 = arith.constant 0 : i32
    return %c0_i32, %c0_i32_0 : i32, i32
  }
  func.func @transform_4(%arg0: i32) -> (i32, i32) {
    %c0_i32 = arith.constant 0 : i32
    %c0_i32_0 = arith.constant 0 : i32
    %c0_i32_1 = arith.constant 0 : i32
    return %c0_i32, %c0_i32_0 : i32, i32
  }
  func.func @transform_5(%arg0: i32) -> (i32, i32) {
    %c0_i32 = arith.constant 0 : i32
    %c0_i32_0 = arith.constant 0 : i32
    return %arg0, %c0_i32 : i32, i32
  }
}

module attributes {stable_mosaic.version = 11 : i64} {
  func.func @mlp_block_kernel(%arg0: i32, %arg1: memref<34x128xf32, #tpu.memory_space<vmem>>, %arg2: memref<1x128xf32, #tpu.memory_space<vmem>>, %arg3: memref<1x128xf32, #tpu.memory_space<vmem>>, %arg4: memref<128x512xbf16, #tpu.memory_space<vmem>>, %arg5: memref<1x512xf32, #tpu.memory_space<vmem>>, %arg6: memref<512x128xbf16, #tpu.memory_space<vmem>>, %arg7: memref<1x128xf32, #tpu.memory_space<vmem>>, %arg8: memref<34x128xf32, #tpu.memory_space<vmem>>) attributes {dimension_semantics = [#tpu.dimension_semantics<parallel>], iteration_bounds = array<i64: 1>, scalar_prefetch = 0 : i64, scratch_operands = 0 : i64, tpu.core_type = #tpu.core_type<tc>, window_params = [{transform_indices = @transform_0, window_bounds = array<i64: 34, 128>}, {pipeline_mode = #tpu.pipeline_mode<synchronous>, transform_indices = @transform_1, window_bounds = array<i64: 1, 128>}, {pipeline_mode = #tpu.pipeline_mode<synchronous>, transform_indices = @transform_2, window_bounds = array<i64: 1, 128>}, {pipeline_mode = #tpu.pipeline_mode<synchronous>, transform_indices = @transform_3, window_bounds = array<i64: 128, 512>}, {pipeline_mode = #tpu.pipeline_mode<synchronous>, transform_indices = @transform_4, window_bounds = array<i64: 1, 512>}, {pipeline_mode = #tpu.pipeline_mode<synchronous>, transform_indices = @transform_5, window_bounds = array<i64: 512, 128>}, {pipeline_mode = #tpu.pipeline_mode<synchronous>, transform_indices = @transform_6, window_bounds = array<i64: 1, 128>}, {transform_indices = @transform_7, window_bounds = array<i64: 34, 128>}]} {
    %c0 = arith.constant 0 : index
    %c0_0 = arith.constant 0 : index
    %0 = vector.load %arg1[%c0, %c0_0] : memref<34x128xf32, #tpu.memory_space<vmem>>, vector<34x128xf32>
    %c0_1 = arith.constant 0 : index
    %c0_2 = arith.constant 0 : index
    %1 = vector.load %arg2[%c0_1, %c0_2] : memref<1x128xf32, #tpu.memory_space<vmem>>, vector<1x128xf32>
    %c0_3 = arith.constant 0 : index
    %c0_4 = arith.constant 0 : index
    %2 = vector.load %arg3[%c0_3, %c0_4] : memref<1x128xf32, #tpu.memory_space<vmem>>, vector<1x128xf32>
    %cst = arith.constant dense<0.000000e+00> : vector<34xf32>
    %3 = vector.multi_reduction <add>, %0, %cst [1] : vector<34x128xf32> to vector<34xf32>
    %4 = vector.shape_cast %3 : vector<34xf32> to vector<34x1xf32>
    %cst_5 = arith.constant 1.280000e+02 : f32
    %5 = vector.broadcast %cst_5 : f32 to vector<34x1xf32>
    %6 = arith.divf %4, %5 : vector<34x1xf32>
    %7 = vector.broadcast %6 : vector<34x1xf32> to vector<34x128xf32>
    %8 = arith.subf %0, %7 : vector<34x128xf32>
    %9 = arith.mulf %8, %8 : vector<34x128xf32>
    %cst_6 = arith.constant dense<0.000000e+00> : vector<34xf32>
    %10 = vector.multi_reduction <add>, %9, %cst_6 [1] : vector<34x128xf32> to vector<34xf32>
    %11 = vector.shape_cast %10 : vector<34xf32> to vector<34x1xf32>
    %cst_7 = arith.constant 1.280000e+02 : f32
    %12 = vector.broadcast %cst_7 : f32 to vector<34x1xf32>
    %13 = arith.divf %11, %12 : vector<34x1xf32>
    %cst_8 = arith.constant 9.99999997E-7 : f32
    %14 = vector.broadcast %cst_8 : f32 to vector<34x1xf32>
    %15 = arith.addf %13, %14 : vector<34x1xf32>
    %16 = math.rsqrt %15 : vector<34x1xf32>
    %17 = vector.broadcast %16 : vector<34x1xf32> to vector<34x128xf32>
    %18 = arith.mulf %8, %17 : vector<34x128xf32>
    %19 = vector.broadcast %1 : vector<1x128xf32> to vector<34x128xf32>
    %20 = arith.mulf %18, %19 : vector<34x128xf32>
    %21 = vector.broadcast %2 : vector<1x128xf32> to vector<34x128xf32>
    %22 = arith.addf %20, %21 : vector<34x128xf32>
    %23 = arith.truncf %22 : vector<34x128xf32> to vector<34x128xbf16>
    %c0_9 = arith.constant 0 : index
    %c0_10 = arith.constant 0 : index
    %24 = vector.load %arg4[%c0_9, %c0_10] : memref<128x512xbf16, #tpu.memory_space<vmem>>, vector<128x512xbf16>
    %cst_11 = arith.constant dense<0.000000e+00> : vector<34x512xf32>
    %25 = tpu.matmul %23, %24, %cst_11 {dimension_numbers = #tpu.dot_dimension_numbers<[1], [0], [0], [1], [0, 0, 1, 1], [], []>} : vector<34x128xbf16>, vector<128x512xbf16>, vector<34x512xf32> -> vector<34x512xf32>
    %c0_12 = arith.constant 0 : index
    %c0_13 = arith.constant 0 : index
    %26 = vector.load %arg5[%c0_12, %c0_13] : memref<1x512xf32, #tpu.memory_space<vmem>>, vector<1x512xf32>
    %27 = vector.broadcast %26 : vector<1x512xf32> to vector<34x512xf32>
    %28 = arith.addf %25, %27 : vector<34x512xf32>
    %cst_14 = arith.constant 5.000000e-01 : f32
    %29 = vector.broadcast %cst_14 : f32 to vector<34x512xf32>
    %30 = arith.mulf %29, %28 : vector<34x512xf32>
    %cst_15 = arith.constant 4.471500e-02 : f32
    %31 = vector.broadcast %cst_15 : f32 to vector<34x512xf32>
    %32 = arith.mulf %31, %28 : vector<34x512xf32>
    %33 = arith.mulf %32, %28 : vector<34x512xf32>
    %34 = arith.mulf %33, %28 : vector<34x512xf32>
    %35 = arith.addf %28, %34 : vector<34x512xf32>
    %cst_16 = arith.constant 0.797884583 : f32
    %36 = vector.broadcast %cst_16 : f32 to vector<34x512xf32>
    %37 = arith.mulf %36, %35 : vector<34x512xf32>
    %38 = math.tanh %37 : vector<34x512xf32>
    %cst_17 = arith.constant 1.000000e+00 : f32
    %39 = vector.broadcast %cst_17 : f32 to vector<34x512xf32>
    %40 = arith.addf %39, %38 : vector<34x512xf32>
    %41 = arith.mulf %30, %40 : vector<34x512xf32>
    %42 = arith.truncf %41 : vector<34x512xf32> to vector<34x512xbf16>
    %c0_18 = arith.constant 0 : index
    %c0_19 = arith.constant 0 : index
    %43 = vector.load %arg6[%c0_18, %c0_19] : memref<512x128xbf16, #tpu.memory_space<vmem>>, vector<512x128xbf16>
    %cst_20 = arith.constant dense<0.000000e+00> : vector<34x128xf32>
    %44 = tpu.matmul %42, %43, %cst_20 {dimension_numbers = #tpu.dot_dimension_numbers<[1], [0], [0], [1], [0, 0, 1, 1], [], []>} : vector<34x512xbf16>, vector<512x128xbf16>, vector<34x128xf32> -> vector<34x128xf32>
    %c0_21 = arith.constant 0 : index
    %c0_22 = arith.constant 0 : index
    %45 = vector.load %arg7[%c0_21, %c0_22] : memref<1x128xf32, #tpu.memory_space<vmem>>, vector<1x128xf32>
    %46 = vector.broadcast %45 : vector<1x128xf32> to vector<34x128xf32>
    %47 = arith.addf %44, %46 : vector<34x128xf32>
    %48 = arith.addf %0, %47 : vector<34x128xf32>
    %c0_23 = arith.constant 0 : index
    %c0_24 = arith.constant 0 : index
    %49 = vector.load %arg8[%c0_23, %c0_24] : memref<34x128xf32, #tpu.memory_space<vmem>>, vector<34x128xf32>
    tpu.vector_store %arg8[%c0_23, %c0_24], %48 {strides = array<i32>} : memref<34x128xf32, #tpu.memory_space<vmem>>, vector<34x128xf32>,
    return
  }
  func.func @transform_0(%arg0: i32) -> (i32, i32) {
    %c0_i32 = arith.constant 0 : i32
    %c0_i32_0 = arith.constant 0 : i32
    return %arg0, %c0_i32 : i32, i32
  }
  func.func @transform_1(%arg0: i32) -> (i32, i32) {
    %c0_i32 = arith.constant 0 : i32
    %c0_i32_0 = arith.constant 0 : i32
    %c0_i32_1 = arith.constant 0 : i32
    return %c0_i32, %c0_i32_0 : i32, i32
  }
  func.func @transform_2(%arg0: i32) -> (i32, i32) {
    %c0_i32 = arith.constant 0 : i32
    %c0_i32_0 = arith.constant 0 : i32
    %c0_i32_1 = arith.constant 0 : i32
    return %c0_i32, %c0_i32_0 : i32, i32
  }
  func.func @transform_3(%arg0: i32) -> (i32, i32) {
    %c0_i32 = arith.constant 0 : i32
    %c0_i32_0 = arith.constant 0 : i32
    %c0_i32_1 = arith.constant 0 : i32
    return %c0_i32, %c0_i32_0 : i32, i32
  }
  func.func @transform_4(%arg0: i32) -> (i32, i32) {
    %c0_i32 = arith.constant 0 : i32
    %c0_i32_0 = arith.constant 0 : i32
    %c0_i32_1 = arith.constant 0 : i32
    return %c0_i32, %c0_i32_0 : i32, i32
  }
  func.func @transform_5(%arg0: i32) -> (i32, i32) {
    %c0_i32 = arith.constant 0 : i32
    %c0_i32_0 = arith.constant 0 : i32
    %c0_i32_1 = arith.constant 0 : i32
    return %c0_i32, %c0_i32_0 : i32, i32
  }
  func.func @transform_6(%arg0: i32) -> (i32, i32) {
    %c0_i32 = arith.constant 0 : i32
    %c0_i32_0 = arith.constant 0 : i32
    %c0_i32_1 = arith.constant 0 : i32
    return %c0_i32, %c0_i32_0 : i32, i32
  }
  func.func @transform_7(%arg0: i32) -> (i32, i32) {
    %c0_i32 = arith.constant 0 : i32
    %c0_i32_0 = arith.constant 0 : i32
    return %arg0, %c0_i32 : i32, i32
  }
}

module attributes {stable_mosaic.version = 11 : i64} {
  func.func @attn_block_kernel(%arg0: i32, %arg1: memref<1x17x384xf32, #tpu.memory_space<vmem>>, %arg2: memref<1x17x128xf32, #tpu.memory_space<vmem>>, %arg3: memref<128x128xbf16, #tpu.memory_space<vmem>>, %arg4: memref<1x128xf32, #tpu.memory_space<vmem>>, %arg5: memref<1x17x128xf32, #tpu.memory_space<vmem>>) attributes {dimension_semantics = [#tpu.dimension_semantics<parallel>], iteration_bounds = array<i64: 2>, scalar_prefetch = 0 : i64, scratch_operands = 0 : i64, tpu.core_type = #tpu.core_type<tc>, window_params = [{transform_indices = @transform_0, window_bounds = array<i64: 1, 17, 384>}, {transform_indices = @transform_1, window_bounds = array<i64: 1, 17, 128>}, {pipeline_mode = #tpu.pipeline_mode<synchronous>, transform_indices = @transform_2, window_bounds = array<i64: 128, 128>}, {pipeline_mode = #tpu.pipeline_mode<synchronous>, transform_indices = @transform_3, window_bounds = array<i64: 1, 128>}, {transform_indices = @transform_4, window_bounds = array<i64: 1, 17, 128>}]} {
    %c0 = arith.constant 0 : index
    %c0_0 = arith.constant 0 : index
    %c0_1 = arith.constant 0 : index
    %0 = vector.load %arg1[%c0, %c0_0, %c0_1] : memref<1x17x384xf32, #tpu.memory_space<vmem>>, vector<1x17x32xf32>
    %1 = vector.shape_cast %0 : vector<1x17x32xf32> to vector<17x32xf32>
    %cst = arith.constant 0.176776692 : f32
    %2 = vector.broadcast %cst : f32 to vector<17x32xf32>
    %3 = arith.mulf %1, %2 : vector<17x32xf32>
    %c0_2 = arith.constant 0 : index
    %c0_3 = arith.constant 0 : index
    %c128 = arith.constant 128 : index
    %4 = vector.load %arg1[%c0_2, %c0_3, %c128] : memref<1x17x384xf32, #tpu.memory_space<vmem>>, vector<1x17x32xf32>
    %5 = vector.shape_cast %4 : vector<1x17x32xf32> to vector<17x32xf32>
    %c0_4 = arith.constant 0 : index
    %c0_5 = arith.constant 0 : index
    %c256 = arith.constant 256 : index
    %6 = vector.load %arg1[%c0_4, %c0_5, %c256] : memref<1x17x384xf32, #tpu.memory_space<vmem>>, vector<1x17x32xf32>
    %7 = vector.shape_cast %6 : vector<1x17x32xf32> to vector<17x32xf32>
    %8 = arith.truncf %3 : vector<17x32xf32> to vector<17x32xbf16>
    %9 = arith.truncf %5 : vector<17x32xf32> to vector<17x32xbf16>
    %cst_6 = arith.constant dense<0.000000e+00> : vector<17x17xf32>
    %10 = tpu.matmul %8, %9, %cst_6 {dimension_numbers = #tpu.dot_dimension_numbers<[1], [1], [0], [0], [0, 0, 1, 0], [], []>} : vector<17x32xbf16>, vector<17x32xbf16>, vector<17x17xf32> -> vector<17x17xf32>
    %cst_7 = arith.constant dense<0xFF800000> : vector<17xf32>
    %11 = vector.multi_reduction <maximumf>, %10, %cst_7 [1] : vector<17x17xf32> to vector<17xf32>
    %12 = vector.shape_cast %11 : vector<17xf32> to vector<17x1xf32>
    %13 = vector.broadcast %12 : vector<17x1xf32> to vector<17x17xf32>
    %14 = arith.subf %10, %13 : vector<17x17xf32>
    %15 = math.exp %14 : vector<17x17xf32>
    %cst_8 = arith.constant dense<0.000000e+00> : vector<17xf32>
    %16 = vector.multi_reduction <add>, %15, %cst_8 [1] : vector<17x17xf32> to vector<17xf32>
    %17 = vector.shape_cast %16 : vector<17xf32> to vector<17x1xf32>
    %18 = tpu.reciprocal %17 {approx = true} : vector<17x1xf32> -> vector<17x1xf32>
    %19 = arith.truncf %15 : vector<17x17xf32> to vector<17x17xbf16>
    %20 = arith.truncf %7 : vector<17x32xf32> to vector<17x32xbf16>
    %cst_9 = arith.constant dense<0.000000e+00> : vector<17x32xf32>
    %21 = tpu.matmul %19, %20, %cst_9 {dimension_numbers = #tpu.dot_dimension_numbers<[1], [0], [0], [1], [0, 0, 1, 1], [], []>} : vector<17x17xbf16>, vector<17x32xbf16>, vector<17x32xf32> -> vector<17x32xf32>
    %22 = vector.broadcast %18 : vector<17x1xf32> to vector<17x32xf32>
    %23 = arith.mulf %21, %22 : vector<17x32xf32>
    %c0_10 = arith.constant 0 : index
    %c0_11 = arith.constant 0 : index
    %c32 = arith.constant 32 : index
    %24 = vector.load %arg1[%c0_10, %c0_11, %c32] : memref<1x17x384xf32, #tpu.memory_space<vmem>>, vector<1x17x32xf32>
    %25 = vector.shape_cast %24 : vector<1x17x32xf32> to vector<17x32xf32>
    %cst_12 = arith.constant 0.176776692 : f32
    %26 = vector.broadcast %cst_12 : f32 to vector<17x32xf32>
    %27 = arith.mulf %25, %26 : vector<17x32xf32>
    %c0_13 = arith.constant 0 : index
    %c0_14 = arith.constant 0 : index
    %c160 = arith.constant 160 : index
    %28 = vector.load %arg1[%c0_13, %c0_14, %c160] : memref<1x17x384xf32, #tpu.memory_space<vmem>>, vector<1x17x32xf32>
    %29 = vector.shape_cast %28 : vector<1x17x32xf32> to vector<17x32xf32>
    %c0_15 = arith.constant 0 : index
    %c0_16 = arith.constant 0 : index
    %c288 = arith.constant 288 : index
    %30 = vector.load %arg1[%c0_15, %c0_16, %c288] : memref<1x17x384xf32, #tpu.memory_space<vmem>>, vector<1x17x32xf32>
    %31 = vector.shape_cast %30 : vector<1x17x32xf32> to vector<17x32xf32>
    %32 = arith.truncf %27 : vector<17x32xf32> to vector<17x32xbf16>
    %33 = arith.truncf %29 : vector<17x32xf32> to vector<17x32xbf16>
    %cst_17 = arith.constant dense<0.000000e+00> : vector<17x17xf32>
    %34 = tpu.matmul %32, %33, %cst_17 {dimension_numbers = #tpu.dot_dimension_numbers<[1], [1], [0], [0], [0, 0, 1, 0], [], []>} : vector<17x32xbf16>, vector<17x32xbf16>, vector<17x17xf32> -> vector<17x17xf32>
    %cst_18 = arith.constant dense<0xFF800000> : vector<17xf32>
    %35 = vector.multi_reduction <maximumf>, %34, %cst_18 [1] : vector<17x17xf32> to vector<17xf32>
    %36 = vector.shape_cast %35 : vector<17xf32> to vector<17x1xf32>
    %37 = vector.broadcast %36 : vector<17x1xf32> to vector<17x17xf32>
    %38 = arith.subf %34, %37 : vector<17x17xf32>
    %39 = math.exp %38 : vector<17x17xf32>
    %cst_19 = arith.constant dense<0.000000e+00> : vector<17xf32>
    %40 = vector.multi_reduction <add>, %39, %cst_19 [1] : vector<17x17xf32> to vector<17xf32>
    %41 = vector.shape_cast %40 : vector<17xf32> to vector<17x1xf32>
    %42 = tpu.reciprocal %41 {approx = true} : vector<17x1xf32> -> vector<17x1xf32>
    %43 = arith.truncf %39 : vector<17x17xf32> to vector<17x17xbf16>
    %44 = arith.truncf %31 : vector<17x32xf32> to vector<17x32xbf16>
    %cst_20 = arith.constant dense<0.000000e+00> : vector<17x32xf32>
    %45 = tpu.matmul %43, %44, %cst_20 {dimension_numbers = #tpu.dot_dimension_numbers<[1], [0], [0], [1], [0, 0, 1, 1], [], []>} : vector<17x17xbf16>, vector<17x32xbf16>, vector<17x32xf32> -> vector<17x32xf32>
    %46 = vector.broadcast %42 : vector<17x1xf32> to vector<17x32xf32>
    %47 = arith.mulf %45, %46 : vector<17x32xf32>
    %c0_21 = arith.constant 0 : index
    %c0_22 = arith.constant 0 : index
    %c64 = arith.constant 64 : index
    %48 = vector.load %arg1[%c0_21, %c0_22, %c64] : memref<1x17x384xf32, #tpu.memory_space<vmem>>, vector<1x17x32xf32>
    %49 = vector.shape_cast %48 : vector<1x17x32xf32> to vector<17x32xf32>
    %cst_23 = arith.constant 0.176776692 : f32
    %50 = vector.broadcast %cst_23 : f32 to vector<17x32xf32>
    %51 = arith.mulf %49, %50 : vector<17x32xf32>
    %c0_24 = arith.constant 0 : index
    %c0_25 = arith.constant 0 : index
    %c192 = arith.constant 192 : index
    %52 = vector.load %arg1[%c0_24, %c0_25, %c192] : memref<1x17x384xf32, #tpu.memory_space<vmem>>, vector<1x17x32xf32>
    %53 = vector.shape_cast %52 : vector<1x17x32xf32> to vector<17x32xf32>
    %c0_26 = arith.constant 0 : index
    %c0_27 = arith.constant 0 : index
    %c320 = arith.constant 320 : index
    %54 = vector.load %arg1[%c0_26, %c0_27, %c320] : memref<1x17x384xf32, #tpu.memory_space<vmem>>, vector<1x17x32xf32>
    %55 = vector.shape_cast %54 : vector<1x17x32xf32> to vector<17x32xf32>
    %56 = arith.truncf %51 : vector<17x32xf32> to vector<17x32xbf16>
    %57 = arith.truncf %53 : vector<17x32xf32> to vector<17x32xbf16>
    %cst_28 = arith.constant dense<0.000000e+00> : vector<17x17xf32>
    %58 = tpu.matmul %56, %57, %cst_28 {dimension_numbers = #tpu.dot_dimension_numbers<[1], [1], [0], [0], [0, 0, 1, 0], [], []>} : vector<17x32xbf16>, vector<17x32xbf16>, vector<17x17xf32> -> vector<17x17xf32>
    %cst_29 = arith.constant dense<0xFF800000> : vector<17xf32>
    %59 = vector.multi_reduction <maximumf>, %58, %cst_29 [1] : vector<17x17xf32> to vector<17xf32>
    %60 = vector.shape_cast %59 : vector<17xf32> to vector<17x1xf32>
    %61 = vector.broadcast %60 : vector<17x1xf32> to vector<17x17xf32>
    %62 = arith.subf %58, %61 : vector<17x17xf32>
    %63 = math.exp %62 : vector<17x17xf32>
    %cst_30 = arith.constant dense<0.000000e+00> : vector<17xf32>
    %64 = vector.multi_reduction <add>, %63, %cst_30 [1] : vector<17x17xf32> to vector<17xf32>
    %65 = vector.shape_cast %64 : vector<17xf32> to vector<17x1xf32>
    %66 = tpu.reciprocal %65 {approx = true} : vector<17x1xf32> -> vector<17x1xf32>
    %67 = arith.truncf %63 : vector<17x17xf32> to vector<17x17xbf16>
    %68 = arith.truncf %55 : vector<17x32xf32> to vector<17x32xbf16>
    %cst_31 = arith.constant dense<0.000000e+00> : vector<17x32xf32>
    %69 = tpu.matmul %67, %68, %cst_31 {dimension_numbers = #tpu.dot_dimension_numbers<[1], [0], [0], [1], [0, 0, 1, 1], [], []>} : vector<17x17xbf16>, vector<17x32xbf16>, vector<17x32xf32> -> vector<17x32xf32>
    %70 = vector.broadcast %66 : vector<17x1xf32> to vector<17x32xf32>
    %71 = arith.mulf %69, %70 : vector<17x32xf32>
    %c0_32 = arith.constant 0 : index
    %c0_33 = arith.constant 0 : index
    %c96 = arith.constant 96 : index
    %72 = vector.load %arg1[%c0_32, %c0_33, %c96] : memref<1x17x384xf32, #tpu.memory_space<vmem>>, vector<1x17x32xf32>
    %73 = vector.shape_cast %72 : vector<1x17x32xf32> to vector<17x32xf32>
    %cst_34 = arith.constant 0.176776692 : f32
    %74 = vector.broadcast %cst_34 : f32 to vector<17x32xf32>
    %75 = arith.mulf %73, %74 : vector<17x32xf32>
    %c0_35 = arith.constant 0 : index
    %c0_36 = arith.constant 0 : index
    %c224 = arith.constant 224 : index
    %76 = vector.load %arg1[%c0_35, %c0_36, %c224] : memref<1x17x384xf32, #tpu.memory_space<vmem>>, vector<1x17x32xf32>
    %77 = vector.shape_cast %76 : vector<1x17x32xf32> to vector<17x32xf32>
    %c0_37 = arith.constant 0 : index
    %c0_38 = arith.constant 0 : index
    %c352 = arith.constant 352 : index
    %78 = vector.load %arg1[%c0_37, %c0_38, %c352] : memref<1x17x384xf32, #tpu.memory_space<vmem>>, vector<1x17x32xf32>
    %79 = vector.shape_cast %78 : vector<1x17x32xf32> to vector<17x32xf32>
    %80 = arith.truncf %75 : vector<17x32xf32> to vector<17x32xbf16>
    %81 = arith.truncf %77 : vector<17x32xf32> to vector<17x32xbf16>
    %cst_39 = arith.constant dense<0.000000e+00> : vector<17x17xf32>
    %82 = tpu.matmul %80, %81, %cst_39 {dimension_numbers = #tpu.dot_dimension_numbers<[1], [1], [0], [0], [0, 0, 1, 0], [], []>} : vector<17x32xbf16>, vector<17x32xbf16>, vector<17x17xf32> -> vector<17x17xf32>
    %cst_40 = arith.constant dense<0xFF800000> : vector<17xf32>
    %83 = vector.multi_reduction <maximumf>, %82, %cst_40 [1] : vector<17x17xf32> to vector<17xf32>
    %84 = vector.shape_cast %83 : vector<17xf32> to vector<17x1xf32>
    %85 = vector.broadcast %84 : vector<17x1xf32> to vector<17x17xf32>
    %86 = arith.subf %82, %85 : vector<17x17xf32>
    %87 = math.exp %86 : vector<17x17xf32>
    %cst_41 = arith.constant dense<0.000000e+00> : vector<17xf32>
    %88 = vector.multi_reduction <add>, %87, %cst_41 [1] : vector<17x17xf32> to vector<17xf32>
    %89 = vector.shape_cast %88 : vector<17xf32> to vector<17x1xf32>
    %90 = tpu.reciprocal %89 {approx = true} : vector<17x1xf32> -> vector<17x1xf32>
    %91 = arith.truncf %87 : vector<17x17xf32> to vector<17x17xbf16>
    %92 = arith.truncf %79 : vector<17x32xf32> to vector<17x32xbf16>
    %cst_42 = arith.constant dense<0.000000e+00> : vector<17x32xf32>
    %93 = tpu.matmul %91, %92, %cst_42 {dimension_numbers = #tpu.dot_dimension_numbers<[1], [0], [0], [1], [0, 0, 1, 1], [], []>} : vector<17x17xbf16>, vector<17x32xbf16>, vector<17x32xf32> -> vector<17x32xf32>
    %94 = vector.broadcast %90 : vector<17x1xf32> to vector<17x32xf32>
    %95 = arith.mulf %93, %94 : vector<17x32xf32>
    %96 = tpu.concatenate %23, %47, %71, %95 in 1 : vector<17x32xf32>, vector<17x32xf32>, vector<17x32xf32>, vector<17x32xf32> -> vector<17x128xf32>
    %97 = arith.truncf %96 : vector<17x128xf32> to vector<17x128xbf16>
    %c0_43 = arith.constant 0 : index
    %c0_44 = arith.constant 0 : index
    %98 = vector.load %arg3[%c0_43, %c0_44] : memref<128x128xbf16, #tpu.memory_space<vmem>>, vector<128x128xbf16>
    %cst_45 = arith.constant dense<0.000000e+00> : vector<17x128xf32>
    %99 = tpu.matmul %97, %98, %cst_45 {dimension_numbers = #tpu.dot_dimension_numbers<[1], [0], [0], [1], [0, 0, 1, 1], [], []>} : vector<17x128xbf16>, vector<128x128xbf16>, vector<17x128xf32> -> vector<17x128xf32>
    %c0_46 = arith.constant 0 : index
    %c0_47 = arith.constant 0 : index
    %100 = vector.load %arg4[%c0_46, %c0_47] : memref<1x128xf32, #tpu.memory_space<vmem>>, vector<1x128xf32>
    %101 = vector.broadcast %100 : vector<1x128xf32> to vector<17x128xf32>
    %102 = arith.addf %99, %101 : vector<17x128xf32>
    %c0_48 = arith.constant 0 : index
    %c0_49 = arith.constant 0 : index
    %c0_50 = arith.constant 0 : index
    %103 = vector.load %arg2[%c0_48, %c0_49, %c0_50] : memref<1x17x128xf32, #tpu.memory_space<vmem>>, vector<1x17x128xf32>
    %104 = vector.shape_cast %103 : vector<1x17x128xf32> to vector<17x128xf32>
    %105 = arith.addf %104, %102 : vector<17x128xf32>
    %c0_51 = arith.constant 0 : index
    %c0_52 = arith.constant 0 : index
    %c0_53 = arith.constant 0 : index
    %106 = vector.load %arg5[%c0_51, %c0_52, %c0_53] : memref<1x17x128xf32, #tpu.memory_space<vmem>>, vector<1x17x128xf32>
    %107 = vector.shape_cast %106 : vector<1x17x128xf32> to vector<17x128xf32>
    %108 = vector.shape_cast %105 : vector<17x128xf32> to vector<1x17x128xf32>
    tpu.vector_store %arg5[%c0_51, %c0_52, %c0_53], %108 {strides = array<i32>} : memref<1x17x128xf32, #tpu.memory_space<vmem>>, vector<1x17x128xf32>,
    return
  }
  func.func @transform_0(%arg0: i32) -> (i32, i32, i32) {
    %c0_i32 = arith.constant 0 : i32
    %c0_i32_0 = arith.constant 0 : i32
    %c0_i32_1 = arith.constant 0 : i32
    return %arg0, %c0_i32, %c0_i32_0 : i32, i32, i32
  }
  func.func @transform_1(%arg0: i32) -> (i32, i32, i32) {
    %c0_i32 = arith.constant 0 : i32
    %c0_i32_0 = arith.constant 0 : i32
    %c0_i32_1 = arith.constant 0 : i32
    return %arg0, %c0_i32, %c0_i32_0 : i32, i32, i32
  }
  func.func @transform_2(%arg0: i32) -> (i32, i32) {
    %c0_i32 = arith.constant 0 : i32
    %c0_i32_0 = arith.constant 0 : i32
    %c0_i32_1 = arith.constant 0 : i32
    return %c0_i32, %c0_i32_0 : i32, i32
  }
  func.func @transform_3(%arg0: i32) -> (i32, i32) {
    %c0_i32 = arith.constant 0 : i32
    %c0_i32_0 = arith.constant 0 : i32
    %c0_i32_1 = arith.constant 0 : i32
    return %c0_i32, %c0_i32_0 : i32, i32
  }
  func.func @transform_4(%arg0: i32) -> (i32, i32, i32) {
    %c0_i32 = arith.constant 0 : i32
    %c0_i32_0 = arith.constant 0 : i32
    %c0_i32_1 = arith.constant 0 : i32
    return %arg0, %c0_i32, %c0_i32_0 : i32, i32, i32
  }
}

module attributes {stable_mosaic.version = 11 : i64} {
  func.func @ln_matmul_kernel(%arg0: i32, %arg1: memref<2x128xf32, #tpu.memory_space<vmem>>, %arg2: memref<1x128xf32, #tpu.memory_space<vmem>>, %arg3: memref<1x128xf32, #tpu.memory_space<vmem>>, %arg4: memref<128x128xbf16, #tpu.memory_space<vmem>>, %arg5: memref<1x128xf32, #tpu.memory_space<vmem>>, %arg6: memref<2x128xf32, #tpu.memory_space<vmem>>) attributes {dimension_semantics = [#tpu.dimension_semantics<parallel>], iteration_bounds = array<i64: 1>, scalar_prefetch = 0 : i64, scratch_operands = 0 : i64, tpu.core_type = #tpu.core_type<tc>, window_params = [{transform_indices = @transform_0, window_bounds = array<i64: 2, 128>}, {pipeline_mode = #tpu.pipeline_mode<synchronous>, transform_indices = @transform_1, window_bounds = array<i64: 1, 128>}, {pipeline_mode = #tpu.pipeline_mode<synchronous>, transform_indices = @transform_2, window_bounds = array<i64: 1, 128>}, {pipeline_mode = #tpu.pipeline_mode<synchronous>, transform_indices = @transform_3, window_bounds = array<i64: 128, 128>}, {pipeline_mode = #tpu.pipeline_mode<synchronous>, transform_indices = @transform_4, window_bounds = array<i64: 1, 128>}, {transform_indices = @transform_5, window_bounds = array<i64: 2, 128>}]} {
    %c0 = arith.constant 0 : index
    %c0_0 = arith.constant 0 : index
    %0 = vector.load %arg1[%c0, %c0_0] : memref<2x128xf32, #tpu.memory_space<vmem>>, vector<2x128xf32>
    %c0_1 = arith.constant 0 : index
    %c0_2 = arith.constant 0 : index
    %1 = vector.load %arg2[%c0_1, %c0_2] : memref<1x128xf32, #tpu.memory_space<vmem>>, vector<1x128xf32>
    %c0_3 = arith.constant 0 : index
    %c0_4 = arith.constant 0 : index
    %2 = vector.load %arg3[%c0_3, %c0_4] : memref<1x128xf32, #tpu.memory_space<vmem>>, vector<1x128xf32>
    %cst = arith.constant dense<0.000000e+00> : vector<2xf32>
    %3 = vector.multi_reduction <add>, %0, %cst [1] : vector<2x128xf32> to vector<2xf32>
    %4 = vector.shape_cast %3 : vector<2xf32> to vector<2x1xf32>
    %cst_5 = arith.constant 1.280000e+02 : f32
    %5 = vector.broadcast %cst_5 : f32 to vector<2x1xf32>
    %6 = arith.divf %4, %5 : vector<2x1xf32>
    %7 = vector.broadcast %6 : vector<2x1xf32> to vector<2x128xf32>
    %8 = arith.subf %0, %7 : vector<2x128xf32>
    %9 = arith.mulf %8, %8 : vector<2x128xf32>
    %cst_6 = arith.constant dense<0.000000e+00> : vector<2xf32>
    %10 = vector.multi_reduction <add>, %9, %cst_6 [1] : vector<2x128xf32> to vector<2xf32>
    %11 = vector.shape_cast %10 : vector<2xf32> to vector<2x1xf32>
    %cst_7 = arith.constant 1.280000e+02 : f32
    %12 = vector.broadcast %cst_7 : f32 to vector<2x1xf32>
    %13 = arith.divf %11, %12 : vector<2x1xf32>
    %cst_8 = arith.constant 9.99999997E-7 : f32
    %14 = vector.broadcast %cst_8 : f32 to vector<2x1xf32>
    %15 = arith.addf %13, %14 : vector<2x1xf32>
    %16 = math.rsqrt %15 : vector<2x1xf32>
    %17 = vector.broadcast %16 : vector<2x1xf32> to vector<2x128xf32>
    %18 = arith.mulf %8, %17 : vector<2x128xf32>
    %19 = vector.broadcast %1 : vector<1x128xf32> to vector<2x128xf32>
    %20 = arith.mulf %18, %19 : vector<2x128xf32>
    %21 = vector.broadcast %2 : vector<1x128xf32> to vector<2x128xf32>
    %22 = arith.addf %20, %21 : vector<2x128xf32>
    %23 = arith.truncf %22 : vector<2x128xf32> to vector<2x128xbf16>
    %c0_9 = arith.constant 0 : index
    %c0_10 = arith.constant 0 : index
    %24 = vector.load %arg4[%c0_9, %c0_10] : memref<128x128xbf16, #tpu.memory_space<vmem>>, vector<128x128xbf16>
    %cst_11 = arith.constant dense<0.000000e+00> : vector<2x128xf32>
    %25 = tpu.matmul %23, %24, %cst_11 {dimension_numbers = #tpu.dot_dimension_numbers<[1], [0], [0], [1], [0, 0, 1, 1], [], []>} : vector<2x128xbf16>, vector<128x128xbf16>, vector<2x128xf32> -> vector<2x128xf32>
    %c0_12 = arith.constant 0 : index
    %c0_13 = arith.constant 0 : index
    %26 = vector.load %arg5[%c0_12, %c0_13] : memref<1x128xf32, #tpu.memory_space<vmem>>, vector<1x128xf32>
    %27 = vector.broadcast %26 : vector<1x128xf32> to vector<2x128xf32>
    %28 = arith.addf %25, %27 : vector<2x128xf32>
    %c0_14 = arith.constant 0 : index
    %c0_15 = arith.constant 0 : index
    %29 = vector.load %arg6[%c0_14, %c0_15] : memref<2x128xf32, #tpu.memory_space<vmem>>, vector<2x128xf32>
    tpu.vector_store %arg6[%c0_14, %c0_15], %28 {strides = array<i32>} : memref<2x128xf32, #tpu.memory_space<vmem>>, vector<2x128xf32>,
    return
  }
  func.func @transform_0(%arg0: i32) -> (i32, i32) {
    %c0_i32 = arith.constant 0 : i32
    %c0_i32_0 = arith.constant 0 : i32
    return %arg0, %c0_i32 : i32, i32
  }
  func.func @transform_1(%arg0: i32) -> (i32, i32) {
    %c0_i32 = arith.constant 0 : i32
    %c0_i32_0 = arith.constant 0 : i32
    %c0_i32_1 = arith.constant 0 : i32
    return %c0_i32, %c0_i32_0 : i32, i32
  }
  func.func @transform_2(%arg0: i32) -> (i32, i32) {
    %c0_i32 = arith.constant 0 : i32
    %c0_i32_0 = arith.constant 0 : i32
    %c0_i32_1 = arith.constant 0 : i32
    return %c0_i32, %c0_i32_0 : i32, i32
  }
  func.func @transform_3(%arg0: i32) -> (i32, i32) {
    %c0_i32 = arith.constant 0 : i32
    %c0_i32_0 = arith.constant 0 : i32
    %c0_i32_1 = arith.constant 0 : i32
    return %c0_i32, %c0_i32_0 : i32, i32
  }
  func.func @transform_4(%arg0: i32) -> (i32, i32) {
    %c0_i32 = arith.constant 0 : i32
    %c0_i32_0 = arith.constant 0 : i32
    %c0_i32_1 = arith.constant 0 : i32
    return %c0_i32, %c0_i32_0 : i32, i32
  }
  func.func @transform_5(%arg0: i32) -> (i32, i32) {
    %c0_i32 = arith.constant 0 : i32
    %c0_i32_0 = arith.constant 0 : i32
    return %arg0, %c0_i32 : i32, i32
  }
}

</mosaic_0001>

<bundles_post_ra>
// kernel: vit_forward.8
= control target key start
LH: loop header
LB: loop body
LE: loop exit
PB: predicated region body
PF: predicated region fallthrough
CT: control target
= control target key end

     0   :  { %s1045_s1 = inlined_call_operand.vmem [shape: bf16[768,128], index: 1, kind: input, shape index: {}]   ;;  %s1046_s0 = inlined_call_operand.vmem [shape: f32[32,768], index: 0, kind: input, shape index: {}]   ;;  %s1047_s2 = inlined_call_operand.vmem [shape: f32[1,128], index: 2, kind: input, shape index: {}]   ;;  %s1048_s3 = inlined_call_operand.vmem [shape: f32[32,128], index: 3, kind: output, shape index: {}]  }
   0x1   :  { %v746_v0 = vld [vmem:[%s1045_s1 + $0x78] sm:$0xff]   ;;  %v750_v4 = vld [vmem:[%s1045_s1 + $0x70] sm:$0xff]   ;;  %v754_v8 = vld [vmem:[%s1045_s1 + $0x68] sm:$0xff]  }
   0x2   :  { %v747_v1 = vld [vmem:[%s1045_s1 + $0xf8] sm:$0xff]   ;;  %646 = vmatprep.subr.bf16.mxu0 %v746_v0  ;;  %v751_v5 = vld [vmem:[%s1045_s1 + $0xf0] sm:$0xff]   ;;  %v755_v9 = vld [vmem:[%s1045_s1 + $0xe8] sm:$0xff]  }
   0x3   :  { %v748_v2 = vld [vmem:[%s1045_s1 + $0x38] sm:$0xff]   ;;  %674 = vmatprep.subr.bf16.mxu1 %v747_v1  ;;  %v752_v6 = vld [vmem:[%s1045_s1 + $0x30] sm:$0xff]   ;;  %v756_v10 = vld [vmem:[%s1045_s1 + $0x28] sm:$0xff]  }
   0x4   :  { %v749_v3 = vld [vmem:[%s1045_s1 + $0xb8] sm:$0xff]   ;;  %647 = vmatpush3.bf16.msra.mxu0 %v748_v2  ;;  %v753_v7 = vld [vmem:[%s1045_s1 + $0xb0] sm:$0xff]   ;;  %v757_v11 = vld [vmem:[%s1045_s1 + $0xa8] sm:$0xff]  }
   0x5   :  { %675 = vmatpush3.bf16.msra.mxu1 %v749_v3  ;;  %648 = vmatprep.subr.bf16.mxu0 %v750_v4  ;;  %v758_v12 = vld [vmem:[%s1045_s1 + $0x60] sm:$0xff]   ;;  %v762_v16 = vld [vmem:[%s1045_s1 + $0x58] sm:$0xff]   ;;  %v766_v20 = vld [vmem:[%s1045_s1 + $0x50] sm:$0xff]  }
   0x6   :  { %676 = vmatprep.subr.bf16.mxu1 %v751_v5  ;;  %v759_v13 = vld [vmem:[%s1045_s1 + $0xe0] sm:$0xff]   ;;  %v763_v17 = vld [vmem:[%s1045_s1 + $0xd8] sm:$0xff]   ;;  %v767_v21 = vld [vmem:[%s1045_s1 + $0xd0] sm:$0xff]  }
   0x7   :  { %v760_v14 = vld [vmem:[%s1045_s1 + $0x20] sm:$0xff]   ;;  %v764_v18 = vld [vmem:[%s1045_s1 + $0x18] sm:$0xff]   ;;  %v768_v22 = vld [vmem:[%s1045_s1 + $0x10] sm:$0xff]  }
   0x8   :  { %649 = vmatpush3.bf16.msra.mxu0 %v752_v6  ;;  %v761_v15 = vld [vmem:[%s1045_s1 + $0xa0] sm:$0xff]   ;;  %v765_v19 = vld [vmem:[%s1045_s1 + $0x98] sm:$0xff]   ;;  %v769_v23 = vld [vmem:[%s1045_s1 + $0x90] sm:$0xff]  }
   0x9   :  { %677 = vmatpush3.bf16.msra.mxu1 %v753_v7  ;;  %650 = vmatprep.subr.bf16.mxu0 %v754_v8  ;;  %v770_v24 = vld [vmem:[%s1045_s1 + $0x48] sm:$0xff]   ;;  %v774_v28 = vld [vmem:[%s1045_s1 + $0x40] sm:$0xff]   ;;  %v22_v33 = vld [vmem:[%s1046_s0 + $0x38] sm:$0xff] }
   0xa   :  { %678 = vmatprep.subr.bf16.mxu1 %v755_v9  ;;  %v771_v25 = vld [vmem:[%s1045_s1 + $0xc8] sm:$0xff]   ;;  %v775_v29 = vld [vmem:[%s1045_s1 + $0xc0] sm:$0xff]   ;;  %v18_v34 = vld [vmem:[%s1046_s0 + $0x18] sm:$0xff] }
   0xb   :  { %v772_v26 = vld [vmem:[%s1045_s1 + $0x8] sm:$0xff]   ;;  %v776_v30 = vld [vmem:[%s1045_s1] sm:$0xff]   ;;  %v21_v38 = vld [vmem:[%s1046_s0 + $0x30] sm:$0xff] }
   0xc   :  { %651 = vmatpush3.bf16.msra.mxu0 %v756_v10  ;;  %v773_v27 = vld [vmem:[%s1045_s1 + $0x88] sm:$0xff]   ;;  %v777_v31 = vld [vmem:[%s1045_s1 + $0x80] sm:$0xff]   ;;  %v17_v41 = vld [vmem:[%s1046_s0 + $0x10] sm:$0xff] }
   0xd   :  { %679 = vmatpush3.bf16.msra.mxu1 %v757_v11  ;;  %652 = vmatprep.subr.bf16.mxu0 %v758_v12  ;;  %v16_v32 = vld [vmem:[%s1046_s0 + $0x8] sm:$0xff]  ;;  %v15_v37 = vld [vmem:[%s1046_s0] sm:$0xff]  ;;  %v778_v44 = vld [vmem:[%s1045_s1 + $0x178] sm:$0xff]  }
   0xe   :  { %680 = vmatprep.subr.bf16.mxu1 %v759_v13  ;;  %v40_v35 = vpack.c.bf16 %v22_v33, %v16_v32  ;;  %v24_v36 = vld [vmem:[%s1046_s0 + $0x48] sm:$0xff]  ;;  %v39_v40 = vpack.c.bf16 %v21_v38, %v15_v37  ;;  %v23_v42 = vld [vmem:[%s1046_s0 + $0x40] sm:$0xff]  ;;  %v779_v45 = vld [vmem:[%s1045_s1 + $0x138] sm:$0xff]  }
   0xf   :  { %v42_v39 = vpack.c.bf16 %v24_v36, %v18_v34  ;;  %v41_v43 = vpack.c.bf16 %v23_v42, %v17_v41  ;;  %v780_v46 = vld [vmem:[%s1045_s1 + $0x170] sm:$0xff]   ;;  %v782_v48 = vld [vmem:[%s1045_s1 + $0x168] sm:$0xff]   ;;  %v784_v50 = vld [vmem:[%s1045_s1 + $0x160] sm:$0xff]  }
  0x10   :  { %653 = vmatpush3.bf16.msra.mxu0 %v760_v14  ;;  %474 = vmatprep.mubr.bf16.mxu0 %v40_v35  ;;  %v781_v47 = vld [vmem:[%s1045_s1 + $0x130] sm:$0xff]   ;;  %v783_v49 = vld [vmem:[%s1045_s1 + $0x128] sm:$0xff]   ;;  %v34_v52 = vld [vmem:[%s1046_s0 + $0x98] sm:$0xff] }
  0x11   :  { %681 = vmatpush3.bf16.msra.mxu1 %v761_v15  ;;  %654 = vmatprep.subr.bf16.mxu0 %v762_v16  ;;  %v28_v51 = vld [vmem:[%s1046_s0 + $0x68] sm:$0xff]  ;;  %v27_v53 = vld [vmem:[%s1046_s0 + $0x60] sm:$0xff]  ;;  %v33_v54 = vld [vmem:[%s1046_s0 + $0x90] sm:$0xff] }
  0x12   :  { %682 = vmatprep.subr.bf16.mxu1 %v763_v17  ;;  %523 = vmatprep.mubr.bf16.mxu1 %v42_v39  ;;  %v785_v55 = vld [vmem:[%s1045_s1 + $0x120] sm:$0xff]   ;;  %v46_v56 = vpack.c.bf16 %v34_v52, %v28_v51  ;;  %v45_v57 = vpack.c.bf16 %v33_v54, %v27_v53  ;;  %v30_v58 = vld [vmem:[%s1046_s0 + $0x78] sm:$0xff]  ;;  %v36_v59 = vld [vmem:[%s1046_s0 + $0xa8] sm:$0xff] }
  0x13   :  { %v786_v60 = vld [vmem:[%s1045_s1 + $0x158] sm:$0xff]   ;;  %v48_v61 = vpack.c.bf16 %v36_v59, %v30_v58  ;;  %v29_v62 = vld [vmem:[%s1046_s0 + $0x70] sm:$0xff]  ;;  %v35_v63 = vld [vmem:[%s1046_s0 + $0xa0] sm:$0xff] }
  0x14   :  { %655 = vmatpush3.bf16.msra.mxu0 %v764_v18  ;;  %v47_v0 = vpack.c.bf16 %v35_v63, %v29_v62  ;;  %v787_v1 = vld [vmem:[%s1045_s1 + $0x118] sm:$0xff]   ;;  %v788_v2 = vld [vmem:[%s1045_s1 + $0x150] sm:$0xff]   ;;  %v20_v3 = vld [vmem:[%s1046_s0 + $0x28] sm:$0xff] }
  0x15   :  { %683 = vmatpush3.bf16.msra.mxu1 %v765_v19  ;;  %656 = vmatprep.subr.bf16.mxu0 %v766_v20  ;;  %v26_v4 = vld [vmem:[%s1046_s0 + $0x58] sm:$0xff]  ;;  %v789_v5 = vld [vmem:[%s1045_s1 + $0x110] sm:$0xff]   ;;  %v32_v7 = vld [vmem:[%s1046_s0 + $0x88] sm:$0xff] }
  0x16   :  { %684 = vmatprep.subr.bf16.mxu1 %v767_v21  ;;  %v44_v6 = vpack.c.bf16 %v26_v4, %v20_v3  ;;  %v38_v8 = vld [vmem:[%s1046_s0 + $0xb8] sm:$0xff]  ;;  %v790_v9 = vld [vmem:[%s1045_s1 + $0x148] sm:$0xff]   ;;  %v792_v12 = vld [vmem:[%s1045_s1 + $0x140] sm:$0xff]  }
  0x17   :  { %v50_v10 = vpack.c.bf16 %v38_v8, %v32_v7  ;;  %v791_v11 = vld [vmem:[%s1045_s1 + $0x108] sm:$0xff]   ;;  %v793_v13 = vld [vmem:[%s1045_s1 + $0x100] sm:$0xff]   ;;  %v25_v15 = vld [vmem:[%s1046_s0 + $0x50] sm:$0xff] }
  0x18   :  { %657 = vmatpush3.bf16.msra.mxu0 %v768_v22  ;;  %v19_v14 = vld [vmem:[%s1046_s0 + $0x20] sm:$0xff]  ;;  %v37_v17 = vld [vmem:[%s1046_s0 + $0xb0] sm:$0xff] }
  0x19   :  { %685 = vmatpush3.bf16.msra.mxu1 %v769_v23  ;;  %658 = vmatprep.subr.bf16.mxu0 %v770_v24  ;;  %v31_v16 = vld [vmem:[%s1046_s0 + $0x80] sm:$0xff]  ;;  %v43_v18 = vpack.c.bf16 %v25_v15, %v19_v14 }
  0x1a   :  { %686 = vmatprep.subr.bf16.mxu1 %v771_v25  ;;  %v49_v19 = vpack.c.bf16 %v37_v17, %v31_v16  ;;  %v597_v35 = vld [vmem:[%s1047_s2] ss:$0 sm:$0xff] }
  0x1c   :  { %659 = vmatpush3.bf16.msra.mxu0 %v772_v26 }
  0x1d   :  { %687 = vmatpush3.bf16.msra.mxu1 %v773_v27  ;;  %660 = vmatprep.subr.bf16.mxu0 %v774_v28 }
  0x1e   :  { %688 = vmatprep.subr.bf16.mxu1 %v775_v29 }
  0x20   :  { %661 = vmatpush3.bf16.msra.mxu0 %v776_v30 }
  0x21   :  { %689 = vmatpush3.bf16.msra.mxu1 %v777_v31  ;;  %702 = vmatprep.subr.bf16.mxu0 %v778_v44 }
  0x22   :  { %730 = vmatprep.subr.bf16.mxu1 %v778_v44 }
  0x23   :  { %475 = vmatmul.mubr.bf16.vlgmr.msra.gmra.mxu0 %v39_v40 }
  0x24   :  { %524 = vmatmul.mubr.bf16.vlgmr.msra.gmra.mxu1 %v41_v43  ;;  %703 = vmatpush3.bf16.msra.mxu0 %v779_v45 }
  0x25   :  { %738 = vmatpush3.bf16.msra.mxu1 %v779_v45  ;;  %704 = vmatprep.subr.bf16.mxu0 %v780_v46 }
  0x26   :  { %731 = vmatprep.subr.bf16.mxu1 %v780_v46  ;;  %482 = vmatprep.mubr.bf16.mxu0 %v46_v56 }
  0x27   :  { %531 = vmatprep.mubr.bf16.mxu1 %v48_v61 }
  0x28   :  { %705 = vmatpush3.bf16.msra.mxu0 %v781_v47 }
  0x29   :  { %739 = vmatpush3.bf16.msra.mxu1 %v781_v47  ;;  %706 = vmatprep.subr.bf16.mxu0 %v782_v48 }
  0x2a   :  { %732 = vmatprep.subr.bf16.mxu1 %v782_v48 }
  0x2b   :  { %483 = vmatmul.mubr.bf16.gmra.mxu0 %v45_v57 }
  0x2c   :  { %707 = vmatpush3.bf16.msra.mxu0 %v783_v49  ;;  %532 = vmatmul.mubr.bf16.gmra.mxu1 %v47_v0 }
  0x2d   :  { %740 = vmatpush3.bf16.msra.mxu1 %v783_v49  ;;  %708 = vmatprep.subr.bf16.mxu0 %v784_v50 }
  0x2e   :  { %733 = vmatprep.subr.bf16.mxu1 %v784_v50  ;;  %572 = vmatprep.mubr.bf16.mxu0 %v44_v6 }
  0x2f   :  { %580 = vmatprep.mubr.bf16.mxu1 %v50_v10 }
  0x30   :  { %709 = vmatpush3.bf16.msra.mxu0 %v785_v55 }
  0x31   :  { %741 = vmatpush3.bf16.msra.mxu1 %v785_v55  ;;  %710 = vmatprep.subr.bf16.mxu0 %v786_v60 }
  0x32   :  { %734 = vmatprep.subr.bf16.mxu1 %v786_v60 }
  0x34   :  { %711 = vmatpush3.bf16.msra.mxu0 %v787_v1 }
  0x35   :  { %742 = vmatpush3.bf16.msra.mxu1 %v787_v1  ;;  %712 = vmatprep.subr.bf16.mxu0 %v788_v2 }
  0x36   :  { %735 = vmatprep.subr.bf16.mxu1 %v788_v2 }
  0x38   :  { %713 = vmatpush3.bf16.msra.mxu0 %v789_v5 }
  0x39   :  { %743 = vmatpush3.bf16.msra.mxu1 %v789_v5  ;;  %714 = vmatprep.subr.bf16.mxu0 %v790_v9 }
  0x3a   :  { %736 = vmatprep.subr.bf16.mxu1 %v790_v9 }
  0x3c   :  { %715 = vmatpush3.bf16.msra.mxu0 %v791_v11 }
  0x3d   :  { %744 = vmatpush3.bf16.msra.mxu1 %v791_v11  ;;  %716 = vmatprep.subr.bf16.mxu0 %v792_v12 }
  0x3e   :  { %737 = vmatprep.subr.bf16.mxu1 %v792_v12 }
  0x40   :  { %717 = vmatpush3.bf16.msra.mxu0 %v793_v13 }
  0x41   :  { %745 = vmatpush3.bf16.msra.mxu1 %v793_v13 }
  0x43   :  { %573 = vmatmul.mubr.bf16.vlgmr.msra.gmra.mxu0 %v43_v18 }
  0x44   :  { %581 = vmatmul.mubr.bf16.vlgmr.msra.gmra.mxu1 %v49_v19 }
  0xe3   :  { %v662_v20 = vpop.f32.mrf.mxu0 }
  0xe4   :  { %v690_v21 = vpop.f32.mrf.mxu1 }
  0xe5   :  { %v663_v22 = vpop.f32.mrf.mxu0 }
  0xe6   :  { %v691_v23 = vpop.f32.mrf.mxu1  ;;  %v664_v33 = vadd.f32 %v663_v22, %v662_v20 }
  0xe7   :  { %v665_v24 = vpop.f32.mrf.mxu0  ;;  %v692_v45 = vadd.f32 %v691_v23, %v690_v21 }
  0xe8   :  { %v693_v25 = vpop.f32.mrf.mxu1  ;;  %v477_v38 = vadd.f32 %v664_v33, %v597_v35 }
  0xe9   :  { %v666_v26 = vpop.f32.mrf.mxu0 }
  0xea   :  { %v694_v27 = vpop.f32.mrf.mxu1  ;;  %v667_v39 = vadd.f32 %v666_v26, %v665_v24  ;;  %v526_v48 = vadd.f32 %v692_v45, %v477_v38 }
  0xeb   :  { %v668_v28 = vpop.f32.mrf.mxu0  ;;  %v695_v57 = vadd.f32 %v694_v27, %v693_v25 }
  0xec   :  { %v696_v29 = vpop.f32.mrf.mxu1  ;;  %v480_v49 = vadd.f32 %v667_v39, %v597_v35 }
  0xed   :  { %v669_v30 = vpop.f32.mrf.mxu0 }
  0xee   :  { %v697_v31 = vpop.f32.mrf.mxu1  ;;  %v670_v36 = vadd.f32 %v669_v30, %v668_v28  ;;  %v529_v62 = vadd.f32 %v695_v57, %v480_v49 }
  0xef   :  { %v671_v32 = vpop.f32.mrf.mxu0  ;;  %v698_v42 = vadd.f32 %v697_v31, %v696_v29 }
  0xf0   :  { %v699_v34 = vpop.f32.mrf.mxu1  ;;  %v485_v41 = vadd.f32 %v670_v36, %v597_v35 }
  0xf1   :  { %v672_v37 = vpop.f32.mrf.mxu0 }
  0xf2   :  { %v700_v40 = vpop.f32.mrf.mxu1  ;;  %v673_v43 = vadd.f32 %v672_v37, %v671_v32  ;;  %v534_v52 = vadd.f32 %v698_v42, %v485_v41 }
  0xf3   :  { %v701_v54 = vadd.f32 %v700_v40, %v699_v34 }
  0xf4   :  { %v488_v53 = vadd.f32 %v673_v43, %v597_v35 }
  0xf6   :  { %v537_v1 = vadd.f32 %v701_v54, %v488_v53 }
 0x103   :  { %v718_v44 = vpop.f32.mrf.mxu0 }
 0x104   :  { %v724_v46 = vpop.f32.mrf.mxu1 }
 0x105   :  { %v719_v47 = vpop.f32.mrf.mxu0 }
 0x106   :  { %v720_v50 = vadd.f32 %v719_v47, %v718_v44  ;;  %v725_v51 = vpop.f32.mrf.mxu1 }
 0x107   :  { %v726_v55 = vadd.f32 %v725_v51, %v724_v46  ;;  %v721_v56 = vpop.f32.mrf.mxu0 }
 0x108   :  { %v575_v58 = vadd.f32 %v720_v50, %v526_v48  ;;  %v727_v59 = vpop.f32.mrf.mxu1 }
 0x109   :  { %v583_v60 = vadd.f32 %v726_v55, %v534_v52  ;;  %v722_v61 = vpop.f32.mrf.mxu0 }
 0x10a   :  { %589 = vst [vmem:[%s1048_s3] sm:$0xff] %v575_v58  ;;  %v723_v63 = vadd.f32 %v722_v61, %v721_v56  ;;  %v728_v0 = vpop.f32.mrf.mxu1 }
 0x10b   :  { %591 = vst [vmem:[%s1048_s3 + $0x10] sm:$0xff] %v583_v60  ;;  %v729_v2 = vadd.f32 %v728_v0, %v727_v59 }
 0x10c   :  { %v578_v3 = vadd.f32 %v723_v63, %v529_v62 }
 0x10d   :  { %v586_v4 = vadd.f32 %v729_v2, %v537_v1 }
 0x10e   :  { %590 = vst [vmem:[%s1048_s3 + $0x8] sm:$0xff] %v578_v3 }
 0x10f   :  { %592 = vst [vmem:[%s1048_s3 + $0x18] sm:$0xff] %v586_v4 }

// kernel: vit_forward.9
= control target key start
LH: loop header
LB: loop body
LE: loop exit
PB: predicated region body
PF: predicated region fallthrough
CT: control target
= control target key end

     0   :  { %vm36_vm0 = vcmask 1041408   ;;  %v535_v7 = vmov 0.0   ;;  %v536_v47 = vmov 0   ;;  %vm537_vm1 = vmmov 0   ;;  %s753_s0 = inlined_call_operand.vmem [shape: f32[34,128], index: 0, kind: input, shape index: {}]   ;;  %s754_s3 = inlined_call_operand.vmem [shape: bf16[128,384], index: 3, kind: input, shape index: {}]   ;;  %s755_s1 = inlined_call_operand.vmem [shape: f32[1,128], index: 1, kind: input, shape index: {}]   ;;  %s756_s2 = inlined_call_operand.vmem [shape: f32[1,128], index: 2, kind: input, shape index: {}]   ;;  %s757_s4 = inlined_call_operand.vmem [shape: f32[1,384], index: 4, kind: input, shape index: {}]   ;;  %s758_s5 = inlined_call_operand.vmem [shape: f32[34,384], index: 5, kind: output, shape index: {}]  }
   0x1   :  { %v21_v0 = vld [vmem:[%s753_s0] sm:$0xff]  ;;  %v23_v1 = vld [vmem:[%s753_s0 + $0x10] sm:$0xff]  ;;  %v22_v2 = vld [vmem:[%s753_s0 + $0x8] sm:$0xff]  ;;  %462 = vmatprep.subr.bf16.mxu1 %v535_v7  ;;  %321 = vmatprep.mubr.bf16.mxu0 %v536_v47 }
   0x2   :  { %28 = vadd.xlane.f32.xlu0 %v21_v0  ;;  %32 = vadd.xlane.f32.xlu1 %v23_v1  ;;  %v24_v3 = vld [vmem:[%s753_s0 + $0x18] sm:$0xff]  ;;  %v25_v4 = vld [vmem:[%s753_s0 + $0x20] sm:$0x3]  ;;  %v495_v8 = vld [vmem:[%s754_s3 + $0xa8] ss:$12 sps:$4 sm:$0xff]  }
   0x3   :  { %v37_v5 = vsel %vm36_vm0, %v25_v4, 0.0  ;;  %v493_v6 = vld [vmem:[%s754_s3 + $0xac] ss:$12 sps:$4 sm:$0xff]   ;;  %v496_v9 = vld [vmem:[%s754_s3 + $0xb0] ss:$12 sps:$4 sm:$0xff]   ;;  %478 = vmatprep.mubr.msk.bf16.mxu1 %vm537_vm1, %v535_v7 }
   0x4   :  { %289 = vmatprep.subr.bf16.mxu0 %v493_v6  ;;  %463 = vmatpush3.bf16.msra.mxu1 %v496_v9  ;;  %v497_v31 = vld [vmem:[%s754_s3 + $0x94] ss:$12 sps:$4 sm:$0xff]   ;;  %v499_v32 = vld [vmem:[%s754_s3 + $0x90] ss:$12 sps:$4 sm:$0xff]   ;;  %v500_v33 = vld [vmem:[%s754_s3 + $0x98] ss:$12 sps:$4 sm:$0xff]  }
   0x5   :  { %290 = vmatpush1.bf16.msra.mxu0 %v495_v8  ;;  %464 = vmatprep.subr.bf16.mxu1 %v535_v7  ;;  %v501_v34 = vld [vmem:[%s754_s3 + $0x7c] ss:$12 sps:$4 sm:$0xff]   ;;  %v503_v35 = vld [vmem:[%s754_s3 + $0x78] ss:$12 sps:$4 sm:$0xff]   ;;  %v504_v36 = vld [vmem:[%s754_s3 + $0x80] ss:$12 sps:$4 sm:$0xff]  }
   0x6   :  { %30 = vadd.xlane.f32.xlu0 %v22_v2  ;;  %34 = vadd.xlane.f32.xlu1 %v24_v3  ;;  %v505_v37 = vld [vmem:[%s754_s3 + $0x64] ss:$12 sps:$4 sm:$0xff]   ;;  %v507_v38 = vld [vmem:[%s754_s3 + $0x60] ss:$12 sps:$4 sm:$0xff]   ;;  %v508_v39 = vld [vmem:[%s754_s3 + $0x68] ss:$12 sps:$4 sm:$0xff]  }
   0x7   :  { %291 = vmatprep.subr.bf16.mxu0 %v497_v31  ;;  %v509_v40 = vld [vmem:[%s754_s3 + $0x4c] ss:$12 sps:$4 sm:$0xff]   ;;  %v511_v41 = vld [vmem:[%s754_s3 + $0x48] ss:$12 sps:$4 sm:$0xff]   ;;  %v512_v42 = vld [vmem:[%s754_s3 + $0x50] ss:$12 sps:$4 sm:$0xff]   ;;  %v146_v31 = vlaneseq }
   0x8   :  { %465 = vmatpush3.bf16.msra.mxu1 %v500_v33  ;;  %v513_v43 = vld [vmem:[%s754_s3 + $0x34] ss:$12 sps:$4 sm:$0xff]   ;;  %v515_v44 = vld [vmem:[%s754_s3 + $0x30] ss:$12 sps:$4 sm:$0xff]   ;;  %v516_v45 = vld [vmem:[%s754_s3 + $0x38] ss:$12 sps:$4 sm:$0xff]  }
   0x9   :  { %292 = vmatpush1.bf16.msra.mxu0 %v499_v32  ;;  %466 = vmatprep.subr.bf16.mxu1 %v535_v7  ;;  %v517_v46 = vld [vmem:[%s754_s3 + $0x1c] ss:$12 sps:$4 sm:$0xff]   ;;  %v519_v48 = vld [vmem:[%s754_s3 + $0x18] ss:$12 sps:$4 sm:$0xff]   ;;  %v520_v49 = vld [vmem:[%s754_s3 + $0x20] ss:$12 sps:$4 sm:$0xff]  }
   0xa   :  { %38 = vadd.xlane.f32.xlu0 %v37_v5  ;;  %293 = vmatprep.subr.bf16.mxu0 %v501_v34  ;;  %v521_v50 = vld [vmem:[%s754_s3 + $0x4] ss:$12 sps:$4 sm:$0xff]   ;;  %v523_v51 = vld [vmem:[%s754_s3] ss:$12 sps:$4 sm:$0xff]   ;;  %v524_v52 = vld [vmem:[%s754_s3 + $0x8] ss:$12 sps:$4 sm:$0xff]  }
   0xb   :  { %v425_v6 = vld [vmem:[%s755_s1] ss:$0 sm:$0xff]  ;;  %v147_v32 = vshrl.u32 %v146_v31, 7 }
   0xc   :  { %467 = vmatpush3.bf16.msra.mxu1 %v504_v36 }
   0xd   :  { %294 = vmatpush1.bf16.msra.mxu0 %v503_v35  ;;  %468 = vmatprep.subr.bf16.mxu1 %v535_v7  ;;  %v148_v33 = vsub.s32 0, %v147_v32  ;;  %v156_v34 = vsub.s32 2, %v147_v32  ;;  %v152_v35 = vsub.s32 1, %v147_v32 }
   0xe   :  { %295 = vmatprep.subr.bf16.mxu0 %v505_v37 }
  0x10   :  { %469 = vmatpush3.bf16.msra.mxu1 %v508_v39 }
  0x11   :  { %296 = vmatpush1.bf16.msra.mxu0 %v507_v38  ;;  %470 = vmatprep.subr.bf16.mxu1 %v535_v7 }
  0x12   :  { %297 = vmatprep.subr.bf16.mxu0 %v509_v40 }
  0x14   :  { %471 = vmatpush3.bf16.msra.mxu1 %v512_v42 }
  0x15   :  { %298 = vmatpush1.bf16.msra.mxu0 %v511_v41  ;;  %472 = vmatprep.subr.bf16.mxu1 %v535_v7 }
  0x16   :  { %299 = vmatprep.subr.bf16.mxu0 %v513_v43 }
  0x18   :  { %473 = vmatpush3.bf16.msra.mxu1 %v516_v45 }
  0x19   :  { %300 = vmatpush1.bf16.msra.mxu0 %v515_v44  ;;  %474 = vmatprep.subr.bf16.mxu1 %v535_v7 }
  0x1a   :  { %301 = vmatprep.subr.bf16.mxu0 %v517_v46 }
  0x1c   :  { %475 = vmatpush3.bf16.msra.mxu1 %v520_v49 }
  0x1d   :  { %302 = vmatpush1.bf16.msra.mxu0 %v519_v48  ;;  %476 = vmatprep.subr.bf16.mxu1 %v535_v7 }
  0x1e   :  { %303 = vmatprep.subr.bf16.mxu0 %v521_v50 }
  0x20   :  { %477 = vmatpush3.bf16.msra.mxu1 %v524_v52 }
  0x21   :  { %304 = vmatpush1.bf16.msra.mxu0 %v523_v51 }
  0x8b   :  { %v29_v10 = vpop.xlane.xlu0 %28  ;;  %v33_v11 = vpop.xlane.xlu1 %32 }
  0x8c   :  { %v41_v12 = vmul.f32 0.0078125, %v29_v10  ;;  %v43_v13 = vmul.f32 0.0078125, %v33_v11 }
  0x8e   :  { %v595_v14 = vsub.f32 %v21_v0, %v41_v12  ;;  %v597_v15 = vsub.f32 %v23_v1, %v43_v13  ;;  %v426_v12 = vld [vmem:[%s756_s2] ss:$0 sm:$0xff] }
  0x8f   :  { %v31_v16 = vpop.xlane.xlu0 %30  ;;  %v35_v17 = vpop.xlane.xlu1 %34 }
  0x90   :  { %v42_v18 = vmul.f32 0.0078125, %v31_v16  ;;  %v51_v19 = vmul.f32 %v595_v14, %v595_v14  ;;  %v44_v20 = vmul.f32 0.0078125, %v35_v17  ;;  %v53_v23 = vmul.f32 %v597_v15, %v597_v15 }
  0x92   :  { %v601_v21 = vsub.f32 %v22_v2, %v42_v18  ;;  %56 = vadd.xlane.f32.xlu1 %v51_v19  ;;  %v603_v22 = vsub.f32 %v24_v3, %v44_v20 }
  0x93   :  { %v39_v24 = vpop.xlane.xlu0 %38 }
  0x94   :  { %v45_v25 = vmul.f32 0.0078125, %v39_v24  ;;  %v52_v26 = vmul.f32 %v601_v21, %v601_v21  ;;  %v54_v28 = vmul.f32 %v603_v22, %v603_v22 }
  0x96   :  { %v609_v27 = vsub.f32 %v25_v4, %v45_v25  ;;  %60 = vadd.xlane.f32.xlu1 %v53_v23  ;;  %58 = vadd.xlane.f32.xlu0 %v52_v26 }
  0x98   :  { %v55_v29 = vmul.f32 %v609_v27, %v609_v27 }
  0x9a   :  { %62 = vadd.xlane.f32.xlu0 %v54_v28  ;;  %v64_v30 = vsel %vm36_vm0, %v55_v29, 0.0 }
  0x9b   :  { %65 = vadd.xlane.f32.xlu1 %v64_v30 }
 0x11b   :  { %v57_v53 = vpop.xlane.xlu1 %56 }
 0x11c   :  { %v67_v54 = vmul.f32 0.0078125, %v57_v53 }
 0x11e   :  { %v72_v55 = vadd.f32 1e-06, %v67_v54 }
 0x11f   :  { %v61_v56 = vpop.xlane.xlu1 %60  ;;  %v59_v57 = vpop.xlane.xlu0 %58 }
 0x120   :  { %525 = vrsqrt.f32 %v72_v55  ;;  %v69_v58 = vmul.f32 0.0078125, %v61_v56  ;;  %v68_v59 = vmul.f32 0.0078125, %v59_v57 }
 0x122   :  { %v73_v60 = vadd.f32 1e-06, %v68_v59  ;;  %v74_v61 = vadd.f32 1e-06, %v69_v58 }
 0x123   :  { %v63_v62 = vpop.xlane.xlu0 %62 }
 0x124   :  { %v70_v63 = vmul.f32 0.0078125, %v63_v62  ;;  %v66_v0 = vpop.xlane.xlu1 %65  ;;  %527 = vrsqrt.f32 %v73_v60 }
 0x125   :  { %v71_v1 = vmul.f32 0.0078125, %v66_v0  ;;  %529 = vrsqrt.f32 %v74_v61 }
 0x126   :  { %v75_v2 = vadd.f32 1e-06, %v70_v63 }
 0x127   :  { %v76_v3 = vadd.f32 1e-06, %v71_v1 }
 0x128   :  { %531 = vrsqrt.f32 %v75_v2 }
 0x129   :  { %533 = vrsqrt.f32 %v76_v3 }
 0x12d   :  { %v526_v4 = vpop.eup %525 }
 0x12e   :  { %v82_v5 = vmul.f32 %v526_v4, %v595_v14 }
 0x130   :  { %v93_v10 = vmul.f32 %v425_v6, %v82_v5 }
 0x131   :  { %v528_v8 = vpop.eup %527 }
 0x132   :  { %v83_v9 = vmul.f32 %v528_v8, %v601_v21  ;;  %v530_v11 = vpop.eup %529  ;;  %v104_v18 = vadd.f32 %v426_v12, %v93_v10 }
 0x133   :  { %v84_v14 = vmul.f32 %v530_v11, %v597_v15 }
 0x134   :  { %v94_v16 = vmul.f32 %v425_v6, %v83_v9 }
 0x135   :  { %v532_v13 = vpop.eup %531  ;;  %v95_v21 = vmul.f32 %v425_v6, %v84_v14 }
 0x136   :  { %v85_v17 = vmul.f32 %v532_v13, %v603_v22  ;;  %v105_v19 = vadd.f32 %v426_v12, %v94_v16  ;;  %v534_v24 = vpop.eup %533 }
 0x137   :  { %v86_v26 = vmul.f32 %v534_v24, %v609_v27  ;;  %v106_v28 = vadd.f32 %v426_v12, %v95_v21  ;;  %v144_v27 = vld [vmem:[%s757_s4] sm:$0x7] }
 0x138   :  { %v109_v20 = vpack.c.bf16 %v105_v19, %v104_v18  ;;  %v96_v23 = vmul.f32 %v425_v6, %v85_v17  ;;  %v149_v36 = vrot.slane %v144_v27, %v148_v33  ;;  %v157_v37 = vrot.slane %v144_v27, %v156_v34 }
 0x139   :  { %v97_v29 = vmul.f32 %v425_v6, %v86_v26  ;;  %v153_v38 = vrot.slane %v144_v27, %v152_v35 }
 0x13a   :  { %322 = vmatmul.mubr.bf16.vlgmr.msra.gmra.mxu0 %v109_v20  ;;  %479 = vmatmul.mubr.bf16.vlgmr.msra.gmra.mxu1 %v109_v20  ;;  %v107_v25 = vadd.f32 %v426_v12, %v96_v23 }
 0x13b   :  { %331 = vmatprep.mubr.bf16.mxu0 %v536_v47  ;;  %482 = vmatprep.mubr.msk.bf16.mxu1 %vm537_vm1, %v535_v7  ;;  %v108_v15 = vadd.f32 %v426_v12, %v97_v29 }
 0x13c   :  { %v110_v22 = vpack.c.bf16 %v107_v25, %v106_v28 }
 0x13d   :  { %v111_v30 = vpack.c.bf16 %v108_v15, %v108_v15 }
 0x142   :  { %332 = vmatmul.mubr.bf16.gmra.mxu0 %v110_v22  ;;  %483 = vmatmul.mubr.bf16.gmra.mxu1 %v110_v22 }
 0x143   :  { %341 = vmatprep.mubr.bf16.mxu0 %v536_v47  ;;  %486 = vmatprep.mubr.msk.bf16.mxu1 %vm537_vm1, %v535_v7 }
 0x14a   :  { %342 = vmatmul.mubr.bf16.gmra.mxu0 %v111_v30  ;;  %487 = vmatmul.mubr.bf16.gmra.mxu1 %v111_v30 }
 0x1fa   :  { %v323_v39 = vpop.f32.mrf.mxu0  ;;  %v384_v40 = vpop.f32.mrf.mxu1 }
 0x1fb   :  { %v324_v41 = vadd.f32 %v323_v39, %v149_v36  ;;  %v385_v7 = vadd.f32 %v384_v40, %v157_v37 }
 0x1fc   :  { %v325_v42 = vpop.f32.mrf.mxu0  ;;  %v480_v43 = vpop.f32.mrf.mxu1 }
 0x1fd   :  { %406 = vst [vmem:[%s758_s5] sm:$0xff] %v324_v41  ;;  %408 = vst [vmem:[%s758_s5 + $0x10] sm:$0xff] %v385_v7  ;;  %v326_v44 = vadd.f32 %v325_v42, %v153_v38 }
 0x1fe   :  { %v327_v45 = vpop.f32.mrf.mxu0  ;;  %v387_v46 = vpop.f32.mrf.mxu1 }
 0x1ff   :  { %407 = vst [vmem:[%s758_s5 + $0x8] sm:$0xff] %v326_v44  ;;  %v328_v47 = vadd.f32 %v327_v45, %v149_v36  ;;  %v388_v48 = vadd.f32 %v387_v46, %v157_v37 }
 0x200   :  { %v329_v49 = vpop.f32.mrf.mxu0  ;;  %v481_v50 = vpop.f32.mrf.mxu1 }
 0x201   :  { %409 = vst [vmem:[%s758_s5 + $0x18] sm:$0xff] %v328_v47  ;;  %411 = vst [vmem:[%s758_s5 + $0x28] sm:$0xff] %v388_v48  ;;  %v330_v51 = vadd.f32 %v329_v49, %v153_v38 }
 0x202   :  { %v333_v52 = vpop.f32.mrf.mxu0  ;;  %v392_v53 = vpop.f32.mrf.mxu1 }
 0x203   :  { %410 = vst [vmem:[%s758_s5 + $0x20] sm:$0xff] %v330_v51  ;;  %v334_v54 = vadd.f32 %v333_v52, %v149_v36  ;;  %v393_v55 = vadd.f32 %v392_v53, %v157_v37 }
 0x204   :  { %v335_v56 = vpop.f32.mrf.mxu0  ;;  %v484_v57 = vpop.f32.mrf.mxu1 }
 0x205   :  { %412 = vst [vmem:[%s758_s5 + $0x30] sm:$0xff] %v334_v54  ;;  %414 = vst [vmem:[%s758_s5 + $0x40] sm:$0xff] %v393_v55  ;;  %v336_v58 = vadd.f32 %v335_v56, %v153_v38 }
 0x206   :  { %v337_v59 = vpop.f32.mrf.mxu0  ;;  %v395_v60 = vpop.f32.mrf.mxu1 }
 0x207   :  { %413 = vst [vmem:[%s758_s5 + $0x38] sm:$0xff] %v336_v58  ;;  %v338_v61 = vadd.f32 %v337_v59, %v149_v36  ;;  %v396_v62 = vadd.f32 %v395_v60, %v157_v37 }
 0x208   :  { %v339_v63 = vpop.f32.mrf.mxu0  ;;  %v485_v0 = vpop.f32.mrf.mxu1 }
 0x209   :  { %415 = vst [vmem:[%s758_s5 + $0x48] sm:$0xff] %v338_v61  ;;  %417 = vst [vmem:[%s758_s5 + $0x58] sm:$0xff] %v396_v62  ;;  %v340_v1 = vadd.f32 %v339_v63, %v153_v38 }
 0x20a   :  { %v343_v2 = vpop.f32.mrf.mxu0  ;;  %v400_v3 = vpop.f32.mrf.mxu1 }
 0x20b   :  { %416 = vst [vmem:[%s758_s5 + $0x50] sm:$0xff] %v340_v1  ;;  %v344_v4 = vadd.f32 %v343_v2, %v149_v36  ;;  %v401_v5 = vadd.f32 %v400_v3, %v157_v37 }
 0x20c   :  { %v345_v6 = vpop.f32.mrf.mxu0  ;;  %v488_v8 = vpop.f32.mrf.mxu1 }
 0x20d   :  { %418 = vst [vmem:[%s758_s5 + $0x60] sm:$0x3] %v344_v4  ;;  %420 = vst [vmem:[%s758_s5 + $0x70] sm:$0x3] %v401_v5  ;;  %v346_v9 = vadd.f32 %v345_v6, %v153_v38 }
 0x20e   :  { %v347_v10 = vpop.f32.mrf.mxu0  ;;  %v403_v11 = vpop.f32.mrf.mxu1 }
 0x20f   :  { %419 = vst [vmem:[%s758_s5 + $0x68] sm:$0x3] %v346_v9 }
 0x210   :  { %v348_v12 = vpop.f32.mrf.mxu0  ;;  %v489_v13 = vpop.f32.mrf.mxu1 }

// kernel: vit_forward.15
= control target key start
LH: loop header
LB: loop body
LE: loop exit
PB: predicated region body
PF: predicated region fallthrough
CT: control target
= control target key end

     0   :  { %vm25_vm0 = vcmask 1041408   ;;  %s330_s0 = inlined_call_operand.vmem [shape: f32[2,128], index: 0, kind: input, shape index: {}]   ;;  %s331_s1 = inlined_call_operand.vmem [shape: f32[1,128], index: 1, kind: input, shape index: {}]   ;;  %s332_s2 = inlined_call_operand.vmem [shape: f32[1,128], index: 2, kind: input, shape index: {}]   ;;  %s333_s3 = inlined_call_operand.vmem [shape: bf16[128,128], index: 3, kind: input, shape index: {}]   ;;  %s334_s4 = inlined_call_operand.vmem [shape: f32[1,128], index: 4, kind: input, shape index: {}]   ;;  %s335_s5 = inlined_call_operand.hbm [shape: f32[2,128], index: 5, kind: output, shape index: {}]  }
   0x1   :  { %v22_v0 = vld [vmem:[%s330_s0] sm:$0x3] }
   0x2   :  { %v26_v1 = vsel %vm25_vm0, %v22_v0, 0.0 }
   0x3   :  { %27 = vadd.xlane.f32.xlu0 %v26_v1 }
   0x4   :  { %10 = vsyncpa [#allocation3], 0  ;;  %v224_v2 = vld [vmem:[%s333_s3 + $0x38] sm:$0xff]   ;;  %v256_v3 = vmov 0.0   ;;  %v225_v4 = vld [vmem:[%s333_s3 + $0x30] sm:$0xff]   ;;  %vm257_vm1 = vmmov 0  }
   0x5   :  { %201 = vmatprep.subr.bf16.mxu0 %v256_v3  ;;  %v226_v10 = vld [vmem:[%s333_s3 + $0x28] sm:$0xff]   ;;  %v227_v11 = vld [vmem:[%s333_s3 + $0x20] sm:$0xff]   ;;  %217 = vmatprep.mubr.msk.bf16.mxu0 %vm257_vm1, %v256_v3  ;;  %v228_v12 = vld [vmem:[%s333_s3 + $0x18] sm:$0xff]   ;;  %s258_s15 = smov [#allocation2]  }
   0x6   :  { %202 = vmatpush3.bf16.msra.mxu0 %v224_v2  ;;  %v229_v13 = vld [vmem:[%s333_s3 + $0x10] sm:$0xff]   ;;  %v230_v14 = vld [vmem:[%s333_s3 + $0x8] sm:$0xff]   ;;  %v231_v15 = vld [vmem:[%s333_s3] sm:$0xff]   ;;  %s173_s16 = sshll.u32 %s258_s15, 4  ;;  %s174_s16 = int_to_ptr.vmem [resolvable:$true] %s173_s16 }
   0x7   :  { %203 = vmatprep.subr.bf16.mxu0 %v256_v3  ;;  %v181_v20 = vld [vmem:[%s331_s1] ss:$0 sm:$0xff]  ;;  %s234_s1 = scalar_lea.vmem %s174_s16, 32  ;;  %p239_p1 = scmp.lt.s32.totalorder %s174_s16, %s174_s16 }
   0x8   :  { %v182_v22 = vld [vmem:[%s332_s2] ss:$0 sm:$0xff]  ;;  %p235_p0 = scmp.ne.s32.totalorder %s174_s16, %s234_s1  ;;  %p240_p2 = scmp.lt.s32.totalorder %s234_s1, %s234_s1 }
   0x9   :  { %v183_v26 = vld [vmem:[%s334_s4] ss:$0 sm:$0xff] }
   0xa   :  { %204 = vmatpush3.bf16.msra.mxu0 %v225_v4  ;;  %p241_p3 = por %p240_p2, %p239_p1 }
   0xb   :  { %205 = vmatprep.subr.bf16.mxu0 %v256_v3 }
   0xc   :  { %p242_p4 = pnand %p241_p3, %p235_p0 }
   0xe   :  { %206 = vmatpush3.bf16.msra.mxu0 %v226_v10 }
   0xf   :  { %207 = vmatprep.subr.bf16.mxu0 %v256_v3 }
  0x12   :  { %208 = vmatpush3.bf16.msra.mxu0 %v227_v11 }
  0x13   :  { %209 = vmatprep.subr.bf16.mxu0 %v256_v3 }
  0x16   :  { %210 = vmatpush3.bf16.msra.mxu0 %v228_v12 }
  0x17   :  { %211 = vmatprep.subr.bf16.mxu0 %v256_v3 }
  0x1a   :  { %212 = vmatpush3.bf16.msra.mxu0 %v229_v13 }
  0x1b   :  { %213 = vmatprep.subr.bf16.mxu0 %v256_v3 }
  0x1e   :  { %214 = vmatpush3.bf16.msra.mxu0 %v230_v14 }
  0x1f   :  { %215 = vmatprep.subr.bf16.mxu0 %v256_v3 }
  0x22   :  { %216 = vmatpush3.bf16.msra.mxu0 %v231_v15 }
  0x8c   :  { %v28_v5 = vpop.xlane.xlu0 %27 }
  0x8d   :  { %v30_v6 = vmul.f32 0.0078125, %v28_v5 }
  0x8f   :  { %v31_v7 = vsub.f32 %v22_v0, %v30_v6 }
  0x91   :  { %v32_v8 = vmul.f32 %v31_v7, %v31_v7 }
  0x93   :  { %v33_v9 = vsel %vm25_vm0, %v32_v8, 0.0 }
  0x94   :  { %34 = vadd.xlane.f32.xlu0 %v33_v9 }
 0x11d   :  { %v35_v16 = vpop.xlane.xlu0 %34 }
 0x11e   :  { %v36_v17 = vmul.f32 0.0078125, %v35_v16 }
 0x120   :  { %v37_v18 = vadd.f32 1e-06, %v36_v17 }
 0x122   :  { %232 = vrsqrt.f32 %v37_v18 }
 0x12f   :  { %v233_v19 = vpop.eup %232 }
 0x130   :  { %v39_v21 = vmul.f32 %v233_v19, %v31_v7 }
 0x132   :  { %v46_v23 = vmul.f32 %v181_v20, %v39_v21 }
 0x134   :  { %v53_v24 = vadd.f32 %v182_v22, %v46_v23 }
 0x136   :  { %v54_v25 = vpack.c.bf16 %v53_v24, %v53_v24 }
 0x138   :  { %218 = vmatmul.mubr.bf16.vlgmr.msra.gmra.mxu0 %v54_v25 }
 0x1f8   :  { %v160_v27 = vpop.f32.mrf.mxu0 }
 0x1f9   :  { %v161_v28 = vadd.f32 %v183_v26, %v160_v27 }
 0x1fa   :  { %v219_v29 = vpop.f32.mrf.mxu0 }
 0x1fb   :  { %166 = vst [vmem:[#allocation2] sm:$0x3] %v161_v28 }
 0x1fc   :  { %v163_v30 = vpop.f32.mrf.mxu0 }
 0x1fd   :  { %245 = shalt.err (!%p242_p4)
}
 0x1fe   :  { %176 = dma.vmem_to_hbm [thread:$0]  %s174_s16, 32, %s335_s5, [#allocation3]   ;;  %v220_v31 = vpop.f32.mrf.mxu0 }
 0x1ff   :  { %254 = dma.done.wait [#allocation3], 32  }
 0x200   :  { %255 = vsyncadd [#allocation3], 4294967264 }
 0x201   :  { %180 = vsyncpa [#allocation3], 1 }

// kernel: vit_forward.11
= control target key start
LH: loop header
LB: loop body
LE: loop exit
PB: predicated region body
PF: predicated region fallthrough
CT: control target
= control target key end

     0   :  { %vm42_vm0 = vcmask 1041408   ;;  %v1306_v53 = vmov 0   ;;  %s1795_s0 = inlined_call_operand.vmem [shape: f32[34,128], index: 0, kind: input, shape index: {}]   ;;  %s1796_s3 = inlined_call_operand.vmem [shape: bf16[128,512], index: 3, kind: input, shape index: {}]   ;;  %s1797_s1 = inlined_call_operand.vmem [shape: f32[1,128], index: 1, kind: input, shape index: {}]   ;;  %s1798_s2 = inlined_call_operand.vmem [shape: f32[1,128], index: 2, kind: input, shape index: {}]   ;;  %s1799_s5 = inlined_call_operand.vmem [shape: bf16[512,128], index: 5, kind: input, shape index: {}]   ;;  %s1800_s4 = inlined_call_operand.vmem [shape: f32[1,512], index: 4, kind: input, shape index: {}]   ;;  %s1801_s6 = inlined_call_operand.vmem [shape: f32[1,128], index: 6, kind: input, shape index: {}]   ;;  %s1802_s7 = inlined_call_operand.vmem [shape: f32[34,128], index: 7, kind: output, shape index: {}]  }
   0x1   :  { %v27_v0 = vld [vmem:[%s1795_s0] sm:$0xff]  ;;  %v29_v1 = vld [vmem:[%s1795_s0 + $0x10] sm:$0xff]  ;;  %v28_v2 = vld [vmem:[%s1795_s0 + $0x8] sm:$0xff]  ;;  %364 = vmatprep.mubr.bf16.mxu0 %v1306_v53  ;;  %425 = vmatprep.mubr.bf16.mxu1 %v1306_v53 }
   0x2   :  { %34 = vadd.xlane.f32.xlu0 %v27_v0  ;;  %38 = vadd.xlane.f32.xlu1 %v29_v1  ;;  %v30_v3 = vld [vmem:[%s1795_s0 + $0x18] sm:$0xff]  ;;  %v31_v4 = vld [vmem:[%s1795_s0 + $0x20] sm:$0x3]  ;;  %v1171_v6 = vld [vmem:[%s1796_s3 + $0xe4] ss:$16 sps:$4 sm:$0xff]  }
   0x3   :  { %v43_v5 = vsel %vm42_vm0, %v31_v4, 0.0  ;;  %v1173_v7 = vld [vmem:[%s1796_s3 + $0xec] ss:$16 sps:$4 sm:$0xff]   ;;  %332 = vmatprep.subr.bf16.mxu0 %v1171_v6  ;;  %v1175_v8 = vld [vmem:[%s1796_s3 + $0xe0] ss:$16 sps:$4 sm:$0xff]  }
   0x4   :  { %v1176_v9 = vld [vmem:[%s1796_s3 + $0xe8] ss:$16 sps:$4 sm:$0xff]   ;;  %393 = vmatprep.subr.bf16.mxu1 %v1173_v7  ;;  %333 = vmatpush1.bf16.msra.mxu0 %v1175_v8  ;;  %v1177_v31 = vld [vmem:[%s1796_s3 + $0xc4] ss:$16 sps:$4 sm:$0xff]   ;;  %v1179_v32 = vld [vmem:[%s1796_s3 + $0xcc] ss:$16 sps:$4 sm:$0xff]  }
   0x5   :  { %394 = vmatpush1.bf16.msra.mxu1 %v1176_v9  ;;  %v1181_v33 = vld [vmem:[%s1796_s3 + $0xc0] ss:$16 sps:$4 sm:$0xff]   ;;  %v1182_v34 = vld [vmem:[%s1796_s3 + $0xc8] ss:$16 sps:$4 sm:$0xff]   ;;  %334 = vmatprep.subr.bf16.mxu0 %v1177_v31  ;;  %v1183_v35 = vld [vmem:[%s1796_s3 + $0xa4] ss:$16 sps:$4 sm:$0xff]  }
   0x6   :  { %36 = vadd.xlane.f32.xlu0 %v28_v2  ;;  %40 = vadd.xlane.f32.xlu1 %v30_v3  ;;  %v1185_v36 = vld [vmem:[%s1796_s3 + $0xac] ss:$16 sps:$4 sm:$0xff]   ;;  %v1187_v37 = vld [vmem:[%s1796_s3 + $0xa0] ss:$16 sps:$4 sm:$0xff]   ;;  %v1188_v38 = vld [vmem:[%s1796_s3 + $0xa8] ss:$16 sps:$4 sm:$0xff]  }
   0x7   :  { %395 = vmatprep.subr.bf16.mxu1 %v1179_v32  ;;  %v1189_v39 = vld [vmem:[%s1796_s3 + $0x84] ss:$16 sps:$4 sm:$0xff]   ;;  %v1191_v40 = vld [vmem:[%s1796_s3 + $0x8c] ss:$16 sps:$4 sm:$0xff]   ;;  %v1193_v41 = vld [vmem:[%s1796_s3 + $0x80] ss:$16 sps:$4 sm:$0xff]  }
   0x8   :  { %335 = vmatpush1.bf16.msra.mxu0 %v1181_v33  ;;  %v1194_v42 = vld [vmem:[%s1796_s3 + $0x88] ss:$16 sps:$4 sm:$0xff]   ;;  %v1195_v43 = vld [vmem:[%s1796_s3 + $0x64] ss:$16 sps:$4 sm:$0xff]   ;;  %v1197_v44 = vld [vmem:[%s1796_s3 + $0x6c] ss:$16 sps:$4 sm:$0xff]  }
   0x9   :  { %396 = vmatpush1.bf16.msra.mxu1 %v1182_v34  ;;  %336 = vmatprep.subr.bf16.mxu0 %v1183_v35  ;;  %v1199_v45 = vld [vmem:[%s1796_s3 + $0x60] ss:$16 sps:$4 sm:$0xff]   ;;  %v1200_v46 = vld [vmem:[%s1796_s3 + $0x68] ss:$16 sps:$4 sm:$0xff]   ;;  %v1201_v47 = vld [vmem:[%s1796_s3 + $0x44] ss:$16 sps:$4 sm:$0xff]  }
   0xa   :  { %44 = vadd.xlane.f32.xlu0 %v43_v5  ;;  %397 = vmatprep.subr.bf16.mxu1 %v1185_v36  ;;  %v1203_v48 = vld [vmem:[%s1796_s3 + $0x4c] ss:$16 sps:$4 sm:$0xff]   ;;  %v1205_v49 = vld [vmem:[%s1796_s3 + $0x40] ss:$16 sps:$4 sm:$0xff]   ;;  %v1206_v50 = vld [vmem:[%s1796_s3 + $0x48] ss:$16 sps:$4 sm:$0xff]  }
   0xb   :  { %v1207_v51 = vld [vmem:[%s1796_s3 + $0x24] ss:$16 sps:$4 sm:$0xff]   ;;  %v1209_v52 = vld [vmem:[%s1796_s3 + $0x2c] ss:$16 sps:$4 sm:$0xff]   ;;  %v1211_v54 = vld [vmem:[%s1796_s3 + $0x20] ss:$16 sps:$4 sm:$0xff]  }
   0xc   :  { %337 = vmatpush1.bf16.msra.mxu0 %v1187_v37  ;;  %v1212_v55 = vld [vmem:[%s1796_s3 + $0x28] ss:$16 sps:$4 sm:$0xff]   ;;  %v1213_v56 = vld [vmem:[%s1796_s3 + $0x4] ss:$16 sps:$4 sm:$0xff]   ;;  %v1215_v57 = vld [vmem:[%s1796_s3 + $0xc] ss:$16 sps:$4 sm:$0xff]  }
   0xd   :  { %398 = vmatpush1.bf16.msra.mxu1 %v1188_v38  ;;  %338 = vmatprep.subr.bf16.mxu0 %v1189_v39  ;;  %v1217_v58 = vld [vmem:[%s1796_s3] ss:$16 sps:$4 sm:$0xff]   ;;  %v1218_v59 = vld [vmem:[%s1796_s3 + $0x8] ss:$16 sps:$4 sm:$0xff]  }
   0xe   :  { %399 = vmatprep.subr.bf16.mxu1 %v1191_v40  ;;  %v1219_v37 = vld [vmem:[%s1799_s5 + $0x78] sm:$0xff]   ;;  %v1223_v40 = vld [vmem:[%s1799_s5 + $0x70] sm:$0xff]  }
   0xf   :  { %v1221_v38 = vld [vmem:[%s1799_s5 + $0x38] sm:$0xff]  }
  0x10   :  { %339 = vmatpush1.bf16.msra.mxu0 %v1193_v41  ;;  %v1222_v39 = vld [vmem:[%s1799_s5 + $0xb8] sm:$0xff]   ;;  %v1224_v41 = vld [vmem:[%s1799_s5 + $0xf0] sm:$0xff]  }
  0x11   :  { %400 = vmatpush1.bf16.msra.mxu1 %v1194_v42  ;;  %340 = vmatprep.subr.bf16.mxu0 %v1195_v43  ;;  %v1225_v42 = vld [vmem:[%s1799_s5 + $0x30] sm:$0xff]  }
  0x12   :  { %401 = vmatprep.subr.bf16.mxu1 %v1197_v44  ;;  %v1226_v43 = vld [vmem:[%s1799_s5 + $0xb0] sm:$0xff]   ;;  %v1227_v44 = vld [vmem:[%s1799_s5 + $0x68] sm:$0xff]  }
  0x14   :  { %341 = vmatpush1.bf16.msra.mxu0 %v1199_v45  ;;  %v1228_v45 = vld [vmem:[%s1799_s5 + $0xe8] sm:$0xff]  }
  0x15   :  { %402 = vmatpush1.bf16.msra.mxu1 %v1200_v46  ;;  %342 = vmatprep.subr.bf16.mxu0 %v1201_v47  ;;  %v1229_v46 = vld [vmem:[%s1799_s5 + $0x28] sm:$0xff]  }
  0x16   :  { %403 = vmatprep.subr.bf16.mxu1 %v1203_v48  ;;  %v1230_v47 = vld [vmem:[%s1799_s5 + $0xa8] sm:$0xff]   ;;  %v1231_v48 = vld [vmem:[%s1799_s5 + $0x60] sm:$0xff]  }
  0x18   :  { %343 = vmatpush1.bf16.msra.mxu0 %v1205_v49  ;;  %v1232_v49 = vld [vmem:[%s1799_s5 + $0xe0] sm:$0xff]  }
  0x19   :  { %404 = vmatpush1.bf16.msra.mxu1 %v1206_v50  ;;  %344 = vmatprep.subr.bf16.mxu0 %v1207_v51  ;;  %v1233_v50 = vld [vmem:[%s1799_s5 + $0x20] sm:$0xff]  }
  0x1a   :  { %405 = vmatprep.subr.bf16.mxu1 %v1209_v52  ;;  %v1234_v51 = vld [vmem:[%s1799_s5 + $0xa0] sm:$0xff]   ;;  %v1235_v52 = vld [vmem:[%s1799_s5 + $0x58] sm:$0xff]  }
  0x1c   :  { %345 = vmatpush1.bf16.msra.mxu0 %v1211_v54  ;;  %v1237_v54 = vld [vmem:[%s1799_s5 + $0x18] sm:$0xff]  }
  0x1d   :  { %406 = vmatpush1.bf16.msra.mxu1 %v1212_v55  ;;  %346 = vmatprep.subr.bf16.mxu0 %v1213_v56  ;;  %v1238_v55 = vld [vmem:[%s1799_s5 + $0x98] sm:$0xff]   ;;  %v1239_v56 = vld [vmem:[%s1799_s5 + $0x50] sm:$0xff]  }
  0x1e   :  { %407 = vmatprep.subr.bf16.mxu1 %v1215_v57  ;;  %v1240_v57 = vld [vmem:[%s1799_s5 + $0xd0] sm:$0xff]  }
  0x20   :  { %347 = vmatpush1.bf16.msra.mxu0 %v1217_v58  ;;  %v1241_v58 = vld [vmem:[%s1799_s5 + $0x10] sm:$0xff]  }
  0x21   :  { %408 = vmatpush1.bf16.msra.mxu1 %v1218_v59  ;;  %1102 = vmatprep.subr.bf16.mxu0 %v1219_v37  ;;  %v1242_v59 = vld [vmem:[%s1799_s5 + $0x90] sm:$0xff]  }
  0x8b   :  { %v35_v10 = vpop.xlane.xlu0 %34  ;;  %v39_v11 = vpop.xlane.xlu1 %38 }
  0x8c   :  { %v47_v12 = vmul.f32 0.0078125, %v35_v10  ;;  %v49_v13 = vmul.f32 0.0078125, %v39_v11 }
  0x8e   :  { %v1375_v14 = vsub.f32 %v27_v0, %v47_v12  ;;  %v1377_v15 = vsub.f32 %v29_v1, %v49_v13  ;;  %v1035_v13 = vld [vmem:[%s1797_s1] ss:$0 sm:$0xff] }
  0x8f   :  { %v37_v16 = vpop.xlane.xlu0 %36  ;;  %v41_v17 = vpop.xlane.xlu1 %40 }
  0x90   :  { %v48_v18 = vmul.f32 0.0078125, %v37_v16  ;;  %v57_v19 = vmul.f32 %v1375_v14, %v1375_v14  ;;  %v50_v20 = vmul.f32 0.0078125, %v41_v17  ;;  %v59_v23 = vmul.f32 %v1377_v15, %v1377_v15 }
  0x92   :  { %v1381_v21 = vsub.f32 %v28_v2, %v48_v18  ;;  %62 = vadd.xlane.f32.xlu1 %v57_v19  ;;  %v1383_v22 = vsub.f32 %v30_v3, %v50_v20  ;;  %v1036_v20 = vld [vmem:[%s1798_s2] ss:$0 sm:$0xff] }
  0x93   :  { %v45_v24 = vpop.xlane.xlu0 %44 }
  0x94   :  { %v51_v25 = vmul.f32 0.0078125, %v45_v24  ;;  %v58_v26 = vmul.f32 %v1381_v21, %v1381_v21  ;;  %v60_v28 = vmul.f32 %v1383_v22, %v1383_v22 }
  0x96   :  { %v1389_v27 = vsub.f32 %v31_v4, %v51_v25  ;;  %66 = vadd.xlane.f32.xlu1 %v59_v23  ;;  %64 = vadd.xlane.f32.xlu0 %v58_v26 }
  0x98   :  { %v61_v29 = vmul.f32 %v1389_v27, %v1389_v27 }
  0x9a   :  { %68 = vadd.xlane.f32.xlu0 %v60_v28  ;;  %v70_v30 = vsel %vm42_vm0, %v61_v29, 0.0 }
  0x9b   :  { %71 = vadd.xlane.f32.xlu1 %v70_v30 }
 0x11b   :  { %v63_v60 = vpop.xlane.xlu1 %62 }
 0x11c   :  { %v73_v61 = vmul.f32 0.0078125, %v63_v60  ;;  %v1243_v60 = vld [vmem:[%s1799_s5 + $0x48] sm:$0xff]  }
 0x11e   :  { %v78_v62 = vadd.f32 1e-06, %v73_v61  ;;  %v1244_v61 = vld [vmem:[%s1799_s5 + $0xc8] sm:$0xff]  }
 0x11f   :  { %v67_v63 = vpop.xlane.xlu1 %66  ;;  %v65_v0 = vpop.xlane.xlu0 %64 }
 0x120   :  { %1251 = vrsqrt.f32 %v78_v62  ;;  %v75_v1 = vmul.f32 0.0078125, %v67_v63  ;;  %v74_v2 = vmul.f32 0.0078125, %v65_v0  ;;  %v1245_v62 = vld [vmem:[%s1799_s5 + $0x8] sm:$0xff]   ;;  %v1247_v0 = vld [vmem:[%s1799_s5 + $0x40] sm:$0xff]  }
 0x121   :  { %v1246_v63 = vld [vmem:[%s1799_s5 + $0x88] sm:$0xff]  }
 0x122   :  { %v79_v3 = vadd.f32 1e-06, %v74_v2  ;;  %v80_v4 = vadd.f32 1e-06, %v75_v1  ;;  %v1248_v1 = vld [vmem:[%s1799_s5 + $0xc0] sm:$0xff]  }
 0x123   :  { %v69_v5 = vpop.xlane.xlu0 %68  ;;  %v1249_v2 = vld [vmem:[%s1799_s5] sm:$0xff]  }
 0x124   :  { %v76_v6 = vmul.f32 0.0078125, %v69_v5  ;;  %v72_v7 = vpop.xlane.xlu1 %71  ;;  %1253 = vrsqrt.f32 %v79_v3  ;;  %v1250_v3 = vld [vmem:[%s1799_s5 + $0x80] sm:$0xff]  }
 0x125   :  { %v77_v8 = vmul.f32 0.0078125, %v72_v7  ;;  %1255 = vrsqrt.f32 %v80_v4  ;;  %v152_v4 = vlaneseq }
 0x126   :  { %v81_v9 = vadd.f32 1e-06, %v76_v6 }
 0x127   :  { %v82_v10 = vadd.f32 1e-06, %v77_v8  ;;  %v153_v5 = vshrl.u32 %v152_v4, 7  ;;  %v150_v8 = vld [vmem:[%s1800_s4] sm:$0xf] }
 0x128   :  { %1257 = vrsqrt.f32 %v81_v9 }
 0x129   :  { %1259 = vrsqrt.f32 %v82_v10  ;;  %v154_v6 = vsub.s32 0, %v153_v5  ;;  %v162_v7 = vsub.s32 2, %v153_v5 }
 0x12b   :  { %v1596_v9 = vrot.slane %v150_v8, %v154_v6  ;;  %v1598_v10 = vrot.slane %v150_v8, %v162_v7 }
 0x12d   :  { %v1252_v11 = vpop.eup %1251 }
 0x12e   :  { %v88_v12 = vmul.f32 %v1252_v11, %v1375_v14 }
 0x130   :  { %v99_v18 = vmul.f32 %v1035_v13, %v88_v12 }
 0x131   :  { %v1254_v16 = vpop.eup %1253 }
 0x132   :  { %v89_v17 = vmul.f32 %v1254_v16, %v1381_v21  ;;  %v1256_v19 = vpop.eup %1255  ;;  %v110_v26 = vadd.f32 %v1036_v20, %v99_v18  ;;  %v166_v18 = vsub.s32 3, %v153_v5 }
 0x133   :  { %v90_v14 = vmul.f32 %v1256_v19, %v1377_v15 }
 0x134   :  { %v100_v24 = vmul.f32 %v1035_v13, %v89_v17 }
 0x135   :  { %v1258_v23 = vpop.eup %1257  ;;  %v101_v21 = vmul.f32 %v1035_v13, %v90_v14 }
 0x136   :  { %v91_v25 = vmul.f32 %v1258_v23, %v1383_v22  ;;  %v111_v28 = vadd.f32 %v1036_v20, %v100_v24  ;;  %v1260_v31 = vpop.eup %1259 }
 0x137   :  { %v92_v33 = vmul.f32 %v1260_v31, %v1389_v27  ;;  %v112_v34 = vadd.f32 %v1036_v20, %v101_v21  ;;  %v1220_v27 = vld [vmem:[%s1799_s5 + $0xf8] sm:$0xff]  }
 0x138   :  { %v115_v29 = vpack.c.bf16 %v111_v28, %v110_v26  ;;  %v102_v30 = vmul.f32 %v1035_v13, %v91_v25  ;;  %1136 = vmatprep.subr.bf16.mxu1 %v1220_v27 }
 0x139   :  { %v103_v22 = vmul.f32 %v1035_v13, %v92_v33  ;;  %v158_v13 = vsub.s32 1, %v153_v5 }
 0x13a   :  { %365 = vmatmul.mubr.bf16.vlgmr.msra.gmra.mxu0 %v115_v29  ;;  %426 = vmatmul.mubr.bf16.vlgmr.msra.gmra.mxu1 %v115_v29  ;;  %v113_v32 = vadd.f32 %v1036_v20, %v102_v30  ;;  %v1604_v29 = vrot.slane %v150_v8, %v166_v18 }
 0x13b   :  { %374 = vmatprep.mubr.bf16.mxu0 %v1306_v53  ;;  %435 = vmatprep.mubr.bf16.mxu1 %v1306_v53  ;;  %v114_v15 = vadd.f32 %v1036_v20, %v103_v22  ;;  %v1602_v25 = vrot.slane %v150_v8, %v158_v13 }
 0x13c   :  { %v116_v35 = vpack.c.bf16 %v113_v32, %v112_v34  ;;  %1103 = vmatpush3.bf16.msra.mxu0 %v1221_v38  ;;  %1137 = vmatpush3.bf16.msra.mxu1 %v1222_v39 }
 0x13d   :  { %v117_v36 = vpack.c.bf16 %v114_v15, %v114_v15  ;;  %1104 = vmatprep.subr.bf16.mxu0 %v1223_v40  ;;  %1138 = vmatprep.subr.bf16.mxu1 %v1224_v41 }
 0x140   :  { %1105 = vmatpush3.bf16.msra.mxu0 %v1225_v42  ;;  %1139 = vmatpush3.bf16.msra.mxu1 %v1226_v43 }
 0x141   :  { %1106 = vmatprep.subr.bf16.mxu0 %v1227_v44  ;;  %1140 = vmatprep.subr.bf16.mxu1 %v1228_v45 }
 0x142   :  { %375 = vmatmul.mubr.bf16.gmra.mxu0 %v116_v35  ;;  %436 = vmatmul.mubr.bf16.gmra.mxu1 %v116_v35 }
 0x143   :  { %384 = vmatprep.mubr.bf16.mxu0 %v1306_v53  ;;  %445 = vmatprep.mubr.bf16.mxu1 %v1306_v53  ;;  %v1236_v53 = vld [vmem:[%s1799_s5 + $0xd8] sm:$0xff]  }
 0x144   :  { %1107 = vmatpush3.bf16.msra.mxu0 %v1229_v46  ;;  %1141 = vmatpush3.bf16.msra.mxu1 %v1230_v47 }
 0x145   :  { %1108 = vmatprep.subr.bf16.mxu0 %v1231_v48  ;;  %1142 = vmatprep.subr.bf16.mxu1 %v1232_v49 }
 0x148   :  { %1109 = vmatpush3.bf16.msra.mxu0 %v1233_v50  ;;  %1143 = vmatpush3.bf16.msra.mxu1 %v1234_v51 }
 0x149   :  { %1110 = vmatprep.subr.bf16.mxu0 %v1235_v52  ;;  %1144 = vmatprep.subr.bf16.mxu1 %v1236_v53 }
 0x14a   :  { %385 = vmatmul.mubr.bf16.gmra.mxu0 %v117_v36  ;;  %446 = vmatmul.mubr.bf16.gmra.mxu1 %v117_v36 }
 0x14c   :  { %1111 = vmatpush3.bf16.msra.mxu0 %v1237_v54  ;;  %1145 = vmatpush3.bf16.msra.mxu1 %v1238_v55 }
 0x14d   :  { %1112 = vmatprep.subr.bf16.mxu0 %v1239_v56  ;;  %1146 = vmatprep.subr.bf16.mxu1 %v1240_v57 }
 0x150   :  { %1113 = vmatpush3.bf16.msra.mxu0 %v1241_v58  ;;  %1147 = vmatpush3.bf16.msra.mxu1 %v1242_v59 }
 0x151   :  { %1114 = vmatprep.subr.bf16.mxu0 %v1243_v60  ;;  %1148 = vmatprep.subr.bf16.mxu1 %v1244_v61 }
 0x154   :  { %1115 = vmatpush3.bf16.msra.mxu0 %v1245_v62  ;;  %1149 = vmatpush3.bf16.msra.mxu1 %v1246_v63 }
 0x155   :  { %1116 = vmatprep.subr.bf16.mxu0 %v1247_v0  ;;  %1150 = vmatprep.subr.bf16.mxu1 %v1248_v1 }
 0x158   :  { %1117 = vmatpush3.bf16.msra.mxu0 %v1249_v2  ;;  %1151 = vmatpush3.bf16.msra.mxu1 %v1250_v3 }
 0x1fa   :  { %v366_v11 = vpop.f32.mrf.mxu0  ;;  %v427_v12 = vpop.f32.mrf.mxu1 }
 0x1fb   :  { %v367_v16 = vadd.f32 %v366_v11, %v1596_v9  ;;  %v428_v17 = vadd.f32 %v427_v12, %v1598_v10 }
 0x1fc   :  { %v368_v19 = vpop.f32.mrf.mxu0  ;;  %v429_v20 = vpop.f32.mrf.mxu1 }
 0x1fd   :  { %v474_v23 = vmul.f32 0.044715, %v367_v16  ;;  %v476_v24 = vmul.f32 0.044715, %v428_v17  ;;  %v1615_v37 = vadd.f32 %v368_v19, %v1602_v25  ;;  %v1618_v27 = vadd.f32 %v429_v20, %v1604_v29 }
 0x1fe   :  { %v370_v26 = vpop.f32.mrf.mxu0  ;;  %v431_v28 = vpop.f32.mrf.mxu1  ;;  %v1645_v63 = vmul.f32 0.5, %v367_v16  ;;  %v1647_v0 = vmul.f32 0.5, %v428_v17 }
 0x1ff   :  { %v494_v14 = vmul.f32 %v474_v23, %v367_v16  ;;  %v1607_v30 = vadd.f32 %v370_v26, %v1596_v9  ;;  %v1610_v31 = vadd.f32 %v431_v28, %v1598_v10  ;;  %v496_v21 = vmul.f32 %v476_v24, %v428_v17 }
 0x200   :  { %v372_v32 = vpop.f32.mrf.mxu0  ;;  %v433_v33 = vpop.f32.mrf.mxu1  ;;  %v475_v52 = vmul.f32 0.044715, %v1615_v37  ;;  %v477_v56 = vmul.f32 0.044715, %v1618_v27  ;;  %v1657_v8 = vmul.f32 0.5, %v1615_v37 }
 0x201   :  { %v514_v34 = vmul.f32 %v494_v14, %v367_v16  ;;  %v478_v35 = vmul.f32 0.044715, %v1607_v30  ;;  %v480_v22 = vmul.f32 0.044715, %v1610_v31  ;;  %v516_v40 = vmul.f32 %v496_v21, %v428_v17 }
 0x202   :  { %v376_v15 = vpop.f32.mrf.mxu0  ;;  %v437_v36 = vpop.f32.mrf.mxu1  ;;  %v1623_v42 = vadd.f32 %v372_v32, %v1602_v25  ;;  %v1627_v46 = vadd.f32 %v433_v33, %v1604_v29  ;;  %v495_v5 = vmul.f32 %v475_v52, %v1615_v37  ;;  %v497_v12 = vmul.f32 %v477_v56, %v1618_v27 }
 0x203   :  { %v498_v38 = vmul.f32 %v478_v35, %v1607_v30  ;;  %v534_v39 = vadd.f32 %v514_v34, %v367_v16  ;;  %v500_v41 = vmul.f32 %v480_v22, %v1610_v31  ;;  %v1631_v48 = vadd.f32 %v376_v15, %v1596_v9 }
 0x204   :  { %v378_v43 = vpop.f32.mrf.mxu0  ;;  %v439_v44 = vpop.f32.mrf.mxu1  ;;  %v1634_v49 = vadd.f32 %v437_v36, %v1598_v10  ;;  %v536_v55 = vadd.f32 %v516_v40, %v428_v17  ;;  %v479_v57 = vmul.f32 0.044715, %v1623_v42  ;;  %v481_v62 = vmul.f32 0.044715, %v1627_v46 }
 0x205   :  { %v518_v45 = vmul.f32 %v498_v38, %v1607_v30  ;;  %v520_v47 = vmul.f32 %v500_v41, %v1610_v31  ;;  %v1638_v53 = vadd.f32 %v378_v43, %v1602_v25  ;;  %v554_v54 = vmul.f32 0.7978846, %v534_v39 }
 0x206   :  { %v380_v50 = vpop.f32.mrf.mxu0  ;;  %v441_v51 = vpop.f32.mrf.mxu1  ;;  %v482_v1 = vmul.f32 0.044715, %v1631_v48  ;;  %v484_v2 = vmul.f32 0.044715, %v1634_v49  ;;  %v1654_v7 = vadd.f32 %v439_v44, %v1604_v29  ;;  %v556_v11 = vmul.f32 0.7978846, %v536_v55 }
 0x207   :  { %v538_v60 = vadd.f32 %v518_v45, %v1607_v30  ;;  %v540_v61 = vadd.f32 %v520_v47, %v1610_v31  ;;  %v483_v6 = vmul.f32 0.044715, %v1638_v53  ;;  %1261 = vtanh.f32 %v554_v54 }
 0x208   :  { %v382_v58 = vpop.f32.mrf.mxu0  ;;  %v443_v59 = vpop.f32.mrf.mxu1  ;;  %v499_v13 = vmul.f32 %v479_v57, %v1623_v42  ;;  %v501_v20 = vmul.f32 %v481_v62, %v1627_v46  ;;  %v502_v24 = vmul.f32 %v482_v1, %v1631_v48  ;;  %v504_v26 = vmul.f32 %v484_v2, %v1634_v49 }
 0x209   :  { %v558_v18 = vmul.f32 0.7978846, %v538_v60  ;;  %v560_v19 = vmul.f32 0.7978846, %v540_v61  ;;  %v1663_v23 = vadd.f32 %v382_v58, %v1602_v25  ;;  %v1668_v28 = vadd.f32 %v380_v50, %v1596_v9 }
 0x20a   :  { %v386_v3 = vpop.f32.mrf.mxu0  ;;  %v447_v4 = vpop.f32.mrf.mxu1  ;;  %v1671_v14 = vadd.f32 %v443_v59, %v1604_v29  ;;  %v503_v33 = vmul.f32 %v483_v6, %v1638_v53  ;;  %v485_v34 = vmul.f32 0.044715, %v1654_v7  ;;  %v1676_v35 = vadd.f32 %v441_v51, %v1598_v10 }
 0x20b   :  { %v487_v22 = vmul.f32 0.044715, %v1663_v23  ;;  %1263 = vtanh.f32 %v556_v11  ;;  %v515_v15 = vmul.f32 %v495_v5, %v1615_v37  ;;  %v519_v36 = vmul.f32 %v499_v13, %v1623_v42 }
 0x20c   :  { %v388_v16 = vpop.f32.mrf.mxu0  ;;  %v449_v17 = vpop.f32.mrf.mxu1  ;;  %v489_v38 = vmul.f32 0.044715, %v1671_v14  ;;  %v517_v41 = vmul.f32 %v497_v12, %v1618_v27  ;;  %1265 = vtanh.f32 %v558_v18  ;;  %v521_v43 = vmul.f32 %v501_v20, %v1627_v46 }
 0x20d   :  { %v507_v44 = vmul.f32 %v487_v22, %v1663_v23  ;;  %1267 = vtanh.f32 %v560_v19  ;;  %v522_v45 = vmul.f32 %v502_v24, %v1631_v48  ;;  %v486_v47 = vmul.f32 0.044715, %v1668_v28 }
 0x20e   :  { %v390_v21 = vpop.f32.mrf.mxu0  ;;  %v451_v32 = vpop.f32.mrf.mxu1  ;;  %v1688_v50 = vmul.f32 0.5, %v1618_v27  ;;  %v524_v51 = vmul.f32 %v504_v26, %v1634_v49  ;;  %v523_v52 = vmul.f32 %v503_v33, %v1638_v53  ;;  %v505_v54 = vmul.f32 %v485_v34, %v1654_v7 }
 0x20f   :  { %v488_v55 = vmul.f32 0.044715, %v1676_v35  ;;  %v509_v56 = vmul.f32 %v489_v38, %v1671_v14  ;;  %v1696_v57 = vadd.f32 %v386_v3, %v1596_v9  ;;  %v535_v58 = vadd.f32 %v515_v15, %v1615_v37 }
 0x210   :  { %v391_v39 = vpop.f32.mrf.mxu0  ;;  %v452_v40 = vpop.f32.mrf.mxu1  ;;  %v539_v59 = vadd.f32 %v519_v36, %v1623_v42  ;;  %v527_v60 = vmul.f32 %v507_v44, %v1663_v23  ;;  %v1702_v61 = vadd.f32 %v388_v16, %v1602_v25  ;;  %v537_v62 = vadd.f32 %v517_v41, %v1618_v27 }
 0x211   :  { %v541_v1 = vadd.f32 %v521_v43, %v1627_v46  ;;  %v506_v2 = vmul.f32 %v486_v47, %v1668_v28  ;;  %v1708_v5 = vadd.f32 %v449_v17, %v1604_v29  ;;  %v555_v9 = vmul.f32 0.7978846, %v535_v58 }
 0x212   :  { %v559_v3 = vmul.f32 0.7978846, %v539_v59  ;;  %v525_v37 = vmul.f32 %v505_v54, %v1654_v7  ;;  %v1712_v6 = vadd.f32 %v447_v4, %v1598_v10  ;;  %v557_v11 = vmul.f32 0.7978846, %v537_v62 }
 0x213   :  { %v561_v12 = vmul.f32 0.7978846, %v541_v1  ;;  %v508_v25 = vmul.f32 %v488_v55, %v1676_v35  ;;  %v529_v27 = vmul.f32 %v509_v56, %v1671_v14  ;;  %1269 = vtanh.f32 %v555_v9 }
 0x214   :  { %v543_v13 = vadd.f32 %v523_v52, %v1638_v53  ;;  %v1262_v16 = vpop.eup %1261  ;;  %v490_v29 = vmul.f32 0.044715, %v1696_v57  ;;  %v491_v17 = vmul.f32 0.044715, %v1702_v61  ;;  %1271 = vtanh.f32 %v559_v3 }
 0x215   :  { %v547_v18 = vadd.f32 %v527_v60, %v1663_v23  ;;  %v526_v10 = vmul.f32 %v506_v2, %v1668_v28  ;;  %v493_v4 = vmul.f32 0.044715, %v1708_v5  ;;  %1273 = vtanh.f32 %v557_v11 }
 0x216   :  { %v563_v19 = vmul.f32 0.7978846, %v543_v13  ;;  %v492_v20 = vmul.f32 0.044715, %v1712_v6  ;;  %1275 = vtanh.f32 %v561_v12  ;;  %v545_v26 = vadd.f32 %v525_v37, %v1654_v7 }
 0x217   :  { %v567_v24 = vmul.f32 0.7978846, %v547_v18  ;;  %v458_v21 = vmul.f32 0.5, %v1607_v30  ;;  %v528_v32 = vmul.f32 %v508_v25, %v1676_v35  ;;  %v549_v33 = vadd.f32 %v529_v27, %v1671_v14 }
 0x218   :  { %1277 = vtanh.f32 %v563_v19  ;;  %v1264_v34 = vpop.eup %1263  ;;  %v460_v22 = vmul.f32 0.5, %v1610_v31  ;;  %v511_v15 = vmul.f32 %v491_v17, %v1702_v61  ;;  %v565_v36 = vmul.f32 0.7978846, %v545_v26 }
 0x219   :  { %1279 = vtanh.f32 %v567_v24  ;;  %v1266_v38 = vpop.eup %1265  ;;  %v513_v39 = vmul.f32 %v493_v4, %v1708_v5  ;;  %v569_v40 = vmul.f32 0.7978846, %v549_v33  ;;  %v542_v41 = vadd.f32 %v522_v45, %v1631_v48 }
 0x21a   :  { %v546_v30 = vadd.f32 %v526_v10, %v1668_v28  ;;  %v1268_v43 = vpop.eup %1267  ;;  %v510_v44 = vmul.f32 %v490_v29, %v1696_v57  ;;  %v512_v47 = vmul.f32 %v492_v20, %v1712_v6  ;;  %1281 = vtanh.f32 %v565_v36 }
 0x21b   :  { %v544_v31 = vadd.f32 %v524_v51, %v1634_v49  ;;  %1283 = vtanh.f32 %v569_v40  ;;  %v562_v52 = vmul.f32 0.7978846, %v542_v41  ;;  %v548_v55 = vadd.f32 %v528_v32, %v1676_v35 }
 0x21c   :  { %v566_v54 = vmul.f32 0.7978846, %v546_v30  ;;  %v459_v56 = vmul.f32 0.5, %v1623_v42  ;;  %v594_v58 = vadd.f32 1.0, %v1262_v16  ;;  %v531_v45 = vmul.f32 %v511_v15, %v1702_v61 }
 0x21d   :  { %v564_v59 = vmul.f32 0.7978846, %v544_v31  ;;  %v461_v60 = vmul.f32 0.5, %v1627_v46  ;;  %1285 = vtanh.f32 %v562_v52  ;;  %v568_v62 = vmul.f32 0.7978846, %v548_v55 }
 0x21e   :  { %v533_v1 = vmul.f32 %v513_v39, %v1708_v5  ;;  %v596_v2 = vadd.f32 1.0, %v1264_v34  ;;  %1287 = vtanh.f32 %v566_v54  ;;  %v551_v51 = vadd.f32 %v531_v45, %v1702_v61 }
 0x21f   :  { %v530_v9 = vmul.f32 %v510_v44, %v1696_v57  ;;  %v598_v3 = vadd.f32 1.0, %v1266_v38  ;;  %1289 = vtanh.f32 %v564_v59  ;;  %v532_v37 = vmul.f32 %v512_v47, %v1712_v6 }
 0x220   :  { %v553_v42 = vadd.f32 %v533_v1, %v1708_v5  ;;  %v1270_v11 = vpop.eup %1269  ;;  %v614_v12 = vmul.f32 %v594_v58, %v1645_v63  ;;  %1291 = vtanh.f32 %v568_v62  ;;  %v571_v46 = vmul.f32 0.7978846, %v551_v51 }
 0x221   :  { %v550_v25 = vadd.f32 %v530_v9, %v1696_v57  ;;  %v1272_v27 = vpop.eup %1271  ;;  %v595_v13 = vadd.f32 1.0, %v1270_v11  ;;  %v600_v16 = vadd.f32 1.0, %v1268_v43  ;;  %v552_v17 = vadd.f32 %v532_v37, %v1712_v6 }
 0x222   :  { %v573_v29 = vmul.f32 0.7978846, %v553_v42  ;;  %v1274_v18 = vpop.eup %1273  ;;  %v599_v10 = vadd.f32 1.0, %v1272_v27  ;;  %v463_v4 = vmul.f32 0.5, %v1638_v53  ;;  %1293 = vtanh.f32 %v571_v46 }
 0x223   :  { %v570_v19 = vmul.f32 0.7978846, %v550_v25  ;;  %v1276_v20 = vpop.eup %1275  ;;  %v597_v24 = vadd.f32 1.0, %v1274_v18  ;;  %v618_v26 = vmul.f32 %v598_v3, %v458_v21  ;;  %v572_v63 = vmul.f32 0.7978846, %v552_v17 }
 0x224   :  { %1295 = vtanh.f32 %v573_v29  ;;  %v615_v33 = vmul.f32 %v595_v13, %v1657_v8  ;;  %v619_v34 = vmul.f32 %v599_v10, %v459_v56  ;;  %v601_v15 = vadd.f32 1.0, %v1276_v20 }
 0x225   :  { %v1278_v32 = vpop.eup %1277  ;;  %1297 = vtanh.f32 %v570_v19  ;;  %v620_v38 = vmul.f32 %v600_v16, %v460_v22  ;;  %v467_v39 = vmul.f32 0.5, %v1663_v23  ;;  %v617_v41 = vmul.f32 %v597_v24, %v1688_v50 }
 0x226   :  { %v1280_v36 = vpop.eup %1279  ;;  %v603_v40 = vadd.f32 1.0, %v1278_v32  ;;  %1299 = vtanh.f32 %v572_v63  ;;  %v635_v53 = vpack.c.bf16 %v619_v34, %v615_v33  ;;  %v621_v30 = vmul.f32 %v601_v15, %v461_v60 }
 0x227   :  { %v607_v43 = vadd.f32 1.0, %v1280_v36  ;;  %v1282_v21 = vpop.eup %1281  ;;  %v634_v44 = vpack.c.bf16 %v618_v26, %v614_v12  ;;  %v616_v47 = vmul.f32 %v596_v2, %v1647_v0  ;;  %v465_v23 = vmul.f32 0.5, %v1654_v7 }
 0x228   :  { %v1284_v31 = vpop.eup %1283  ;;  %941 = vmatprep.mubr.bf16.mxu0 %v635_v53  ;;  %v637_v8 = vpack.c.bf16 %v621_v30, %v617_v41  ;;  %v623_v52 = vmul.f32 %v603_v40, %v463_v4  ;;  %v605_v55 = vadd.f32 1.0, %v1282_v21  ;;  %v469_v56 = vmul.f32 0.5, %v1671_v14 }
 0x229   :  { %v627_v54 = vmul.f32 %v607_v43, %v467_v39  ;;  %942 = vmatmul.mubr.bf16.vlgmr.msra.gmra.mxu0 %v634_v44  ;;  %v636_v22 = vpack.c.bf16 %v620_v38, %v616_v47  ;;  %v609_v58 = vadd.f32 1.0, %v1284_v31  ;;  %v462_v2 = vmul.f32 0.5, %v1631_v48 }
 0x22a   :  { %v1286_v50 = vpop.eup %1285  ;;  %997 = vmatprep.mubr.bf16.mxu1 %v637_v8  ;;  %v625_v60 = vmul.f32 %v605_v55, %v465_v23  ;;  %v466_v51 = vmul.f32 0.5, %v1668_v28  ;;  %v464_v14 = vmul.f32 0.5, %v1634_v49  ;;  %v468_v12 = vmul.f32 0.5, %v1676_v35  ;;  %v1301_v8 = vld [vmem:[%s1795_s0] sm:$0xff] }
 0x22b   :  { %v639_v59 = vpack.c.bf16 %v627_v54, %v623_v52  ;;  %v1288_v45 = vpop.eup %1287  ;;  %998 = vmatmul.mubr.bf16.vlgmr.msra.gmra.mxu1 %v636_v22  ;;  %v629_v0 = vmul.f32 %v609_v58, %v469_v56  ;;  %v602_v62 = vadd.f32 1.0, %v1286_v50  ;;  %v471_v27 = vmul.f32 0.5, %v1702_v61 }
 0x22c   :  { %v1290_v1 = vpop.eup %1289  ;;  %v606_v9 = vadd.f32 1.0, %v1288_v45  ;;  %v473_v18 = vmul.f32 0.5, %v1708_v5  ;;  %v470_v35 = vmul.f32 0.5, %v1696_v57  ;;  %v472_v32 = vmul.f32 0.5, %v1712_v6  ;;  %v1069_v57 = vld [vmem:[%s1801_s6] ss:$0 sm:$0xff] }
 0x22d   :  { %949 = vmatprep.mubr.bf16.mxu0 %v639_v59  ;;  %v1292_v3 = vpop.eup %1291  ;;  %v641_v7 = vpack.c.bf16 %v629_v0, %v625_v60  ;;  %v604_v42 = vadd.f32 1.0, %v1290_v1  ;;  %v622_v37 = vmul.f32 %v602_v62, %v462_v2  ;;  %v1302_v59 = vld [vmem:[%s1795_s0 + $0x8] sm:$0xff] }
 0x22e   :  { %v626_v11 = vmul.f32 %v606_v9, %v466_v51  ;;  %v608_v46 = vadd.f32 1.0, %v1292_v3 }
 0x22f   :  { %v1294_v25 = vpop.eup %1293  ;;  %1005 = vmatprep.mubr.bf16.mxu1 %v641_v7  ;;  %v624_v48 = vmul.f32 %v604_v42, %v464_v14  ;;  %v1303_v42 = vld [vmem:[%s1795_s0 + $0x10] sm:$0xff] }
 0x230   :  { %v638_v16 = vpack.c.bf16 %v626_v11, %v622_v37  ;;  %v628_v29 = vmul.f32 %v608_v46, %v468_v12  ;;  %v611_v28 = vadd.f32 1.0, %v1294_v25 }
 0x231   :  { %v1296_v13 = vpop.eup %1295 }
 0x232   :  { %v1298_v17 = vpop.eup %1297  ;;  %v613_v10 = vadd.f32 1.0, %v1296_v13  ;;  %950 = vmatmul.mubr.bf16.gmra.mxu0 %v638_v16  ;;  %v640_v4 = vpack.c.bf16 %v628_v29, %v624_v48  ;;  %v631_v19 = vmul.f32 %v611_v28, %v471_v27  ;;  %v1304_v29 = vld [vmem:[%s1795_s0 + $0x18] sm:$0xff] }
 0x233   :  { %v1300_v49 = vpop.eup %1299  ;;  %v610_v20 = vadd.f32 1.0, %v1298_v17 }
 0x234   :  { %v633_v24 = vmul.f32 %v613_v10, %v473_v18  ;;  %v612_v26 = vadd.f32 1.0, %v1300_v49  ;;  %1006 = vmatmul.mubr.bf16.gmra.mxu1 %v640_v4  ;;  %v643_v61 = vpack.c.bf16 %v631_v19, %v631_v19 }
 0x235   :  { %v630_v63 = vmul.f32 %v610_v20, %v470_v35  ;;  %v1305_v35 = vld [vmem:[%s1795_s0 + $0x20] sm:$0x3] }
 0x236   :  { %v645_v33 = vpack.c.bf16 %v633_v24, %v633_v24  ;;  %957 = vmatprep.mubr.bf16.mxu0 %v643_v61  ;;  %v632_v34 = vmul.f32 %v612_v26, %v472_v32 }
 0x237   :  { %v642_v5 = vpack.c.bf16 %v630_v63, %v630_v63 }
 0x238   :  { %1013 = vmatprep.mubr.bf16.mxu1 %v645_v33  ;;  %v644_v15 = vpack.c.bf16 %v632_v34, %v632_v34 }
 0x23a   :  { %958 = vmatmul.mubr.bf16.gmra.mxu0 %v642_v5 }
 0x23c   :  { %1014 = vmatmul.mubr.bf16.gmra.mxu1 %v644_v15 }
 0x2e9   :  { %v1118_v36 = vpop.f32.mrf.mxu0 }
 0x2eb   :  { %v1152_v38 = vpop.f32.mrf.mxu1  ;;  %v1119_v39 = vpop.f32.mrf.mxu0 }
 0x2ec   :  { %v1120_v40 = vadd.f32 %v1119_v39, %v1118_v36 }
 0x2ed   :  { %v1153_v53 = vpop.f32.mrf.mxu1  ;;  %v1121_v41 = vpop.f32.mrf.mxu0 }
 0x2ee   :  { %v944_v30 = vadd.f32 %v1120_v40, %v1069_v57  ;;  %v1154_v6 = vadd.f32 %v1153_v53, %v1152_v38 }
 0x2ef   :  { %v1155_v43 = vpop.f32.mrf.mxu1  ;;  %v1122_v21 = vpop.f32.mrf.mxu0 }
 0x2f0   :  { %v1000_v44 = vadd.f32 %v1154_v6, %v944_v30  ;;  %v1123_v47 = vadd.f32 %v1122_v21, %v1121_v41 }
 0x2f1   :  { %v1156_v31 = vpop.f32.mrf.mxu1 }
 0x2f2   :  { %v1021_v52 = vadd.f32 %v1301_v8, %v1000_v44  ;;  %v947_v54 = vadd.f32 %v1123_v47, %v1069_v57  ;;  %v1157_v55 = vadd.f32 %v1156_v31, %v1155_v43  ;;  %v1124_v22 = vpop.f32.mrf.mxu0 }
 0x2f4   :  { %1026 = vst [vmem:[%s1802_s7] sm:$0xff] %v1021_v52  ;;  %v1003_v23 = vadd.f32 %v1157_v55, %v947_v54  ;;  %v1158_v56 = vpop.f32.mrf.mxu1  ;;  %v1125_v58 = vpop.f32.mrf.mxu0 }
 0x2f5   :  { %v1126_v50 = vadd.f32 %v1125_v58, %v1124_v22 }
 0x2f6   :  { %v1022_v45 = vadd.f32 %v1302_v59, %v1003_v23  ;;  %v1159_v60 = vpop.f32.mrf.mxu1  ;;  %v1127_v0 = vpop.f32.mrf.mxu0 }
 0x2f7   :  { %v952_v62 = vadd.f32 %v1126_v50, %v1069_v57  ;;  %v1160_v1 = vadd.f32 %v1159_v60, %v1158_v56 }
 0x2f8   :  { %1027 = vst [vmem:[%s1802_s7 + $0x8] sm:$0xff] %v1022_v45  ;;  %v1161_v2 = vpop.f32.mrf.mxu1  ;;  %v1128_v51 = vpop.f32.mrf.mxu0 }
 0x2f9   :  { %v1008_v9 = vadd.f32 %v1160_v1, %v952_v62  ;;  %v1129_v3 = vadd.f32 %v1128_v51, %v1127_v0 }
 0x2fa   :  { %v1162_v7 = vpop.f32.mrf.mxu1  ;;  %v1130_v14 = vpop.f32.mrf.mxu0 }
 0x2fb   :  { %v1023_v37 = vadd.f32 %v1303_v42, %v1008_v9  ;;  %v955_v11 = vadd.f32 %v1129_v3, %v1069_v57  ;;  %v1163_v12 = vadd.f32 %v1162_v7, %v1161_v2 }
 0x2fc   :  { %v1164_v46 = vpop.f32.mrf.mxu1  ;;  %v1131_v25 = vpop.f32.mrf.mxu0 }
 0x2fd   :  { %1028 = vst [vmem:[%s1802_s7 + $0x10] sm:$0xff] %v1023_v37  ;;  %v1011_v27 = vadd.f32 %v1163_v12, %v955_v11  ;;  %v1132_v13 = vadd.f32 %v1131_v25, %v1130_v14 }
 0x2fe   :  { %v1165_v16 = vpop.f32.mrf.mxu1  ;;  %v1133_v48 = vpop.f32.mrf.mxu0 }
 0x2ff   :  { %v1024_v28 = vadd.f32 %v1304_v29, %v1011_v27  ;;  %v960_v17 = vadd.f32 %v1132_v13, %v1069_v57  ;;  %v1166_v18 = vadd.f32 %v1165_v16, %v1164_v46 }
 0x300   :  { %v1167_v10 = vpop.f32.mrf.mxu1  ;;  %v1134_v49 = vpop.f32.mrf.mxu0 }
 0x301   :  { %1029 = vst [vmem:[%s1802_s7 + $0x18] sm:$0xff] %v1024_v28  ;;  %v1016_v4 = vadd.f32 %v1166_v18, %v960_v17 }
 0x302   :  { %v1168_v19 = vpop.f32.mrf.mxu1 }
 0x303   :  { %v1025_v20 = vadd.f32 %v1305_v35, %v1016_v4 }
 0x305   :  { %1030 = vst [vmem:[%s1802_s7 + $0x20] sm:$0x3] %v1025_v20 }

// kernel: vit_forward.10
= control target key start
LH: loop header
LB: loop body
LE: loop exit
PB: predicated region body
PF: predicated region fallthrough
CT: control target
= control target key end

     0   :  { %s1431_s15 = smov 0   ;;  %s1674_s0 = inlined_call_operand.vmem [shape: f32[2,17,384], index: 0, kind: input, shape index: {}]   ;;  %s1675_s1 = inlined_call_operand.vmem [shape: f32[2,17,128], index: 1, kind: input, shape index: {}]   ;;  %s1676_s2 = inlined_call_operand.vmem [shape: bf16[128,128], index: 2, kind: input, shape index: {}]   ;;  %s1677_s3 = inlined_call_operand.vmem [shape: f32[1,128], index: 3, kind: input, shape index: {}]   ;;  %s1678_s4 = inlined_call_operand.vmem [shape: f32[2,17,128], index: 4, kind: output, shape index: {}]  }
   0x1 LB: > { %s1140_s16 = sadd.s32 4294967295, %s1400_s15   ;;  %p1144_p0 = scmp.ge.s32.totalorder %s1400_s15, 1  ;;  %s1400_s15 = sphi %s1431_s15, %s14_s15  }
   0x2   : > { %p172_p1 = scmp.lt.s32.totalorder %s1400_s15, 3 }
   0x4   : > { %p173_p2 = pnand %p1144_p0, %p172_p1 }
   0x5   : > { %p203_p3 = scmp.lt.s32.totalorder (!%p173_p2), %s1140_s16, 1  ;;  %s1402_s21 = smov (!%p173_p2), 96  }
   0x6   : > { %176 = sbr.rel (%p173_p2) target bundleno = 2046 (0x7fe), region = 36  ;;  %s1404_s22 = smov (!%p173_p2), 64  }
   0x7   : > { %s1405_s23 = smov (!%p173_p2), 32  }
   0xb   : > { %s1680_s16 = smov (!%p203_p3, %s1140_s16), 1  ;;  %vm235_vm0 = vcmask 261120   ;;  %vm303_vm1 = vcmask 131072   ;;  %vm296_vm2 = vcmask 138240   ;;  %vm338_vm3 = vcmask 1040384  }
   0xc   : > { %s1309_s17 = smul.u32 72, %s1680_s16  ;;  %v1403_v26 = vmov 0   ;;  %vm935_vm4 = vcmask 523264   ;;  %vm939_vm5 = vcmask 785408  }
   0xd   : > { %v1485_v27 = vsel %vm338_vm3, 65535, %v1403_v26  ;;  %s1310_s14 = smul.u32 24, %s1680_s16 }
   0xe   : > { %s1445_s20 = scalar_lea.vmem %s1674_s0, %s1309_s17 }
   0xf   : > { %v227_v0 = vld [vmem:[%s1445_s20 + $0x38] sm:$0x1]  ;;  %v225_v1 = vld [vmem:[%s1445_s20 + $0x8] sm:$0xff]  ;;  %v226_v2 = vld [vmem:[%s1445_s20 + $0x20] sm:$0xff]  ;;  %s212_s19 = scalar_lea.vmem %s1675_s1, %s1310_s14  ;;  %s217_s24 = scalar_lea.vmem %s1678_s4, %s1310_s14 }
  0x10   : > { %v1450_v3 = vpack.c.bf16 %v227_v0, %v227_v0  ;;  %v1452_v4 = vpack.c.bf16 %v226_v2, %v225_v1  ;;  %v219_v5 = vld [vmem:[%s1445_s20] sm:$0xff]  ;;  %v220_v6 = vld [vmem:[%s1445_s20 + $0x18] sm:$0xff]  ;;  %v221_v11 = vld [vmem:[%s1445_s20 + $0x30] sm:$0x1] }
  0x11   : > { %v222_v7 = vmul.f32 0.17677669, %v219_v5  ;;  %v223_v8 = vmul.f32 0.17677669, %v220_v6  ;;  %v224_v13 = vmul.f32 0.17677669, %v221_v11 }
  0x12   : > { %1301 = vmatprep.subr.msk.bf16.mxu1 %vm235_vm0, %v1450_v3  ;;  %v246_v9 = vsel %vm235_vm0, %v1450_v3, 0  ;;  %v243_v12 = vsel %vm235_vm0, %v1452_v4, 0  ;;  %v230_v22 = vld [vmem:[%s1445_s20 + $0x40] sm:$0x1]  ;;  %v228_v23 = vld [vmem:[%s1445_s20 + $0x10] sm:$0xff]  ;;  %v229_v24 = vld [vmem:[%s1445_s20 + $0x28] sm:$0xff] }
  0x13   : > { %1218 = vmatpush3.bf16.xpose.msra.mxu1 %v246_v9  ;;  %v1460_v10 = vpack.c.bf16 %v223_v8, %v222_v7  ;;  %v1469_v14 = vpack.c.bf16 %v224_v13, %v224_v13  ;;  %v1483_v25 = vpack.c.bf16 %v230_v22, %v230_v22  ;;  %v1489_v29 = vpack.c.bf16 %v229_v24, %v228_v23 }
  0x14   : > { %1302 = vmatprep.subr.msk.bf16.mxu1 %vm235_vm0, %v1452_v4 }
  0x15   : > { %1221 = vmatprep.mubr.msk.bf16.mxu1 %vm235_vm0, %v1460_v10  ;;  %v342_v28 = vand.u32 %v1485_v27, %v1483_v25 }
  0x1b   : > { %1220 = vmatpush3.bf16.xpose.msra.mxu1 %v243_v12 }
  0x1c   : > { %1225 = vmatprep.subr.bf16.mxu1 %v342_v28 }
  0x22   : > { %1222 = vmatmul.mubr.msk.bf16.vlgmr.msra.gmra.mxu1 %vm235_vm0, %v1469_v14 }
  0x23   : > { %1226 = vmatpush3.bf16.msra.mxu1 %v342_v28 }
  0x24   : > { %1227 = vmatprep.subr.bf16.mxu1 %v1489_v29 }
  0x27   : > { %1228 = vmatpush3.bf16.msra.mxu1 %v1489_v29 }
  0xe2   : > { %v1223_v15 = vpop.f32.mrf.mxu1 }
  0xe3   : > { %v304_v16 = vsel %vm303_vm1, %v1223_v15, -inf }
  0xe4   : > { %305 = vmax.xlane.f32.xlu1 %v304_v16  ;;  %v282_v17 = vpop.f32.mrf.mxu1 }
  0xe5   : > { %v297_v18 = vsel %vm296_vm2, %v282_v17, -inf }
  0xe6   : > { %298 = vmax.xlane.f32.xlu0 %v297_v18  ;;  %v1224_v19 = vpop.f32.mrf.mxu1 }
  0xe8   : > { %v285_v20 = vpop.f32.mrf.mxu1 }
  0xe9   : > { %v300_v21 = vsel %vm296_vm2, %v285_v20, -inf }
  0xea   : > { %301 = vmax.xlane.f32.xlu0 %v300_v21 }
  0xf5   : > { %405 = vrot.lane.b32.xlu1 %v1450_v3, %s1402_s21 }
  0xf9   : > { %397 = vrot.lane.b32.xlu1 %v1460_v10, %s1402_s21 }
  0xfd   : > { %399 = vrot.lane.b32.xlu1 %v1469_v14, %s1402_s21 }
 0x100   : > { %403 = vrot.lane.b32.xlu0 %v1452_v4, %s1402_s21 }
 0x16d   : > { %v306_v30 = vpop.xlane.xlu1 %305 }
 0x16e   : > { %v309_v31 = vsub.f32 %v1223_v15, %v306_v30 }
 0x16f   : > { %v299_v32 = vpop.xlane.xlu0 %298 }
 0x170   : > { %v307_v33 = vsub.f32 %v282_v17, %v299_v32  ;;  %v314_v35 = vmul.f32 1.442695, %v309_v31 }
 0x171   : > { %v406_v34 = vpop.permute.xlu1 %405 }
 0x172   : > { %1303 = vmatprep.subr.msk.bf16.mxu1 %vm235_vm0, %v406_v34  ;;  %v310_v36 = vmul.f32 1.442695, %v307_v33  ;;  %1346 = vpow2.f32 %v314_v35  ;;  %v417_v44 = vsel %vm235_vm0, %v406_v34, 0 }
 0x173   : > { %v302_v37 = vpop.xlane.xlu0 %301 }
 0x174   : > { %v308_v38 = vsub.f32 %v285_v20, %v302_v37  ;;  %1348 = vpow2.f32 %v310_v36 }
 0x175   : > { %v398_v46 = vpop.permute.xlu1 %397 }
 0x176   : > { %v312_v39 = vmul.f32 1.442695, %v308_v38 }
 0x177   : > { %v404_v47 = vpop.permute.xlu0 %403 }
 0x178   : > { %1350 = vpow2.f32 %v312_v39  ;;  %v414_v48 = vsel %vm235_vm0, %v404_v47, 0 }
 0x179   : > { %v400_v49 = vpop.permute.xlu1 %399 }
 0x17f   : > { %v1498_v40 = vpop.eup %1346 }
 0x180   : > { %v329_v45 = vpack.c.bf16 %v1498_v40, %v1498_v40 }
 0x181   : > { %v1500_v41 = vpop.eup %1348 }
 0x185   : > { %v1502_v42 = vpop.eup %1350 }
 0x186   : > { %v328_v43 = vpack.c.bf16 %v1502_v42, %v1500_v41 }
 0x188   : > { %1229 = vmatprep.mubr.msk.bf16.mxu1 %vm296_vm2, %v328_v43 }
 0x189   : > { %1230 = vmatmul.mubr.msk.bf16.vlgmr.msra.gmra.mxu1 %vm296_vm2, %v329_v45 }
 0x18a   : > { %1234 = vmatpush3.bf16.xpose.msra.mxu1 %v417_v44  ;;  %1237 = vmatprep.mubr.msk.bf16.mxu1 %vm235_vm0, %v398_v46 }
 0x18b   : > { %1304 = vmatprep.subr.msk.bf16.mxu1 %vm235_vm0, %v404_v47 }
 0x192   : > { %1236 = vmatpush3.bf16.xpose.msra.mxu1 %v414_v48 }
 0x199   : > { %1238 = vmatmul.mubr.msk.bf16.vlgmr.msra.gmra.mxu1 %vm235_vm0, %v400_v49 }
 0x249   : > { %v1515_v50 = vpop.f32.mrf.mxu1 }
 0x24b   : > { %v1517_v51 = vpop.f32.mrf.mxu1 }
 0x24d   : > { %v1232_v52 = vpop.f32.mrf.mxu1 }
 0x24f   : > { %v1519_v53 = vpop.f32.mrf.mxu1 }
 0x259   : > { %v1239_v54 = vpop.f32.mrf.mxu1 }
 0x25a   : > { %v473_v55 = vsel %vm303_vm1, %v1239_v54, -inf }
 0x25b   : > { %474 = vmax.xlane.f32.xlu0 %v473_v55  ;;  %v453_v56 = vpop.f32.mrf.mxu1 }
 0x25c   : > { %v467_v57 = vsel %vm296_vm2, %v453_v56, -inf }
 0x25d   : > { %468 = vmax.xlane.f32.xlu1 %v467_v57  ;;  %v1240_v58 = vpop.f32.mrf.mxu1 }
 0x25f   : > { %v456_v59 = vpop.f32.mrf.mxu1 }
 0x260   : > { %v470_v60 = vsel %vm296_vm2, %v456_v59, -inf }
 0x261   : > { %471 = vmax.xlane.f32.xlu0 %v470_v60 }
 0x26e   : > { %501 = vrot.lane.b32.xlu1 %v1489_v29, %s1402_s21 }
 0x272   : > { %572 = vrot.lane.b32.xlu1 %v1450_v3, %s1404_s22 }
 0x276   : > { %570 = vrot.lane.b32.xlu1 %v1452_v4, %s1404_s22 }
 0x277   : > { %503 = vrot.lane.b32.xlu0 %v1483_v25, %s1402_s21 }
 0x27a   : > { %568 = vrot.lane.b32.xlu1 %v1469_v14, %s1404_s22 }
 0x27b   : > { %566 = vrot.lane.b32.xlu0 %v1460_v10, %s1404_s22 }
 0x27e   : > { %666 = vrot.lane.b32.xlu1 %v1489_v29, %s1404_s22 }
 0x2e4   : > { %v475_v61 = vpop.xlane.xlu0 %474 }
 0x2e5   : > { %v478_v62 = vsub.f32 %v1239_v54, %v475_v61 }
 0x2e6   : > { %v469_v63 = vpop.xlane.xlu1 %468 }
 0x2e7   : > { %v476_v0 = vsub.f32 %v453_v56, %v469_v63  ;;  %v483_v1 = vmul.f32 1.442695, %v478_v62 }
 0x2e9   : > { %v479_v2 = vmul.f32 1.442695, %v476_v0  ;;  %1352 = vpow2.f32 %v483_v1 }
 0x2ea   : > { %v472_v5 = vpop.xlane.xlu0 %471  ;;  %v502_v9 = vpop.permute.xlu1 %501 }
 0x2eb   : > { %v477_v6 = vsub.f32 %v456_v59, %v472_v5  ;;  %1354 = vpow2.f32 %v479_v2 }
 0x2ed   : > { %v481_v7 = vmul.f32 1.442695, %v477_v6 }
 0x2ee   : > { %v504_v8 = vpop.permute.xlu0 %503  ;;  %v573_v12 = vpop.permute.xlu1 %572 }
 0x2ef   : > { %1356 = vpow2.f32 %v481_v7  ;;  %v513_v11 = vand.u32 %v504_v8, %v1485_v27  ;;  %v584_v18 = vsel %vm235_vm0, %v573_v12, 0 }
 0x2f1   : > { %1241 = vmatprep.subr.bf16.mxu0 %v513_v11 }
 0x2f2   : > { %1242 = vmatpush3.bf16.msra.mxu0 %v513_v11  ;;  %v567_v20 = vpop.permute.xlu0 %566  ;;  %v571_v21 = vpop.permute.xlu1 %570 }
 0x2f3   : > { %1243 = vmatprep.subr.bf16.mxu0 %v502_v9  ;;  %v581_v22 = vsel %vm235_vm0, %v571_v21, 0 }
 0x2f6   : > { %1244 = vmatpush3.bf16.msra.mxu0 %v502_v9  ;;  %v1540_v13 = vpop.eup %1352  ;;  %v569_v23 = vpop.permute.xlu1 %568 }
 0x2f7   : > { %1305 = vmatprep.subr.msk.bf16.mxu0 %vm235_vm0, %v573_v12  ;;  %v498_v19 = vpack.c.bf16 %v1540_v13, %v1540_v13 }
 0x2f8   : > { %v1542_v15 = vpop.eup %1354 }
 0x2fa   : > { %v667_v43 = vpop.permute.xlu1 %666 }
 0x2fc   : > { %v1544_v16 = vpop.eup %1356 }
 0x2fd   : > { %v497_v17 = vpack.c.bf16 %v1544_v16, %v1542_v15 }
 0x2ff   : > { %1245 = vmatprep.mubr.msk.bf16.mxu0 %vm296_vm2, %v497_v17  ;;  %v485_v17 = vsel %vm296_vm2, %v1542_v15, 0.0 }
 0x300   : > { %1246 = vmatmul.mubr.msk.bf16.vlgmr.msra.gmra.mxu0 %vm296_vm2, %v498_v19  ;;  %v488_v19 = vsel %vm296_vm2, %v1544_v16, 0.0 }
 0x301   : > { %1250 = vmatpush3.bf16.xpose.msra.mxu0 %v584_v18  ;;  %1253 = vmatprep.mubr.msk.bf16.mxu0 %vm235_vm0, %v567_v20 }
 0x302   : > { %1306 = vmatprep.subr.msk.bf16.mxu0 %vm235_vm0, %v571_v21  ;;  %v491_v21 = vsel %vm303_vm1, %v1540_v13, 0.0 }
 0x309   : > { %1252 = vmatpush3.bf16.xpose.msra.mxu0 %v581_v22 }
 0x310   : > { %1254 = vmatmul.mubr.msk.bf16.vlgmr.msra.gmra.mxu0 %vm235_vm0, %v569_v23 }
 0x3c0   : > { %v1557_v24 = vpop.f32.mrf.mxu0 }
 0x3c2   : > { %v1559_v26 = vpop.f32.mrf.mxu0 }
 0x3c4   : > { %v1248_v28 = vpop.f32.mrf.mxu0 }
 0x3c6   : > { %v1561_v30 = vpop.f32.mrf.mxu0 }
 0x3d0   : > { %v1255_v31 = vpop.f32.mrf.mxu0 }
 0x3d1   : > { %v640_v32 = vsel %vm303_vm1, %v1255_v31, -inf }
 0x3d2   : > { %641 = vmax.xlane.f32.xlu0 %v640_v32  ;;  %v620_v33 = vpop.f32.mrf.mxu0 }
 0x3d3   : > { %v634_v35 = vsel %vm296_vm2, %v620_v33, -inf }
 0x3d4   : > { %v1256_v34 = vpop.f32.mrf.mxu0 }
 0x3d6   : > { %635 = vmax.xlane.f32.xlu0 %v634_v35  ;;  %v623_v36 = vpop.f32.mrf.mxu0 }
 0x3d7   : > { %v637_v37 = vsel %vm296_vm2, %v623_v36, -inf }
 0x3d8   : > { %638 = vmax.xlane.f32.xlu1 %v637_v37 }
 0x3e9   : > { %737 = vrot.lane.b32.xlu1 %v1450_v3, %s1405_s23 }
 0x3ec   : > { %668 = vrot.lane.b32.xlu0 %v1483_v25, %s1404_s22 }
 0x3ed   : > { %731 = vrot.lane.b32.xlu1 %v1460_v10, %s1405_s23 }
 0x3f0   : > { %735 = vrot.lane.b32.xlu0 %v1452_v4, %s1405_s23 }
 0x3f4   : > { %733 = vrot.lane.b32.xlu0 %v1469_v14, %s1405_s23 }
 0x45b   : > { %v642_v38 = vpop.xlane.xlu0 %641 }
 0x45c   : > { %v645_v39 = vsub.f32 %v1255_v31, %v642_v38 }
 0x45e   : > { %v650_v45 = vmul.f32 1.442695, %v645_v39 }
 0x45f   : > { %v636_v44 = vpop.xlane.xlu0 %635 }
 0x460   : > { %v643_v46 = vsub.f32 %v620_v33, %v636_v44  ;;  %1358 = vpow2.f32 %v650_v45 }
 0x461   : > { %v639_v47 = vpop.xlane.xlu1 %638 }
 0x462   : > { %v646_v3 = vmul.f32 1.442695, %v643_v46  ;;  %v644_v48 = vsub.f32 %v623_v36, %v639_v47  ;;  %v316_v47 = vsel %vm296_vm2, %v1500_v41, 0.0 }
 0x463   : > { %v669_v49 = vpop.permute.xlu0 %668 }
 0x464   : > { %v648_v52 = vmul.f32 1.442695, %v644_v48  ;;  %v678_v10 = vand.u32 %v669_v49, %v1485_v27  ;;  %1360 = vpow2.f32 %v646_v3  ;;  %v322_v3 = vsel %vm303_vm1, %v1498_v40, 0.0 }
 0x465   : > { %v738_v4 = vpop.permute.xlu1 %737 }
 0x466   : > { %1362 = vpow2.f32 %v648_v52  ;;  %1257 = vmatprep.subr.bf16.mxu1 %v678_v10  ;;  %v749_v57 = vsel %vm235_vm0, %v738_v4, 0 }
 0x467   : > { %1258 = vmatpush3.bf16.msra.mxu1 %v678_v10  ;;  %v736_v60 = vpop.permute.xlu0 %735 }
 0x468   : > { %1259 = vmatprep.subr.bf16.mxu1 %v667_v43  ;;  %v746_v61 = vsel %vm235_vm0, %v736_v60, 0 }
 0x469   : > { %v732_v59 = vpop.permute.xlu1 %731 }
 0x46b   : > { %1260 = vmatpush3.bf16.msra.mxu1 %v667_v43  ;;  %v734_v62 = vpop.permute.xlu0 %733 }
 0x46c   : > { %1307 = vmatprep.subr.msk.bf16.mxu1 %vm235_vm0, %v738_v4 }
 0x46d   : > { %v1359_v14 = vpop.eup %1358 }
 0x46e   : > { %v665_v58 = vpack.c.bf16 %v1359_v14, %v1359_v14  ;;  %v658_v20 = vsel %vm303_vm1, %v1359_v14, 0.0 }
 0x471   : > { %v1361_v54 = vpop.eup %1360 }
 0x472   : > { %v652_v18 = vsel %vm296_vm2, %v1361_v54, 0.0 }
 0x473   : > { %v1363_v55 = vpop.eup %1362 }
 0x474   : > { %v664_v56 = vpack.c.bf16 %v1363_v55, %v1361_v54 }
 0x476   : > { %1261 = vmatprep.mubr.msk.bf16.mxu1 %vm296_vm2, %v664_v56 }
 0x477   : > { %1262 = vmatmul.mubr.msk.bf16.vlgmr.msra.gmra.mxu1 %vm296_vm2, %v665_v58 }
 0x478   : > { %1266 = vmatpush3.bf16.xpose.msra.mxu1 %v749_v57  ;;  %1269 = vmatprep.mubr.msk.bf16.mxu1 %vm235_vm0, %v732_v59 }
 0x479   : > { %1308 = vmatprep.subr.msk.bf16.mxu1 %vm235_vm0, %v736_v60 }
 0x480   : > { %1268 = vmatpush3.bf16.xpose.msra.mxu1 %v746_v61 }
 0x487   : > { %1270 = vmatmul.mubr.msk.bf16.vlgmr.msra.gmra.mxu1 %vm235_vm0, %v734_v62 }
 0x537   : > { %v1585_v63 = vpop.f32.mrf.mxu1 }
 0x539   : > { %v1587_v0 = vpop.f32.mrf.mxu1 }
 0x53b   : > { %v1264_v1 = vpop.f32.mrf.mxu1 }
 0x53d   : > { %v1589_v2 = vpop.f32.mrf.mxu1 }
 0x547   : > { %v1271_v5 = vpop.f32.mrf.mxu1 }
 0x548   : > { %v805_v6 = vsel %vm303_vm1, %v1271_v5, -inf }
 0x549   : > { %806 = vmax.xlane.f32.xlu0 %v805_v6  ;;  %v785_v7 = vpop.f32.mrf.mxu1 }
 0x54a   : > { %v799_v8 = vsel %vm296_vm2, %v785_v7, -inf }
 0x54b   : > { %800 = vmax.xlane.f32.xlu1 %v799_v8  ;;  %v1272_v9 = vpop.f32.mrf.mxu1  ;;  %v1343_v8 = vld [vmem:[%s1676_s2 + $0x10] sm:$0xff]  }
 0x54c   : > { %v1344_v9 = vld [vmem:[%s1676_s2 + $0x8] sm:$0xff]  }
 0x54d   : > { %v788_v11 = vpop.f32.mrf.mxu1 }
 0x54e   : > { %v802_v12 = vsel %vm296_vm2, %v788_v11, -inf }
 0x54f   : > { %803 = vmax.xlane.f32.xlu0 %v802_v12 }
 0x55c   : > { %831 = vrot.lane.b32.xlu1 %v1489_v29, %s1405_s23 }
 0x565   : > { %833 = vrot.lane.b32.xlu0 %v1483_v25, %s1405_s23  ;;  %v655_v25 = vsel %vm296_vm2, %v1363_v55, 0.0 }
 0x580   : > { %486 = vadd.xlane.f32.xlu1 %v485_v17 }
 0x584   : > { %653 = vadd.xlane.f32.xlu1 %v652_v18  ;;  %489 = vadd.xlane.f32.xlu0 %v488_v19 }
 0x588   : > { %659 = vadd.xlane.f32.xlu1 %v658_v20  ;;  %492 = vadd.xlane.f32.xlu0 %v491_v21 }
 0x58c   : > { %656 = vadd.xlane.f32.xlu0 %v655_v25 }
 0x5d2   : > { %v807_v29 = vpop.xlane.xlu0 %806 }
 0x5d3   : > { %v810_v15 = vsub.f32 %v1271_v5, %v807_v29 }
 0x5d4   : > { %v801_v22 = vpop.xlane.xlu1 %800 }
 0x5d5   : > { %v808_v23 = vsub.f32 %v785_v7, %v801_v22  ;;  %v815_v28 = vmul.f32 1.442695, %v810_v15 }
 0x5d7   : > { %v811_v31 = vmul.f32 1.442695, %v808_v23 }
 0x5d8   : > { %v804_v32 = vpop.xlane.xlu0 %803  ;;  %v832_v35 = vpop.permute.xlu1 %831 }
 0x5d9   : > { %1364 = vpow2.f32 %v811_v31  ;;  %v809_v16 = vsub.f32 %v788_v11, %v804_v32  ;;  %v1345_v11 = vld [vmem:[%s1676_s2] sm:$0xff]  }
 0x5da   : > { %1366 = vpow2.f32 %v815_v28 }
 0x5db   : > { %v813_v33 = vmul.f32 1.442695, %v809_v16 }
 0x5dc   : > { %v834_v34 = vpop.permute.xlu0 %833 }
 0x5dd   : > { %1368 = vpow2.f32 %v813_v33  ;;  %v843_v13 = vand.u32 %v834_v34, %v1485_v27  ;;  %v319_v27 = vsel %vm296_vm2, %v1502_v42, 0.0 }
 0x5df   : > { %1273 = vmatprep.subr.bf16.mxu0 %v843_v13 }
 0x5e0   : > { %1274 = vmatpush3.bf16.msra.mxu0 %v843_v13 }
 0x5e1   : > { %1275 = vmatprep.subr.bf16.mxu0 %v832_v35 }
 0x5e4   : > { %1276 = vmatpush3.bf16.msra.mxu0 %v832_v35 }
 0x5e6   : > { %v1365_v36 = vpop.eup %1364 }
 0x5e7   : > { %v817_v37 = vsel %vm296_vm2, %v1365_v36, 0.0  ;;  %v1367_v38 = vpop.eup %1366 }
 0x5e8   : > { %818 = vadd.xlane.f32.xlu0 %v817_v37  ;;  %v823_v43 = vsel %vm303_vm1, %v1367_v38, 0.0  ;;  %v830_v46 = vpack.c.bf16 %v1367_v38, %v1367_v38 }
 0x5ea   : > { %v1369_v39 = vpop.eup %1368 }
 0x5eb   : > { %v820_v44 = vsel %vm296_vm2, %v1369_v39, 0.0  ;;  %v829_v45 = vpack.c.bf16 %v1369_v39, %v1365_v36 }
 0x5ec   : > { %824 = vadd.xlane.f32.xlu0 %v823_v43  ;;  %821 = vadd.xlane.f32.xlu1 %v820_v44 }
 0x5ed   : > { %1277 = vmatprep.mubr.msk.bf16.mxu0 %vm296_vm2, %v829_v45 }
 0x5ee   : > { %1278 = vmatmul.mubr.msk.bf16.vlgmr.msra.gmra.mxu0 %vm296_vm2, %v830_v46 }
 0x5f0   : > { %320 = vadd.xlane.f32.xlu0 %v319_v27  ;;  %317 = vadd.xlane.f32.xlu1 %v316_v47 }
 0x5f4   : > { %323 = vadd.xlane.f32.xlu1 %v322_v3 }
 0x609   : > { %v487_v48 = vpop.xlane.xlu1 %486 }
 0x60a   : > { %1370 = vrcp.f32 %v487_v48 }
 0x60d   : > { %v490_v49 = vpop.xlane.xlu0 %489  ;;  %v654_v52 = vpop.xlane.xlu1 %653 }
 0x60e   : > { %1372 = vrcp.f32 %v490_v49 }
 0x611   : > { %v493_v10 = vpop.xlane.xlu0 %492  ;;  %v660_v42 = vpop.xlane.xlu1 %659 }
 0x612   : > { %1374 = vrcp.f32 %v493_v10 }
 0x613   : > { %1376 = vrcp.f32 %v654_v52 }
 0x615   : > { %v657_v4 = vpop.xlane.xlu0 %656 }
 0x616   : > { %1378 = vrcp.f32 %v657_v4 }
 0x617   : > { %v1371_v14 = vpop.eup %1370  ;;  %1380 = vrcp.f32 %v660_v42 }
 0x618   : > { %v563_v54 = vmul.f32 %v1371_v14, %v1559_v26 }
 0x61b   : > { %v1373_v41 = vpop.eup %1372 }
 0x61c   : > { %v564_v55 = vmul.f32 %v1373_v41, %v1561_v30  ;;  %v1338_v30 = vld [vmem:[%s1676_s2 + $0x38] sm:$0xff]  }
 0x61d   : > { %1281 = vmatprep.subr.bf16.mxu0 %v1338_v30 }
 0x61e   : > { %v1323_v40 = vpack.i.bf16 %v564_v55, %v563_v54  ;;  %1282 = vmatpush3.bf16.msra.mxu0 %v1338_v30 }
 0x61f   : > { %v1375_v56 = vpop.eup %1374 }
 0x620   : > { %v1377_v57 = vpop.eup %1376  ;;  %1324 = vrot.lane.b32.xlu0 %v1323_v40, %s1405_s23  ;;  %v565_v58 = vmul.f32 %v1375_v56, %v1557_v24  ;;  %v1339_v24 = vld [vmem:[%s1676_s2 + $0x30] sm:$0xff]   ;;  %v1164_v40 = vld [vmem:[%s1677_s3] ss:$0 sm:$0xff] }
 0x621   : > { %v728_v60 = vmul.f32 %v1377_v57, %v1587_v0  ;;  %1283 = vmatprep.subr.bf16.mxu0 %v1339_v24  ;;  %v1340_v0 = vld [vmem:[%s1676_s2 + $0x28] sm:$0xff]   ;;  %v1066_v57 = vld [vmem:[%s212_s19 + $0x10] sm:$0x1] }
 0x622   : > { %903 = vrot.lane.b32.xlu1 %v565_v58, %s1405_s23  ;;  %1284 = vmatpush3.bf16.msra.mxu0 %v1339_v24  ;;  %v1065_v24 = vld [vmem:[%s212_s19 + $0x8] sm:$0xff] }
 0x623   : > { %v1379_v59 = vpop.eup %1378  ;;  %1285 = vmatprep.subr.bf16.mxu0 %v1340_v0 }
 0x624   : > { %v729_v61 = vmul.f32 %v1379_v59, %v1589_v2  ;;  %v1381_v1 = vpop.eup %1380  ;;  %v1342_v2 = vld [vmem:[%s1676_s2 + $0x18] sm:$0xff]  }
 0x625   : > { %v730_v26 = vmul.f32 %v1381_v1, %v1585_v63  ;;  %v1341_v63 = vld [vmem:[%s1676_s2 + $0x20] sm:$0xff]  }
 0x626   : > { %v1328_v62 = vpack.i.bf16 %v729_v61, %v728_v60  ;;  %1286 = vmatpush3.bf16.msra.mxu0 %v1340_v0  ;;  %v1064_v60 = vld [vmem:[%s212_s19] sm:$0xff] }
 0x627   : > { %1287 = vmatprep.subr.bf16.mxu0 %v1341_v63 }
 0x628   : > { %1329 = vrot.lane.b32.xlu1 %v1328_v62, %s1404_s22 }
 0x62a   : > { %1288 = vmatpush3.bf16.msra.mxu0 %v1341_v63 }
 0x62b   : > { %1289 = vmatprep.subr.bf16.mxu0 %v1342_v2 }
 0x62c   : > { %915 = vrot.lane.b32.xlu1 %v730_v26, %s1404_s22 }
 0x62e   : > { %1290 = vmatpush3.bf16.msra.mxu0 %v1342_v2 }
 0x62f   : > { %1291 = vmatprep.subr.bf16.mxu0 %v1343_v8 }
 0x632   : > { %1292 = vmatpush3.bf16.msra.mxu0 %v1343_v8 }
 0x633   : > { %1293 = vmatprep.subr.bf16.mxu0 %v1344_v9 }
 0x636   : > { %1294 = vmatpush3.bf16.msra.mxu0 %v1344_v9 }
 0x637   : > { %1295 = vmatprep.subr.bf16.mxu0 %v1345_v11 }
 0x63a   : > { %1296 = vmatpush3.bf16.msra.mxu0 %v1345_v11 }
 0x671   : > { %v819_v5 = vpop.xlane.xlu0 %818 }
 0x675   : > { %v825_v6 = vpop.xlane.xlu0 %824  ;;  %v822_v7 = vpop.xlane.xlu1 %821 }
 0x676   : > { %1382 = vrcp.f32 %v825_v6 }
 0x677   : > { %1384 = vrcp.f32 %v819_v5 }
 0x678   : > { %1386 = vrcp.f32 %v822_v7 }
 0x679   : > { %v318_v28 = vpop.xlane.xlu1 %317  ;;  %v321_v31 = vpop.xlane.xlu0 %320 }
 0x67a   : > { %1388 = vrcp.f32 %v321_v31 }
 0x67d   : > { %v324_v32 = vpop.xlane.xlu1 %323 }
 0x67e   : > { %1390 = vrcp.f32 %v324_v32 }
 0x67f   : > { %1392 = vrcp.f32 %v318_v28 }
 0x683   : > { %v1383_v12 = vpop.eup %1382 }
 0x684   : > { %v1385_v21 = vpop.eup %1384 }
 0x685   : > { %v1387_v25 = vpop.eup %1386 }
 0x687   : > { %v1389_v13 = vpop.eup %1388 }
 0x688   : > { %v393_v43 = vmul.f32 %v1389_v13, %v1519_v53 }
 0x68b   : > { %v1391_v35 = vpop.eup %1390 }
 0x68c   : > { %v1393_v37 = vpop.eup %1392  ;;  %v394_v44 = vmul.f32 %v1391_v35, %v1515_v50 }
 0x68d   : > { %v392_v27 = vmul.f32 %v1393_v37, %v1517_v51 }
 0x692   : > { %v1325_v34 = vpop.permute.xlu0 %1324 }
 0x693   : > { %v1327_v38 = vunpack.i.h.bf16 %v1325_v34  ;;  %v1326_v39 = vunpack.i.l.bf16 %v1325_v34 }
 0x694   : > { %v904_v16 = vpop.permute.xlu1 %903 }
 0x695   : > { %v933_v3 = vsel %vm235_vm0, %v393_v43, %v1327_v38  ;;  %v934_v48 = vsel %vm235_vm0, %v394_v44, %v904_v16  ;;  %v932_v52 = vsel %vm235_vm0, %v392_v27, %v1326_v39 }
 0x69a   : > { %v1330_v33 = vpop.permute.xlu1 %1329 }
 0x69b   : > { %v1332_v45 = vunpack.i.h.bf16 %v1330_v33  ;;  %v1331_v46 = vunpack.i.l.bf16 %v1330_v33 }
 0x69d   : > { %v936_v42 = vsel %vm935_vm4, %v932_v52, %v1331_v46  ;;  %v937_v50 = vsel %vm935_vm4, %v933_v3, %v1332_v45 }
 0x69e   : > { %v916_v36 = vpop.permute.xlu1 %915 }
 0x69f   : > { %v938_v10 = vsel %vm935_vm4, %v934_v48, %v916_v36 }
 0x6ae   : > { %v1279_v17 = vpop.f32.mrf.mxu0 }
 0x6af   : > { %v895_v18 = vmul.f32 %v1383_v12, %v1279_v17 }
 0x6b0   : > { %v879_v19 = vpop.f32.mrf.mxu0 }
 0x6b1   : > { %927 = vrot.lane.b32.xlu1 %v895_v18, %s1402_s21  ;;  %v893_v15 = vmul.f32 %v1385_v21, %v879_v19 }
 0x6b2   : > { %v1280_v20 = vpop.f32.mrf.mxu0 }
 0x6b4   : > { %v882_v29 = vpop.f32.mrf.mxu0 }
 0x6b5   : > { %v894_v22 = vmul.f32 %v1387_v25, %v882_v29 }
 0x6b7   : > { %v1333_v23 = vpack.i.bf16 %v894_v22, %v893_v15 }
 0x6b9   : > { %1334 = vrot.lane.b32.xlu0 %v1333_v23, %s1402_s21 }
 0x723   : > { %v928_v47 = vpop.permute.xlu1 %927 }
 0x724   : > { %v942_v14 = vsel %vm939_vm5, %v938_v10, %v928_v47 }
 0x725   : > { %v944_v55 = vpack.c.bf16 %v942_v14, %v942_v14 }
 0x72b   : > { %v1335_v49 = vpop.permute.xlu0 %1334 }
 0x72c   : > { %v1337_v4 = vunpack.i.h.bf16 %v1335_v49  ;;  %v1336_v53 = vunpack.i.l.bf16 %v1335_v49 }
 0x72e   : > { %v940_v41 = vsel %vm939_vm5, %v936_v42, %v1336_v53  ;;  %v941_v54 = vsel %vm939_vm5, %v937_v50, %v1337_v4 }
 0x72f   : > { %v943_v51 = vpack.c.bf16 %v941_v54, %v940_v41 }
 0x731   : > { %1297 = vmatprep.mubr.bf16.mxu0 %v943_v51 }
 0x732   : > { %1298 = vmatmul.mubr.bf16.vlgmr.msra.gmra.mxu0 %v944_v55 }
 0x7f2   : > { %v1299_v56 = vpop.f32.mrf.mxu0 }
 0x7f3   : > { %v1059_v58 = vadd.f32 %v1299_v56, %v1164_v40 }
 0x7f4   : > { %v1050_v59 = vpop.f32.mrf.mxu0 }
 0x7f5   : > { %v1069_v61 = vadd.f32 %v1066_v57, %v1059_v58  ;;  %v1051_v62 = vadd.f32 %v1164_v40, %v1050_v59 }
 0x7f6   : > { %v1300_v1 = vpop.f32.mrf.mxu0 }
 0x7f7   : > { %1072 = vst [vmem:[%s217_s24 + $0x10] sm:$0x1] %v1069_v61  ;;  %v1067_v26 = vadd.f32 %v1064_v60, %v1051_v62 }
 0x7f8   : > { %v1053_v30 = vpop.f32.mrf.mxu0 }
 0x7f9   : > { %1070 = vst [vmem:[%s217_s24] sm:$0xff] %v1067_v26  ;;  %v1054_v0 = vadd.f32 %v1164_v40, %v1053_v30 }
 0x7fb   : > { %v1068_v63 = vadd.f32 %v1065_v24, %v1054_v0 }
 0x7fd   : > { %1071 = vst [vmem:[%s217_s24 + $0x8] sm:$0xff] %v1068_v63 }
 0x7fe PF: > { %s14_s15 = sadd.s32 1, %s1400_s15  }
 0x7ff   : > { %p11_p4 = scmp.ge.s32.totalorder %s14_s15, 4  }
 0x801   :  { %13 = sbr.rel (!%p11_p4) target bundleno = 1 (0x1), region = 69 }

</bundles_post_ra>
